<compile_context>
chip_gen: v5e
topology: v5e:2x2
jax: 0.10.0
libtpu: 0.0.40
codegen_flags: <defaults>
</compile_context>

<pallas_src>
import jax
import jax.numpy as jnp
from jax import lax
from jax.experimental import pallas as pl
from jax.experimental.pallas import tpu as pltpu

KSIZE = 3
LN_EPS = 1e-5  # torch.nn.LayerNorm default eps


def _identity_block_kernel(x_ref, w_ref, b_ref, gamma_ref, beta_ref, out_ref, xpad_ref):
    # x_ref    : (BB, C, H, W)      VMEM   input block (BB batch elements)
    # w_ref    : (C*C*9,)           SMEM   flat conv weights, idx = ((co*C+ci)*3+dy)*3+dx
    # b_ref    : (C,)               SMEM   conv bias
    # gamma_ref: (1, W)             VMEM   LayerNorm weight
    # beta_ref : (1, W)             VMEM   LayerNorm bias
    # out_ref  : (BB, C, H, W)      VMEM
    # xpad_ref : (BB, C, H+2, W+2)  VMEM scratch: zero-padded copy of the input block
    BB, C, H, W = out_ref.shape

    # ---- build the zero-padded input inside the kernel --------------------------------------
    xpad_ref[...] = jnp.zeros_like(xpad_ref)
    xpad_ref[:, :, 1:H + 1, 1:W + 1] = x_ref[...].astype(jnp.float32)

    # ---- 3x3 conv, stride 1 (padding already in the scratch) --------------------------------
    # One f32 accumulator per output channel, bias-initialized; the C independent chains
    # interleave in the inner loop -> ILP across the 4 VALU slots.
    accs = [jnp.full((BB, H, W), b_ref[co], jnp.float32) for co in range(C)]

    # ci/dy/dx outermost: each shifted window is materialized once and reused for every co.
    for ci in range(C):
        for dy in range(KSIZE):
            for dx in range(KSIZE):
                shifted = xpad_ref[:, ci, dy:dy + H, dx:dx + W]   # (BB, H, W) f32
                base = (ci * KSIZE + dy) * KSIZE + dx
                for co in range(C):
                    accs[co] = accs[co] + shifted * w_ref[co * C * KSIZE * KSIZE + base]

    # Stack along a leading (untiled) axis: register-level concat, no VMEM round-trip.
    y = jnp.stack(accs, axis=1)                             # (BB, C, H, W) f32

    # ---- LayerNorm over the last axis (n_step) + ReLU, vectorized over (BB, C, H) -----------
    gamma = gamma_ref[...].astype(jnp.float32)              # (1, W), loaded + broadcast once
    beta = beta_ref[...].astype(jnp.float32)

    mean = jnp.mean(y, axis=-1, keepdims=True)
    centered = y - mean
    var = jnp.mean(centered * centered, axis=-1, keepdims=True)
    yn = centered * lax.rsqrt(var + LN_EPS)                 # rsqrt -> EUP (free slot)
    out = jnp.maximum(yn * gamma + beta, 0.0)
    out_ref[...] = out.astype(out_ref.dtype)                # single full-block store


def _pick_batch_block(batch):
    """Largest BB <= 4 dividing batch, preferring >= 2 grid steps (v7x has 2 TensorCores)."""
    divisors = [bb for bb in range(min(batch, 4), 0, -1) if batch % bb == 0]
    for bb in divisors:
        if batch // bb >= 2:
            return bb
    return divisors[0]


def identity_block_forward(x, w, b, gamma, beta, *, batch_block=None):
    """x: (B, C, H, W) f32; w: (C, C, 3, 3); b: (C,); gamma/beta: (W,)."""
    B, C, H, W = x.shape
    bb = _pick_batch_block(B) if batch_block is None else batch_block
    assert B % bb == 0, f"batch_block {bb} must divide batch {B}"

    w_flat = w.reshape(-1).astype(jnp.float32)   # row-major (co, ci, dy, dx)
    gamma2 = gamma.reshape(1, W)
    beta2 = beta.reshape(1, W)

    return pl.pallas_call(
        _identity_block_kernel,
        out_shape=jax.ShapeDtypeStruct((B, C, H, W), x.dtype),
        grid_spec=pltpu.PrefetchScalarGridSpec(
            num_scalar_prefetch=0,
            grid=(B // bb,),
            in_specs=[
                pl.BlockSpec((bb, C, H, W), lambda i: (i, 0, 0, 0)),  # input block
                pl.BlockSpec(memory_space=pltpu.MemorySpace.SMEM),    # conv weights (flat)
                pl.BlockSpec(memory_space=pltpu.MemorySpace.SMEM),    # conv bias
                pl.BlockSpec((1, W), lambda i: (0, 0)),               # LN gamma
                pl.BlockSpec((1, W), lambda i: (0, 0)),               # LN beta
            ],
            out_specs=pl.BlockSpec((bb, C, H, W), lambda i: (i, 0, 0, 0)),
            scratch_shapes=[
                pltpu.VMEM((bb, C, H + 2, W + 2), jnp.float32),       # padded input
            ],
        ),
        compiler_params=pltpu.CompilerParams(dimension_semantics=("parallel",)),
    )(x, w_flat, b.astype(jnp.float32), gamma2, beta2)


def identity_block_ref(x, w, b, gamma, beta):
    """Pure-JAX reference matching the PyTorch forward."""
    out = lax.conv_general_dilated(
        x, w, window_strides=(1, 1), padding=((1, 1), (1, 1)),
        dimension_numbers=("NCHW", "OIHW", "NCHW"))
    out = out + b[None, :, None, None]
    mean = jnp.mean(out, axis=-1, keepdims=True)
    var = jnp.mean(jnp.square(out - mean), axis=-1, keepdims=True)
    out = (out - mean) / jnp.sqrt(var + LN_EPS) * gamma + beta
    return jnp.maximum(out, 0.0)


if __name__ == "__main__":
    t_size, n_step = 4, 16

    key = jax.random.PRNGKey(0)
    kw, kb, kg, kbe, kx1, kx2 = jax.random.split(key, 6)

    # Parameter init (shapes per nn.Conv2d(t_size, t_size, 3) / nn.LayerNorm(n_step)).
    fan_in = t_size * KSIZE * KSIZE
    bound = float(1.0 / (fan_in ** 0.5))
    w = jax.random.uniform(kw, (t_size, t_size, KSIZE, KSIZE), jnp.float32, -bound, bound)
    b = jax.random.uniform(kb, (t_size,), jnp.float32, -bound, bound)
    gamma = 1.0 + 0.1 * jax.random.normal(kg, (n_step,), jnp.float32)
    beta = 0.1 * jax.random.normal(kbe, (n_step,), jnp.float32)

    # B=2 -> BB=1 (2 grid steps); B=8 -> BB=4 (2 grid steps): exercises both blocking paths.
    for B, H, kx in ((2, 16, kx1), (8, 16, kx2)):
        x = jax.random.normal(kx, (B, t_size, H, n_step), dtype=jnp.float32)
        out = jax.block_until_ready(identity_block_forward(x, w, b, gamma, beta))
        ref = identity_block_ref(x, w, b, gamma, beta)
        assert out.shape == (B, t_size, H, n_step)
        max_err = float(jnp.max(jnp.abs(out - ref)))
        assert jnp.allclose(out, ref, atol=1e-4, rtol=1e-4), f"B={B}: max abs err {max_err}"

    print("KERNEL_OK")
</pallas_src>

<mosaic_0001>
module attributes {stable_mosaic.version = 11 : i64} {
  func.func @_identity_block_kernel(%arg0: i32, %arg1: memref<1x4x16x16xf32, #tpu.memory_space<vmem>>, %arg2: memref<144xf32, #tpu.memory_space<smem>>, %arg3: memref<4xf32, #tpu.memory_space<smem>>, %arg4: memref<1x16xf32, #tpu.memory_space<vmem>>, %arg5: memref<1x16xf32, #tpu.memory_space<vmem>>, %arg6: memref<1x4x16x16xf32, #tpu.memory_space<vmem>>, %arg7: memref<1x4x18x18xf32, #tpu.memory_space<vmem>>) attributes {dimension_semantics = [#tpu.dimension_semantics<parallel>], iteration_bounds = array<i64: 2>, scalar_prefetch = 0 : i64, scratch_operands = 1 : i64, tpu.core_type = #tpu.core_type<tc>, window_params = [{transform_indices = @transform_0, window_bounds = array<i64: 1, 4, 16, 16>}, {transform_indices = @transform_1, window_bounds = array<i64: 144>}, {transform_indices = @transform_2, window_bounds = array<i64: 4>}, {pipeline_mode = #tpu.pipeline_mode<synchronous>, transform_indices = @transform_3, window_bounds = array<i64: 1, 16>}, {pipeline_mode = #tpu.pipeline_mode<synchronous>, transform_indices = @transform_4, window_bounds = array<i64: 1, 16>}, {transform_indices = @transform_5, window_bounds = array<i64: 1, 4, 16, 16>}]} {
    %cst = arith.constant 0.000000e+00 : f32
    %0 = vector.broadcast %cst : f32 to vector<1x4x18x18xf32>
    %c0 = arith.constant 0 : index
    %c0_0 = arith.constant 0 : index
    %c0_1 = arith.constant 0 : index
    %c0_2 = arith.constant 0 : index
    %1 = vector.load %arg7[%c0, %c0_0, %c0_1, %c0_2] : memref<1x4x18x18xf32, #tpu.memory_space<vmem>>, vector<1x4x18x18xf32>
    tpu.vector_store %arg7[%c0, %c0_0, %c0_1, %c0_2], %0 {strides = array<i32>} : memref<1x4x18x18xf32, #tpu.memory_space<vmem>>, vector<1x4x18x18xf32>,
    %c0_3 = arith.constant 0 : index
    %c0_4 = arith.constant 0 : index
    %c0_5 = arith.constant 0 : index
    %c0_6 = arith.constant 0 : index
    %2 = vector.load %arg1[%c0_3, %c0_4, %c0_5, %c0_6] : memref<1x4x16x16xf32, #tpu.memory_space<vmem>>, vector<1x4x16x16xf32>
    %c0_7 = arith.constant 0 : index
    %c0_8 = arith.constant 0 : index
    %c1 = arith.constant 1 : index
    %c1_9 = arith.constant 1 : index
    %3 = vector.load %arg7[%c0_7, %c0_8, %c1, %c1_9] : memref<1x4x18x18xf32, #tpu.memory_space<vmem>>, vector<1x4x16x16xf32>
    tpu.vector_store %arg7[%c0_7, %c0_8, %c1, %c1_9], %2 {strides = array<i32>} : memref<1x4x18x18xf32, #tpu.memory_space<vmem>>, vector<1x4x16x16xf32>,
    %c0_10 = arith.constant 0 : index
    %4 = memref.load %arg3[%c0_10] : memref<4xf32, #tpu.memory_space<smem>>
    %5 = vector.broadcast %4 : f32 to vector<1x16x16xf32>
    %c1_11 = arith.constant 1 : index
    %6 = memref.load %arg3[%c1_11] : memref<4xf32, #tpu.memory_space<smem>>
    %7 = vector.broadcast %6 : f32 to vector<1x16x16xf32>
    %c2 = arith.constant 2 : index
    %8 = memref.load %arg3[%c2] : memref<4xf32, #tpu.memory_space<smem>>
    %9 = vector.broadcast %8 : f32 to vector<1x16x16xf32>
    %c3 = arith.constant 3 : index
    %10 = memref.load %arg3[%c3] : memref<4xf32, #tpu.memory_space<smem>>
    %11 = vector.broadcast %10 : f32 to vector<1x16x16xf32>
    %c0_12 = arith.constant 0 : index
    %c0_13 = arith.constant 0 : index
    %c0_14 = arith.constant 0 : index
    %c0_15 = arith.constant 0 : index
    %12 = vector.load %arg7[%c0_12, %c0_13, %c0_14, %c0_15] : memref<1x4x18x18xf32, #tpu.memory_space<vmem>>, vector<1x1x16x16xf32>
    %13 = vector.shape_cast %12 : vector<1x1x16x16xf32> to vector<1x16x16xf32>
    %c0_16 = arith.constant 0 : index
    %14 = memref.load %arg2[%c0_16] : memref<144xf32, #tpu.memory_space<smem>>
    %15 = vector.broadcast %14 : f32 to vector<1x16x16xf32>
    %16 = arith.mulf %13, %15 : vector<1x16x16xf32>
    %17 = arith.addf %5, %16 : vector<1x16x16xf32>
    %c36 = arith.constant 36 : index
    %18 = memref.load %arg2[%c36] : memref<144xf32, #tpu.memory_space<smem>>
    %19 = vector.broadcast %18 : f32 to vector<1x16x16xf32>
    %20 = arith.mulf %13, %19 : vector<1x16x16xf32>
    %21 = arith.addf %7, %20 : vector<1x16x16xf32>
    %c72 = arith.constant 72 : index
    %22 = memref.load %arg2[%c72] : memref<144xf32, #tpu.memory_space<smem>>
    %23 = vector.broadcast %22 : f32 to vector<1x16x16xf32>
    %24 = arith.mulf %13, %23 : vector<1x16x16xf32>
    %25 = arith.addf %9, %24 : vector<1x16x16xf32>
    %c108 = arith.constant 108 : index
    %26 = memref.load %arg2[%c108] : memref<144xf32, #tpu.memory_space<smem>>
    %27 = vector.broadcast %26 : f32 to vector<1x16x16xf32>
    %28 = arith.mulf %13, %27 : vector<1x16x16xf32>
    %29 = arith.addf %11, %28 : vector<1x16x16xf32>
    %c0_17 = arith.constant 0 : index
    %c0_18 = arith.constant 0 : index
    %c0_19 = arith.constant 0 : index
    %c1_20 = arith.constant 1 : index
    %30 = vector.load %arg7[%c0_17, %c0_18, %c0_19, %c1_20] : memref<1x4x18x18xf32, #tpu.memory_space<vmem>>, vector<1x1x16x16xf32>
    %31 = vector.shape_cast %30 : vector<1x1x16x16xf32> to vector<1x16x16xf32>
    %c1_21 = arith.constant 1 : index
    %32 = memref.load %arg2[%c1_21] : memref<144xf32, #tpu.memory_space<smem>>
    %33 = vector.broadcast %32 : f32 to vector<1x16x16xf32>
    %34 = arith.mulf %31, %33 : vector<1x16x16xf32>
    %35 = arith.addf %17, %34 : vector<1x16x16xf32>
    %c37 = arith.constant 37 : index
    %36 = memref.load %arg2[%c37] : memref<144xf32, #tpu.memory_space<smem>>
    %37 = vector.broadcast %36 : f32 to vector<1x16x16xf32>
    %38 = arith.mulf %31, %37 : vector<1x16x16xf32>
    %39 = arith.addf %21, %38 : vector<1x16x16xf32>
    %c73 = arith.constant 73 : index
    %40 = memref.load %arg2[%c73] : memref<144xf32, #tpu.memory_space<smem>>
    %41 = vector.broadcast %40 : f32 to vector<1x16x16xf32>
    %42 = arith.mulf %31, %41 : vector<1x16x16xf32>
    %43 = arith.addf %25, %42 : vector<1x16x16xf32>
    %c109 = arith.constant 109 : index
    %44 = memref.load %arg2[%c109] : memref<144xf32, #tpu.memory_space<smem>>
    %45 = vector.broadcast %44 : f32 to vector<1x16x16xf32>
    %46 = arith.mulf %31, %45 : vector<1x16x16xf32>
    %47 = arith.addf %29, %46 : vector<1x16x16xf32>
    %c0_22 = arith.constant 0 : index
    %c0_23 = arith.constant 0 : index
    %c0_24 = arith.constant 0 : index
    %c2_25 = arith.constant 2 : index
    %48 = vector.load %arg7[%c0_22, %c0_23, %c0_24, %c2_25] : memref<1x4x18x18xf32, #tpu.memory_space<vmem>>, vector<1x1x16x16xf32>
    %49 = vector.shape_cast %48 : vector<1x1x16x16xf32> to vector<1x16x16xf32>
    %c2_26 = arith.constant 2 : index
    %50 = memref.load %arg2[%c2_26] : memref<144xf32, #tpu.memory_space<smem>>
    %51 = vector.broadcast %50 : f32 to vector<1x16x16xf32>
    %52 = arith.mulf %49, %51 : vector<1x16x16xf32>
    %53 = arith.addf %35, %52 : vector<1x16x16xf32>
    %c38 = arith.constant 38 : index
    %54 = memref.load %arg2[%c38] : memref<144xf32, #tpu.memory_space<smem>>
    %55 = vector.broadcast %54 : f32 to vector<1x16x16xf32>
    %56 = arith.mulf %49, %55 : vector<1x16x16xf32>
    %57 = arith.addf %39, %56 : vector<1x16x16xf32>
    %c74 = arith.constant 74 : index
    %58 = memref.load %arg2[%c74] : memref<144xf32, #tpu.memory_space<smem>>
    %59 = vector.broadcast %58 : f32 to vector<1x16x16xf32>
    %60 = arith.mulf %49, %59 : vector<1x16x16xf32>
    %61 = arith.addf %43, %60 : vector<1x16x16xf32>
    %c110 = arith.constant 110 : index
    %62 = memref.load %arg2[%c110] : memref<144xf32, #tpu.memory_space<smem>>
    %63 = vector.broadcast %62 : f32 to vector<1x16x16xf32>
    %64 = arith.mulf %49, %63 : vector<1x16x16xf32>
    %65 = arith.addf %47, %64 : vector<1x16x16xf32>
    %c0_27 = arith.constant 0 : index
    %c0_28 = arith.constant 0 : index
    %c1_29 = arith.constant 1 : index
    %c0_30 = arith.constant 0 : index
    %66 = vector.load %arg7[%c0_27, %c0_28, %c1_29, %c0_30] : memref<1x4x18x18xf32, #tpu.memory_space<vmem>>, vector<1x1x16x16xf32>
    %67 = vector.shape_cast %66 : vector<1x1x16x16xf32> to vector<1x16x16xf32>
    %c3_31 = arith.constant 3 : index
    %68 = memref.load %arg2[%c3_31] : memref<144xf32, #tpu.memory_space<smem>>
    %69 = vector.broadcast %68 : f32 to vector<1x16x16xf32>
    %70 = arith.mulf %67, %69 : vector<1x16x16xf32>
    %71 = arith.addf %53, %70 : vector<1x16x16xf32>
    %c39 = arith.constant 39 : index
    %72 = memref.load %arg2[%c39] : memref<144xf32, #tpu.memory_space<smem>>
    %73 = vector.broadcast %72 : f32 to vector<1x16x16xf32>
    %74 = arith.mulf %67, %73 : vector<1x16x16xf32>
    %75 = arith.addf %57, %74 : vector<1x16x16xf32>
    %c75 = arith.constant 75 : index
    %76 = memref.load %arg2[%c75] : memref<144xf32, #tpu.memory_space<smem>>
    %77 = vector.broadcast %76 : f32 to vector<1x16x16xf32>
    %78 = arith.mulf %67, %77 : vector<1x16x16xf32>
    %79 = arith.addf %61, %78 : vector<1x16x16xf32>
    %c111 = arith.constant 111 : index
    %80 = memref.load %arg2[%c111] : memref<144xf32, #tpu.memory_space<smem>>
    %81 = vector.broadcast %80 : f32 to vector<1x16x16xf32>
    %82 = arith.mulf %67, %81 : vector<1x16x16xf32>
    %83 = arith.addf %65, %82 : vector<1x16x16xf32>
    %c0_32 = arith.constant 0 : index
    %c0_33 = arith.constant 0 : index
    %c1_34 = arith.constant 1 : index
    %c1_35 = arith.constant 1 : index
    %84 = vector.load %arg7[%c0_32, %c0_33, %c1_34, %c1_35] : memref<1x4x18x18xf32, #tpu.memory_space<vmem>>, vector<1x1x16x16xf32>
    %85 = vector.shape_cast %84 : vector<1x1x16x16xf32> to vector<1x16x16xf32>
    %c4 = arith.constant 4 : index
    %86 = memref.load %arg2[%c4] : memref<144xf32, #tpu.memory_space<smem>>
    %87 = vector.broadcast %86 : f32 to vector<1x16x16xf32>
    %88 = arith.mulf %85, %87 : vector<1x16x16xf32>
    %89 = arith.addf %71, %88 : vector<1x16x16xf32>
    %c40 = arith.constant 40 : index
    %90 = memref.load %arg2[%c40] : memref<144xf32, #tpu.memory_space<smem>>
    %91 = vector.broadcast %90 : f32 to vector<1x16x16xf32>
    %92 = arith.mulf %85, %91 : vector<1x16x16xf32>
    %93 = arith.addf %75, %92 : vector<1x16x16xf32>
    %c76 = arith.constant 76 : index
    %94 = memref.load %arg2[%c76] : memref<144xf32, #tpu.memory_space<smem>>
    %95 = vector.broadcast %94 : f32 to vector<1x16x16xf32>
    %96 = arith.mulf %85, %95 : vector<1x16x16xf32>
    %97 = arith.addf %79, %96 : vector<1x16x16xf32>
    %c112 = arith.constant 112 : index
    %98 = memref.load %arg2[%c112] : memref<144xf32, #tpu.memory_space<smem>>
    %99 = vector.broadcast %98 : f32 to vector<1x16x16xf32>
    %100 = arith.mulf %85, %99 : vector<1x16x16xf32>
    %101 = arith.addf %83, %100 : vector<1x16x16xf32>
    %c0_36 = arith.constant 0 : index
    %c0_37 = arith.constant 0 : index
    %c1_38 = arith.constant 1 : index
    %c2_39 = arith.constant 2 : index
    %102 = vector.load %arg7[%c0_36, %c0_37, %c1_38, %c2_39] : memref<1x4x18x18xf32, #tpu.memory_space<vmem>>, vector<1x1x16x16xf32>
    %103 = vector.shape_cast %102 : vector<1x1x16x16xf32> to vector<1x16x16xf32>
    %c5 = arith.constant 5 : index
    %104 = memref.load %arg2[%c5] : memref<144xf32, #tpu.memory_space<smem>>
    %105 = vector.broadcast %104 : f32 to vector<1x16x16xf32>
    %106 = arith.mulf %103, %105 : vector<1x16x16xf32>
    %107 = arith.addf %89, %106 : vector<1x16x16xf32>
    %c41 = arith.constant 41 : index
    %108 = memref.load %arg2[%c41] : memref<144xf32, #tpu.memory_space<smem>>
    %109 = vector.broadcast %108 : f32 to vector<1x16x16xf32>
    %110 = arith.mulf %103, %109 : vector<1x16x16xf32>
    %111 = arith.addf %93, %110 : vector<1x16x16xf32>
    %c77 = arith.constant 77 : index
    %112 = memref.load %arg2[%c77] : memref<144xf32, #tpu.memory_space<smem>>
    %113 = vector.broadcast %112 : f32 to vector<1x16x16xf32>
    %114 = arith.mulf %103, %113 : vector<1x16x16xf32>
    %115 = arith.addf %97, %114 : vector<1x16x16xf32>
    %c113 = arith.constant 113 : index
    %116 = memref.load %arg2[%c113] : memref<144xf32, #tpu.memory_space<smem>>
    %117 = vector.broadcast %116 : f32 to vector<1x16x16xf32>
    %118 = arith.mulf %103, %117 : vector<1x16x16xf32>
    %119 = arith.addf %101, %118 : vector<1x16x16xf32>
    %c0_40 = arith.constant 0 : index
    %c0_41 = arith.constant 0 : index
    %c2_42 = arith.constant 2 : index
    %c0_43 = arith.constant 0 : index
    %120 = vector.load %arg7[%c0_40, %c0_41, %c2_42, %c0_43] : memref<1x4x18x18xf32, #tpu.memory_space<vmem>>, vector<1x1x16x16xf32>
    %121 = vector.shape_cast %120 : vector<1x1x16x16xf32> to vector<1x16x16xf32>
    %c6 = arith.constant 6 : index
    %122 = memref.load %arg2[%c6] : memref<144xf32, #tpu.memory_space<smem>>
    %123 = vector.broadcast %122 : f32 to vector<1x16x16xf32>
    %124 = arith.mulf %121, %123 : vector<1x16x16xf32>
    %125 = arith.addf %107, %124 : vector<1x16x16xf32>
    %c42 = arith.constant 42 : index
    %126 = memref.load %arg2[%c42] : memref<144xf32, #tpu.memory_space<smem>>
    %127 = vector.broadcast %126 : f32 to vector<1x16x16xf32>
    %128 = arith.mulf %121, %127 : vector<1x16x16xf32>
    %129 = arith.addf %111, %128 : vector<1x16x16xf32>
    %c78 = arith.constant 78 : index
    %130 = memref.load %arg2[%c78] : memref<144xf32, #tpu.memory_space<smem>>
    %131 = vector.broadcast %130 : f32 to vector<1x16x16xf32>
    %132 = arith.mulf %121, %131 : vector<1x16x16xf32>
    %133 = arith.addf %115, %132 : vector<1x16x16xf32>
    %c114 = arith.constant 114 : index
    %134 = memref.load %arg2[%c114] : memref<144xf32, #tpu.memory_space<smem>>
    %135 = vector.broadcast %134 : f32 to vector<1x16x16xf32>
    %136 = arith.mulf %121, %135 : vector<1x16x16xf32>
    %137 = arith.addf %119, %136 : vector<1x16x16xf32>
    %c0_44 = arith.constant 0 : index
    %c0_45 = arith.constant 0 : index
    %c2_46 = arith.constant 2 : index
    %c1_47 = arith.constant 1 : index
    %138 = vector.load %arg7[%c0_44, %c0_45, %c2_46, %c1_47] : memref<1x4x18x18xf32, #tpu.memory_space<vmem>>, vector<1x1x16x16xf32>
    %139 = vector.shape_cast %138 : vector<1x1x16x16xf32> to vector<1x16x16xf32>
    %c7 = arith.constant 7 : index
    %140 = memref.load %arg2[%c7] : memref<144xf32, #tpu.memory_space<smem>>
    %141 = vector.broadcast %140 : f32 to vector<1x16x16xf32>
    %142 = arith.mulf %139, %141 : vector<1x16x16xf32>
    %143 = arith.addf %125, %142 : vector<1x16x16xf32>
    %c43 = arith.constant 43 : index
    %144 = memref.load %arg2[%c43] : memref<144xf32, #tpu.memory_space<smem>>
    %145 = vector.broadcast %144 : f32 to vector<1x16x16xf32>
    %146 = arith.mulf %139, %145 : vector<1x16x16xf32>
    %147 = arith.addf %129, %146 : vector<1x16x16xf32>
    %c79 = arith.constant 79 : index
    %148 = memref.load %arg2[%c79] : memref<144xf32, #tpu.memory_space<smem>>
    %149 = vector.broadcast %148 : f32 to vector<1x16x16xf32>
    %150 = arith.mulf %139, %149 : vector<1x16x16xf32>
    %151 = arith.addf %133, %150 : vector<1x16x16xf32>
    %c115 = arith.constant 115 : index
    %152 = memref.load %arg2[%c115] : memref<144xf32, #tpu.memory_space<smem>>
    %153 = vector.broadcast %152 : f32 to vector<1x16x16xf32>
    %154 = arith.mulf %139, %153 : vector<1x16x16xf32>
    %155 = arith.addf %137, %154 : vector<1x16x16xf32>
    %c0_48 = arith.constant 0 : index
    %c0_49 = arith.constant 0 : index
    %c2_50 = arith.constant 2 : index
    %c2_51 = arith.constant 2 : index
    %156 = vector.load %arg7[%c0_48, %c0_49, %c2_50, %c2_51] : memref<1x4x18x18xf32, #tpu.memory_space<vmem>>, vector<1x1x16x16xf32>
    %157 = vector.shape_cast %156 : vector<1x1x16x16xf32> to vector<1x16x16xf32>
    %c8 = arith.constant 8 : index
    %158 = memref.load %arg2[%c8] : memref<144xf32, #tpu.memory_space<smem>>
    %159 = vector.broadcast %158 : f32 to vector<1x16x16xf32>
    %160 = arith.mulf %157, %159 : vector<1x16x16xf32>
    %161 = arith.addf %143, %160 : vector<1x16x16xf32>
    %c44 = arith.constant 44 : index
    %162 = memref.load %arg2[%c44] : memref<144xf32, #tpu.memory_space<smem>>
    %163 = vector.broadcast %162 : f32 to vector<1x16x16xf32>
    %164 = arith.mulf %157, %163 : vector<1x16x16xf32>
    %165 = arith.addf %147, %164 : vector<1x16x16xf32>
    %c80 = arith.constant 80 : index
    %166 = memref.load %arg2[%c80] : memref<144xf32, #tpu.memory_space<smem>>
    %167 = vector.broadcast %166 : f32 to vector<1x16x16xf32>
    %168 = arith.mulf %157, %167 : vector<1x16x16xf32>
    %169 = arith.addf %151, %168 : vector<1x16x16xf32>
    %c116 = arith.constant 116 : index
    %170 = memref.load %arg2[%c116] : memref<144xf32, #tpu.memory_space<smem>>
    %171 = vector.broadcast %170 : f32 to vector<1x16x16xf32>
    %172 = arith.mulf %157, %171 : vector<1x16x16xf32>
    %173 = arith.addf %155, %172 : vector<1x16x16xf32>
    %c0_52 = arith.constant 0 : index
    %c1_53 = arith.constant 1 : index
    %c0_54 = arith.constant 0 : index
    %c0_55 = arith.constant 0 : index
    %174 = vector.load %arg7[%c0_52, %c1_53, %c0_54, %c0_55] : memref<1x4x18x18xf32, #tpu.memory_space<vmem>>, vector<1x1x16x16xf32>
    %175 = vector.shape_cast %174 : vector<1x1x16x16xf32> to vector<1x16x16xf32>
    %c9 = arith.constant 9 : index
    %176 = memref.load %arg2[%c9] : memref<144xf32, #tpu.memory_space<smem>>
    %177 = vector.broadcast %176 : f32 to vector<1x16x16xf32>
    %178 = arith.mulf %175, %177 : vector<1x16x16xf32>
    %179 = arith.addf %161, %178 : vector<1x16x16xf32>
    %c45 = arith.constant 45 : index
    %180 = memref.load %arg2[%c45] : memref<144xf32, #tpu.memory_space<smem>>
    %181 = vector.broadcast %180 : f32 to vector<1x16x16xf32>
    %182 = arith.mulf %175, %181 : vector<1x16x16xf32>
    %183 = arith.addf %165, %182 : vector<1x16x16xf32>
    %c81 = arith.constant 81 : index
    %184 = memref.load %arg2[%c81] : memref<144xf32, #tpu.memory_space<smem>>
    %185 = vector.broadcast %184 : f32 to vector<1x16x16xf32>
    %186 = arith.mulf %175, %185 : vector<1x16x16xf32>
    %187 = arith.addf %169, %186 : vector<1x16x16xf32>
    %c117 = arith.constant 117 : index
    %188 = memref.load %arg2[%c117] : memref<144xf32, #tpu.memory_space<smem>>
    %189 = vector.broadcast %188 : f32 to vector<1x16x16xf32>
    %190 = arith.mulf %175, %189 : vector<1x16x16xf32>
    %191 = arith.addf %173, %190 : vector<1x16x16xf32>
    %c0_56 = arith.constant 0 : index
    %c1_57 = arith.constant 1 : index
    %c0_58 = arith.constant 0 : index
    %c1_59 = arith.constant 1 : index
    %192 = vector.load %arg7[%c0_56, %c1_57, %c0_58, %c1_59] : memref<1x4x18x18xf32, #tpu.memory_space<vmem>>, vector<1x1x16x16xf32>
    %193 = vector.shape_cast %192 : vector<1x1x16x16xf32> to vector<1x16x16xf32>
    %c10 = arith.constant 10 : index
    %194 = memref.load %arg2[%c10] : memref<144xf32, #tpu.memory_space<smem>>
    %195 = vector.broadcast %194 : f32 to vector<1x16x16xf32>
    %196 = arith.mulf %193, %195 : vector<1x16x16xf32>
    %197 = arith.addf %179, %196 : vector<1x16x16xf32>
    %c46 = arith.constant 46 : index
    %198 = memref.load %arg2[%c46] : memref<144xf32, #tpu.memory_space<smem>>
    %199 = vector.broadcast %198 : f32 to vector<1x16x16xf32>
    %200 = arith.mulf %193, %199 : vector<1x16x16xf32>
    %201 = arith.addf %183, %200 : vector<1x16x16xf32>
    %c82 = arith.constant 82 : index
    %202 = memref.load %arg2[%c82] : memref<144xf32, #tpu.memory_space<smem>>
    %203 = vector.broadcast %202 : f32 to vector<1x16x16xf32>
    %204 = arith.mulf %193, %203 : vector<1x16x16xf32>
    %205 = arith.addf %187, %204 : vector<1x16x16xf32>
    %c118 = arith.constant 118 : index
    %206 = memref.load %arg2[%c118] : memref<144xf32, #tpu.memory_space<smem>>
    %207 = vector.broadcast %206 : f32 to vector<1x16x16xf32>
    %208 = arith.mulf %193, %207 : vector<1x16x16xf32>
    %209 = arith.addf %191, %208 : vector<1x16x16xf32>
    %c0_60 = arith.constant 0 : index
    %c1_61 = arith.constant 1 : index
    %c0_62 = arith.constant 0 : index
    %c2_63 = arith.constant 2 : index
    %210 = vector.load %arg7[%c0_60, %c1_61, %c0_62, %c2_63] : memref<1x4x18x18xf32, #tpu.memory_space<vmem>>, vector<1x1x16x16xf32>
    %211 = vector.shape_cast %210 : vector<1x1x16x16xf32> to vector<1x16x16xf32>
    %c11 = arith.constant 11 : index
    %212 = memref.load %arg2[%c11] : memref<144xf32, #tpu.memory_space<smem>>
    %213 = vector.broadcast %212 : f32 to vector<1x16x16xf32>
    %214 = arith.mulf %211, %213 : vector<1x16x16xf32>
    %215 = arith.addf %197, %214 : vector<1x16x16xf32>
    %c47 = arith.constant 47 : index
    %216 = memref.load %arg2[%c47] : memref<144xf32, #tpu.memory_space<smem>>
    %217 = vector.broadcast %216 : f32 to vector<1x16x16xf32>
    %218 = arith.mulf %211, %217 : vector<1x16x16xf32>
    %219 = arith.addf %201, %218 : vector<1x16x16xf32>
    %c83 = arith.constant 83 : index
    %220 = memref.load %arg2[%c83] : memref<144xf32, #tpu.memory_space<smem>>
    %221 = vector.broadcast %220 : f32 to vector<1x16x16xf32>
    %222 = arith.mulf %211, %221 : vector<1x16x16xf32>
    %223 = arith.addf %205, %222 : vector<1x16x16xf32>
    %c119 = arith.constant 119 : index
    %224 = memref.load %arg2[%c119] : memref<144xf32, #tpu.memory_space<smem>>
    %225 = vector.broadcast %224 : f32 to vector<1x16x16xf32>
    %226 = arith.mulf %211, %225 : vector<1x16x16xf32>
    %227 = arith.addf %209, %226 : vector<1x16x16xf32>
    %c0_64 = arith.constant 0 : index
    %c1_65 = arith.constant 1 : index
    %c1_66 = arith.constant 1 : index
    %c0_67 = arith.constant 0 : index
    %228 = vector.load %arg7[%c0_64, %c1_65, %c1_66, %c0_67] : memref<1x4x18x18xf32, #tpu.memory_space<vmem>>, vector<1x1x16x16xf32>
    %229 = vector.shape_cast %228 : vector<1x1x16x16xf32> to vector<1x16x16xf32>
    %c12 = arith.constant 12 : index
    %230 = memref.load %arg2[%c12] : memref<144xf32, #tpu.memory_space<smem>>
    %231 = vector.broadcast %230 : f32 to vector<1x16x16xf32>
    %232 = arith.mulf %229, %231 : vector<1x16x16xf32>
    %233 = arith.addf %215, %232 : vector<1x16x16xf32>
    %c48 = arith.constant 48 : index
    %234 = memref.load %arg2[%c48] : memref<144xf32, #tpu.memory_space<smem>>
    %235 = vector.broadcast %234 : f32 to vector<1x16x16xf32>
    %236 = arith.mulf %229, %235 : vector<1x16x16xf32>
    %237 = arith.addf %219, %236 : vector<1x16x16xf32>
    %c84 = arith.constant 84 : index
    %238 = memref.load %arg2[%c84] : memref<144xf32, #tpu.memory_space<smem>>
    %239 = vector.broadcast %238 : f32 to vector<1x16x16xf32>
    %240 = arith.mulf %229, %239 : vector<1x16x16xf32>
    %241 = arith.addf %223, %240 : vector<1x16x16xf32>
    %c120 = arith.constant 120 : index
    %242 = memref.load %arg2[%c120] : memref<144xf32, #tpu.memory_space<smem>>
    %243 = vector.broadcast %242 : f32 to vector<1x16x16xf32>
    %244 = arith.mulf %229, %243 : vector<1x16x16xf32>
    %245 = arith.addf %227, %244 : vector<1x16x16xf32>
    %c0_68 = arith.constant 0 : index
    %c1_69 = arith.constant 1 : index
    %c1_70 = arith.constant 1 : index
    %c1_71 = arith.constant 1 : index
    %246 = vector.load %arg7[%c0_68, %c1_69, %c1_70, %c1_71] : memref<1x4x18x18xf32, #tpu.memory_space<vmem>>, vector<1x1x16x16xf32>
    %247 = vector.shape_cast %246 : vector<1x1x16x16xf32> to vector<1x16x16xf32>
    %c13 = arith.constant 13 : index
    %248 = memref.load %arg2[%c13] : memref<144xf32, #tpu.memory_space<smem>>
    %249 = vector.broadcast %248 : f32 to vector<1x16x16xf32>
    %250 = arith.mulf %247, %249 : vector<1x16x16xf32>
    %251 = arith.addf %233, %250 : vector<1x16x16xf32>
    %c49 = arith.constant 49 : index
    %252 = memref.load %arg2[%c49] : memref<144xf32, #tpu.memory_space<smem>>
    %253 = vector.broadcast %252 : f32 to vector<1x16x16xf32>
    %254 = arith.mulf %247, %253 : vector<1x16x16xf32>
    %255 = arith.addf %237, %254 : vector<1x16x16xf32>
    %c85 = arith.constant 85 : index
    %256 = memref.load %arg2[%c85] : memref<144xf32, #tpu.memory_space<smem>>
    %257 = vector.broadcast %256 : f32 to vector<1x16x16xf32>
    %258 = arith.mulf %247, %257 : vector<1x16x16xf32>
    %259 = arith.addf %241, %258 : vector<1x16x16xf32>
    %c121 = arith.constant 121 : index
    %260 = memref.load %arg2[%c121] : memref<144xf32, #tpu.memory_space<smem>>
    %261 = vector.broadcast %260 : f32 to vector<1x16x16xf32>
    %262 = arith.mulf %247, %261 : vector<1x16x16xf32>
    %263 = arith.addf %245, %262 : vector<1x16x16xf32>
    %c0_72 = arith.constant 0 : index
    %c1_73 = arith.constant 1 : index
    %c1_74 = arith.constant 1 : index
    %c2_75 = arith.constant 2 : index
    %264 = vector.load %arg7[%c0_72, %c1_73, %c1_74, %c2_75] : memref<1x4x18x18xf32, #tpu.memory_space<vmem>>, vector<1x1x16x16xf32>
    %265 = vector.shape_cast %264 : vector<1x1x16x16xf32> to vector<1x16x16xf32>
    %c14 = arith.constant 14 : index
    %266 = memref.load %arg2[%c14] : memref<144xf32, #tpu.memory_space<smem>>
    %267 = vector.broadcast %266 : f32 to vector<1x16x16xf32>
    %268 = arith.mulf %265, %267 : vector<1x16x16xf32>
    %269 = arith.addf %251, %268 : vector<1x16x16xf32>
    %c50 = arith.constant 50 : index
    %270 = memref.load %arg2[%c50] : memref<144xf32, #tpu.memory_space<smem>>
    %271 = vector.broadcast %270 : f32 to vector<1x16x16xf32>
    %272 = arith.mulf %265, %271 : vector<1x16x16xf32>
    %273 = arith.addf %255, %272 : vector<1x16x16xf32>
    %c86 = arith.constant 86 : index
    %274 = memref.load %arg2[%c86] : memref<144xf32, #tpu.memory_space<smem>>
    %275 = vector.broadcast %274 : f32 to vector<1x16x16xf32>
    %276 = arith.mulf %265, %275 : vector<1x16x16xf32>
    %277 = arith.addf %259, %276 : vector<1x16x16xf32>
    %c122 = arith.constant 122 : index
    %278 = memref.load %arg2[%c122] : memref<144xf32, #tpu.memory_space<smem>>
    %279 = vector.broadcast %278 : f32 to vector<1x16x16xf32>
    %280 = arith.mulf %265, %279 : vector<1x16x16xf32>
    %281 = arith.addf %263, %280 : vector<1x16x16xf32>
    %c0_76 = arith.constant 0 : index
    %c1_77 = arith.constant 1 : index
    %c2_78 = arith.constant 2 : index
    %c0_79 = arith.constant 0 : index
    %282 = vector.load %arg7[%c0_76, %c1_77, %c2_78, %c0_79] : memref<1x4x18x18xf32, #tpu.memory_space<vmem>>, vector<1x1x16x16xf32>
    %283 = vector.shape_cast %282 : vector<1x1x16x16xf32> to vector<1x16x16xf32>
    %c15 = arith.constant 15 : index
    %284 = memref.load %arg2[%c15] : memref<144xf32, #tpu.memory_space<smem>>
    %285 = vector.broadcast %284 : f32 to vector<1x16x16xf32>
    %286 = arith.mulf %283, %285 : vector<1x16x16xf32>
    %287 = arith.addf %269, %286 : vector<1x16x16xf32>
    %c51 = arith.constant 51 : index
    %288 = memref.load %arg2[%c51] : memref<144xf32, #tpu.memory_space<smem>>
    %289 = vector.broadcast %288 : f32 to vector<1x16x16xf32>
    %290 = arith.mulf %283, %289 : vector<1x16x16xf32>
    %291 = arith.addf %273, %290 : vector<1x16x16xf32>
    %c87 = arith.constant 87 : index
    %292 = memref.load %arg2[%c87] : memref<144xf32, #tpu.memory_space<smem>>
    %293 = vector.broadcast %292 : f32 to vector<1x16x16xf32>
    %294 = arith.mulf %283, %293 : vector<1x16x16xf32>
    %295 = arith.addf %277, %294 : vector<1x16x16xf32>
    %c123 = arith.constant 123 : index
    %296 = memref.load %arg2[%c123] : memref<144xf32, #tpu.memory_space<smem>>
    %297 = vector.broadcast %296 : f32 to vector<1x16x16xf32>
    %298 = arith.mulf %283, %297 : vector<1x16x16xf32>
    %299 = arith.addf %281, %298 : vector<1x16x16xf32>
    %c0_80 = arith.constant 0 : index
    %c1_81 = arith.constant 1 : index
    %c2_82 = arith.constant 2 : index
    %c1_83 = arith.constant 1 : index
    %300 = vector.load %arg7[%c0_80, %c1_81, %c2_82, %c1_83] : memref<1x4x18x18xf32, #tpu.memory_space<vmem>>, vector<1x1x16x16xf32>
    %301 = vector.shape_cast %300 : vector<1x1x16x16xf32> to vector<1x16x16xf32>
    %c16 = arith.constant 16 : index
    %302 = memref.load %arg2[%c16] : memref<144xf32, #tpu.memory_space<smem>>
    %303 = vector.broadcast %302 : f32 to vector<1x16x16xf32>
    %304 = arith.mulf %301, %303 : vector<1x16x16xf32>
    %305 = arith.addf %287, %304 : vector<1x16x16xf32>
    %c52 = arith.constant 52 : index
    %306 = memref.load %arg2[%c52] : memref<144xf32, #tpu.memory_space<smem>>
    %307 = vector.broadcast %306 : f32 to vector<1x16x16xf32>
    %308 = arith.mulf %301, %307 : vector<1x16x16xf32>
    %309 = arith.addf %291, %308 : vector<1x16x16xf32>
    %c88 = arith.constant 88 : index
    %310 = memref.load %arg2[%c88] : memref<144xf32, #tpu.memory_space<smem>>
    %311 = vector.broadcast %310 : f32 to vector<1x16x16xf32>
    %312 = arith.mulf %301, %311 : vector<1x16x16xf32>
    %313 = arith.addf %295, %312 : vector<1x16x16xf32>
    %c124 = arith.constant 124 : index
    %314 = memref.load %arg2[%c124] : memref<144xf32, #tpu.memory_space<smem>>
    %315 = vector.broadcast %314 : f32 to vector<1x16x16xf32>
    %316 = arith.mulf %301, %315 : vector<1x16x16xf32>
    %317 = arith.addf %299, %316 : vector<1x16x16xf32>
    %c0_84 = arith.constant 0 : index
    %c1_85 = arith.constant 1 : index
    %c2_86 = arith.constant 2 : index
    %c2_87 = arith.constant 2 : index
    %318 = vector.load %arg7[%c0_84, %c1_85, %c2_86, %c2_87] : memref<1x4x18x18xf32, #tpu.memory_space<vmem>>, vector<1x1x16x16xf32>
    %319 = vector.shape_cast %318 : vector<1x1x16x16xf32> to vector<1x16x16xf32>
    %c17 = arith.constant 17 : index
    %320 = memref.load %arg2[%c17] : memref<144xf32, #tpu.memory_space<smem>>
    %321 = vector.broadcast %320 : f32 to vector<1x16x16xf32>
    %322 = arith.mulf %319, %321 : vector<1x16x16xf32>
    %323 = arith.addf %305, %322 : vector<1x16x16xf32>
    %c53 = arith.constant 53 : index
    %324 = memref.load %arg2[%c53] : memref<144xf32, #tpu.memory_space<smem>>
    %325 = vector.broadcast %324 : f32 to vector<1x16x16xf32>
    %326 = arith.mulf %319, %325 : vector<1x16x16xf32>
    %327 = arith.addf %309, %326 : vector<1x16x16xf32>
    %c89 = arith.constant 89 : index
    %328 = memref.load %arg2[%c89] : memref<144xf32, #tpu.memory_space<smem>>
    %329 = vector.broadcast %328 : f32 to vector<1x16x16xf32>
    %330 = arith.mulf %319, %329 : vector<1x16x16xf32>
    %331 = arith.addf %313, %330 : vector<1x16x16xf32>
    %c125 = arith.constant 125 : index
    %332 = memref.load %arg2[%c125] : memref<144xf32, #tpu.memory_space<smem>>
    %333 = vector.broadcast %332 : f32 to vector<1x16x16xf32>
    %334 = arith.mulf %319, %333 : vector<1x16x16xf32>
    %335 = arith.addf %317, %334 : vector<1x16x16xf32>
    %c0_88 = arith.constant 0 : index
    %c2_89 = arith.constant 2 : index
    %c0_90 = arith.constant 0 : index
    %c0_91 = arith.constant 0 : index
    %336 = vector.load %arg7[%c0_88, %c2_89, %c0_90, %c0_91] : memref<1x4x18x18xf32, #tpu.memory_space<vmem>>, vector<1x1x16x16xf32>
    %337 = vector.shape_cast %336 : vector<1x1x16x16xf32> to vector<1x16x16xf32>
    %c18 = arith.constant 18 : index
    %338 = memref.load %arg2[%c18] : memref<144xf32, #tpu.memory_space<smem>>
    %339 = vector.broadcast %338 : f32 to vector<1x16x16xf32>
    %340 = arith.mulf %337, %339 : vector<1x16x16xf32>
    %341 = arith.addf %323, %340 : vector<1x16x16xf32>
    %c54 = arith.constant 54 : index
    %342 = memref.load %arg2[%c54] : memref<144xf32, #tpu.memory_space<smem>>
    %343 = vector.broadcast %342 : f32 to vector<1x16x16xf32>
    %344 = arith.mulf %337, %343 : vector<1x16x16xf32>
    %345 = arith.addf %327, %344 : vector<1x16x16xf32>
    %c90 = arith.constant 90 : index
    %346 = memref.load %arg2[%c90] : memref<144xf32, #tpu.memory_space<smem>>
    %347 = vector.broadcast %346 : f32 to vector<1x16x16xf32>
    %348 = arith.mulf %337, %347 : vector<1x16x16xf32>
    %349 = arith.addf %331, %348 : vector<1x16x16xf32>
    %c126 = arith.constant 126 : index
    %350 = memref.load %arg2[%c126] : memref<144xf32, #tpu.memory_space<smem>>
    %351 = vector.broadcast %350 : f32 to vector<1x16x16xf32>
    %352 = arith.mulf %337, %351 : vector<1x16x16xf32>
    %353 = arith.addf %335, %352 : vector<1x16x16xf32>
    %c0_92 = arith.constant 0 : index
    %c2_93 = arith.constant 2 : index
    %c0_94 = arith.constant 0 : index
    %c1_95 = arith.constant 1 : index
    %354 = vector.load %arg7[%c0_92, %c2_93, %c0_94, %c1_95] : memref<1x4x18x18xf32, #tpu.memory_space<vmem>>, vector<1x1x16x16xf32>
    %355 = vector.shape_cast %354 : vector<1x1x16x16xf32> to vector<1x16x16xf32>
    %c19 = arith.constant 19 : index
    %356 = memref.load %arg2[%c19] : memref<144xf32, #tpu.memory_space<smem>>
    %357 = vector.broadcast %356 : f32 to vector<1x16x16xf32>
    %358 = arith.mulf %355, %357 : vector<1x16x16xf32>
    %359 = arith.addf %341, %358 : vector<1x16x16xf32>
    %c55 = arith.constant 55 : index
    %360 = memref.load %arg2[%c55] : memref<144xf32, #tpu.memory_space<smem>>
    %361 = vector.broadcast %360 : f32 to vector<1x16x16xf32>
    %362 = arith.mulf %355, %361 : vector<1x16x16xf32>
    %363 = arith.addf %345, %362 : vector<1x16x16xf32>
    %c91 = arith.constant 91 : index
    %364 = memref.load %arg2[%c91] : memref<144xf32, #tpu.memory_space<smem>>
    %365 = vector.broadcast %364 : f32 to vector<1x16x16xf32>
    %366 = arith.mulf %355, %365 : vector<1x16x16xf32>
    %367 = arith.addf %349, %366 : vector<1x16x16xf32>
    %c127 = arith.constant 127 : index
    %368 = memref.load %arg2[%c127] : memref<144xf32, #tpu.memory_space<smem>>
    %369 = vector.broadcast %368 : f32 to vector<1x16x16xf32>
    %370 = arith.mulf %355, %369 : vector<1x16x16xf32>
    %371 = arith.addf %353, %370 : vector<1x16x16xf32>
    %c0_96 = arith.constant 0 : index
    %c2_97 = arith.constant 2 : index
    %c0_98 = arith.constant 0 : index
    %c2_99 = arith.constant 2 : index
    %372 = vector.load %arg7[%c0_96, %c2_97, %c0_98, %c2_99] : memref<1x4x18x18xf32, #tpu.memory_space<vmem>>, vector<1x1x16x16xf32>
    %373 = vector.shape_cast %372 : vector<1x1x16x16xf32> to vector<1x16x16xf32>
    %c20 = arith.constant 20 : index
    %374 = memref.load %arg2[%c20] : memref<144xf32, #tpu.memory_space<smem>>
    %375 = vector.broadcast %374 : f32 to vector<1x16x16xf32>
    %376 = arith.mulf %373, %375 : vector<1x16x16xf32>
    %377 = arith.addf %359, %376 : vector<1x16x16xf32>
    %c56 = arith.constant 56 : index
    %378 = memref.load %arg2[%c56] : memref<144xf32, #tpu.memory_space<smem>>
    %379 = vector.broadcast %378 : f32 to vector<1x16x16xf32>
    %380 = arith.mulf %373, %379 : vector<1x16x16xf32>
    %381 = arith.addf %363, %380 : vector<1x16x16xf32>
    %c92 = arith.constant 92 : index
    %382 = memref.load %arg2[%c92] : memref<144xf32, #tpu.memory_space<smem>>
    %383 = vector.broadcast %382 : f32 to vector<1x16x16xf32>
    %384 = arith.mulf %373, %383 : vector<1x16x16xf32>
    %385 = arith.addf %367, %384 : vector<1x16x16xf32>
    %c128 = arith.constant 128 : index
    %386 = memref.load %arg2[%c128] : memref<144xf32, #tpu.memory_space<smem>>
    %387 = vector.broadcast %386 : f32 to vector<1x16x16xf32>
    %388 = arith.mulf %373, %387 : vector<1x16x16xf32>
    %389 = arith.addf %371, %388 : vector<1x16x16xf32>
    %c0_100 = arith.constant 0 : index
    %c2_101 = arith.constant 2 : index
    %c1_102 = arith.constant 1 : index
    %c0_103 = arith.constant 0 : index
    %390 = vector.load %arg7[%c0_100, %c2_101, %c1_102, %c0_103] : memref<1x4x18x18xf32, #tpu.memory_space<vmem>>, vector<1x1x16x16xf32>
    %391 = vector.shape_cast %390 : vector<1x1x16x16xf32> to vector<1x16x16xf32>
    %c21 = arith.constant 21 : index
    %392 = memref.load %arg2[%c21] : memref<144xf32, #tpu.memory_space<smem>>
    %393 = vector.broadcast %392 : f32 to vector<1x16x16xf32>
    %394 = arith.mulf %391, %393 : vector<1x16x16xf32>
    %395 = arith.addf %377, %394 : vector<1x16x16xf32>
    %c57 = arith.constant 57 : index
    %396 = memref.load %arg2[%c57] : memref<144xf32, #tpu.memory_space<smem>>
    %397 = vector.broadcast %396 : f32 to vector<1x16x16xf32>
    %398 = arith.mulf %391, %397 : vector<1x16x16xf32>
    %399 = arith.addf %381, %398 : vector<1x16x16xf32>
    %c93 = arith.constant 93 : index
    %400 = memref.load %arg2[%c93] : memref<144xf32, #tpu.memory_space<smem>>
    %401 = vector.broadcast %400 : f32 to vector<1x16x16xf32>
    %402 = arith.mulf %391, %401 : vector<1x16x16xf32>
    %403 = arith.addf %385, %402 : vector<1x16x16xf32>
    %c129 = arith.constant 129 : index
    %404 = memref.load %arg2[%c129] : memref<144xf32, #tpu.memory_space<smem>>
    %405 = vector.broadcast %404 : f32 to vector<1x16x16xf32>
    %406 = arith.mulf %391, %405 : vector<1x16x16xf32>
    %407 = arith.addf %389, %406 : vector<1x16x16xf32>
    %c0_104 = arith.constant 0 : index
    %c2_105 = arith.constant 2 : index
    %c1_106 = arith.constant 1 : index
    %c1_107 = arith.constant 1 : index
    %408 = vector.load %arg7[%c0_104, %c2_105, %c1_106, %c1_107] : memref<1x4x18x18xf32, #tpu.memory_space<vmem>>, vector<1x1x16x16xf32>
    %409 = vector.shape_cast %408 : vector<1x1x16x16xf32> to vector<1x16x16xf32>
    %c22 = arith.constant 22 : index
    %410 = memref.load %arg2[%c22] : memref<144xf32, #tpu.memory_space<smem>>
    %411 = vector.broadcast %410 : f32 to vector<1x16x16xf32>
    %412 = arith.mulf %409, %411 : vector<1x16x16xf32>
    %413 = arith.addf %395, %412 : vector<1x16x16xf32>
    %c58 = arith.constant 58 : index
    %414 = memref.load %arg2[%c58] : memref<144xf32, #tpu.memory_space<smem>>
    %415 = vector.broadcast %414 : f32 to vector<1x16x16xf32>
    %416 = arith.mulf %409, %415 : vector<1x16x16xf32>
    %417 = arith.addf %399, %416 : vector<1x16x16xf32>
    %c94 = arith.constant 94 : index
    %418 = memref.load %arg2[%c94] : memref<144xf32, #tpu.memory_space<smem>>
    %419 = vector.broadcast %418 : f32 to vector<1x16x16xf32>
    %420 = arith.mulf %409, %419 : vector<1x16x16xf32>
    %421 = arith.addf %403, %420 : vector<1x16x16xf32>
    %c130 = arith.constant 130 : index
    %422 = memref.load %arg2[%c130] : memref<144xf32, #tpu.memory_space<smem>>
    %423 = vector.broadcast %422 : f32 to vector<1x16x16xf32>
    %424 = arith.mulf %409, %423 : vector<1x16x16xf32>
    %425 = arith.addf %407, %424 : vector<1x16x16xf32>
    %c0_108 = arith.constant 0 : index
    %c2_109 = arith.constant 2 : index
    %c1_110 = arith.constant 1 : index
    %c2_111 = arith.constant 2 : index
    %426 = vector.load %arg7[%c0_108, %c2_109, %c1_110, %c2_111] : memref<1x4x18x18xf32, #tpu.memory_space<vmem>>, vector<1x1x16x16xf32>
    %427 = vector.shape_cast %426 : vector<1x1x16x16xf32> to vector<1x16x16xf32>
    %c23 = arith.constant 23 : index
    %428 = memref.load %arg2[%c23] : memref<144xf32, #tpu.memory_space<smem>>
    %429 = vector.broadcast %428 : f32 to vector<1x16x16xf32>
    %430 = arith.mulf %427, %429 : vector<1x16x16xf32>
    %431 = arith.addf %413, %430 : vector<1x16x16xf32>
    %c59 = arith.constant 59 : index
    %432 = memref.load %arg2[%c59] : memref<144xf32, #tpu.memory_space<smem>>
    %433 = vector.broadcast %432 : f32 to vector<1x16x16xf32>
    %434 = arith.mulf %427, %433 : vector<1x16x16xf32>
    %435 = arith.addf %417, %434 : vector<1x16x16xf32>
    %c95 = arith.constant 95 : index
    %436 = memref.load %arg2[%c95] : memref<144xf32, #tpu.memory_space<smem>>
    %437 = vector.broadcast %436 : f32 to vector<1x16x16xf32>
    %438 = arith.mulf %427, %437 : vector<1x16x16xf32>
    %439 = arith.addf %421, %438 : vector<1x16x16xf32>
    %c131 = arith.constant 131 : index
    %440 = memref.load %arg2[%c131] : memref<144xf32, #tpu.memory_space<smem>>
    %441 = vector.broadcast %440 : f32 to vector<1x16x16xf32>
    %442 = arith.mulf %427, %441 : vector<1x16x16xf32>
    %443 = arith.addf %425, %442 : vector<1x16x16xf32>
    %c0_112 = arith.constant 0 : index
    %c2_113 = arith.constant 2 : index
    %c2_114 = arith.constant 2 : index
    %c0_115 = arith.constant 0 : index
    %444 = vector.load %arg7[%c0_112, %c2_113, %c2_114, %c0_115] : memref<1x4x18x18xf32, #tpu.memory_space<vmem>>, vector<1x1x16x16xf32>
    %445 = vector.shape_cast %444 : vector<1x1x16x16xf32> to vector<1x16x16xf32>
    %c24 = arith.constant 24 : index
    %446 = memref.load %arg2[%c24] : memref<144xf32, #tpu.memory_space<smem>>
    %447 = vector.broadcast %446 : f32 to vector<1x16x16xf32>
    %448 = arith.mulf %445, %447 : vector<1x16x16xf32>
    %449 = arith.addf %431, %448 : vector<1x16x16xf32>
    %c60 = arith.constant 60 : index
    %450 = memref.load %arg2[%c60] : memref<144xf32, #tpu.memory_space<smem>>
    %451 = vector.broadcast %450 : f32 to vector<1x16x16xf32>
    %452 = arith.mulf %445, %451 : vector<1x16x16xf32>
    %453 = arith.addf %435, %452 : vector<1x16x16xf32>
    %c96 = arith.constant 96 : index
    %454 = memref.load %arg2[%c96] : memref<144xf32, #tpu.memory_space<smem>>
    %455 = vector.broadcast %454 : f32 to vector<1x16x16xf32>
    %456 = arith.mulf %445, %455 : vector<1x16x16xf32>
    %457 = arith.addf %439, %456 : vector<1x16x16xf32>
    %c132 = arith.constant 132 : index
    %458 = memref.load %arg2[%c132] : memref<144xf32, #tpu.memory_space<smem>>
    %459 = vector.broadcast %458 : f32 to vector<1x16x16xf32>
    %460 = arith.mulf %445, %459 : vector<1x16x16xf32>
    %461 = arith.addf %443, %460 : vector<1x16x16xf32>
    %c0_116 = arith.constant 0 : index
    %c2_117 = arith.constant 2 : index
    %c2_118 = arith.constant 2 : index
    %c1_119 = arith.constant 1 : index
    %462 = vector.load %arg7[%c0_116, %c2_117, %c2_118, %c1_119] : memref<1x4x18x18xf32, #tpu.memory_space<vmem>>, vector<1x1x16x16xf32>
    %463 = vector.shape_cast %462 : vector<1x1x16x16xf32> to vector<1x16x16xf32>
    %c25 = arith.constant 25 : index
    %464 = memref.load %arg2[%c25] : memref<144xf32, #tpu.memory_space<smem>>
    %465 = vector.broadcast %464 : f32 to vector<1x16x16xf32>
    %466 = arith.mulf %463, %465 : vector<1x16x16xf32>
    %467 = arith.addf %449, %466 : vector<1x16x16xf32>
    %c61 = arith.constant 61 : index
    %468 = memref.load %arg2[%c61] : memref<144xf32, #tpu.memory_space<smem>>
    %469 = vector.broadcast %468 : f32 to vector<1x16x16xf32>
    %470 = arith.mulf %463, %469 : vector<1x16x16xf32>
    %471 = arith.addf %453, %470 : vector<1x16x16xf32>
    %c97 = arith.constant 97 : index
    %472 = memref.load %arg2[%c97] : memref<144xf32, #tpu.memory_space<smem>>
    %473 = vector.broadcast %472 : f32 to vector<1x16x16xf32>
    %474 = arith.mulf %463, %473 : vector<1x16x16xf32>
    %475 = arith.addf %457, %474 : vector<1x16x16xf32>
    %c133 = arith.constant 133 : index
    %476 = memref.load %arg2[%c133] : memref<144xf32, #tpu.memory_space<smem>>
    %477 = vector.broadcast %476 : f32 to vector<1x16x16xf32>
    %478 = arith.mulf %463, %477 : vector<1x16x16xf32>
    %479 = arith.addf %461, %478 : vector<1x16x16xf32>
    %c0_120 = arith.constant 0 : index
    %c2_121 = arith.constant 2 : index
    %c2_122 = arith.constant 2 : index
    %c2_123 = arith.constant 2 : index
    %480 = vector.load %arg7[%c0_120, %c2_121, %c2_122, %c2_123] : memref<1x4x18x18xf32, #tpu.memory_space<vmem>>, vector<1x1x16x16xf32>
    %481 = vector.shape_cast %480 : vector<1x1x16x16xf32> to vector<1x16x16xf32>
    %c26 = arith.constant 26 : index
    %482 = memref.load %arg2[%c26] : memref<144xf32, #tpu.memory_space<smem>>
    %483 = vector.broadcast %482 : f32 to vector<1x16x16xf32>
    %484 = arith.mulf %481, %483 : vector<1x16x16xf32>
    %485 = arith.addf %467, %484 : vector<1x16x16xf32>
    %c62 = arith.constant 62 : index
    %486 = memref.load %arg2[%c62] : memref<144xf32, #tpu.memory_space<smem>>
    %487 = vector.broadcast %486 : f32 to vector<1x16x16xf32>
    %488 = arith.mulf %481, %487 : vector<1x16x16xf32>
    %489 = arith.addf %471, %488 : vector<1x16x16xf32>
    %c98 = arith.constant 98 : index
    %490 = memref.load %arg2[%c98] : memref<144xf32, #tpu.memory_space<smem>>
    %491 = vector.broadcast %490 : f32 to vector<1x16x16xf32>
    %492 = arith.mulf %481, %491 : vector<1x16x16xf32>
    %493 = arith.addf %475, %492 : vector<1x16x16xf32>
    %c134 = arith.constant 134 : index
    %494 = memref.load %arg2[%c134] : memref<144xf32, #tpu.memory_space<smem>>
    %495 = vector.broadcast %494 : f32 to vector<1x16x16xf32>
    %496 = arith.mulf %481, %495 : vector<1x16x16xf32>
    %497 = arith.addf %479, %496 : vector<1x16x16xf32>
    %c0_124 = arith.constant 0 : index
    %c3_125 = arith.constant 3 : index
    %c0_126 = arith.constant 0 : index
    %c0_127 = arith.constant 0 : index
    %498 = vector.load %arg7[%c0_124, %c3_125, %c0_126, %c0_127] : memref<1x4x18x18xf32, #tpu.memory_space<vmem>>, vector<1x1x16x16xf32>
    %499 = vector.shape_cast %498 : vector<1x1x16x16xf32> to vector<1x16x16xf32>
    %c27 = arith.constant 27 : index
    %500 = memref.load %arg2[%c27] : memref<144xf32, #tpu.memory_space<smem>>
    %501 = vector.broadcast %500 : f32 to vector<1x16x16xf32>
    %502 = arith.mulf %499, %501 : vector<1x16x16xf32>
    %503 = arith.addf %485, %502 : vector<1x16x16xf32>
    %c63 = arith.constant 63 : index
    %504 = memref.load %arg2[%c63] : memref<144xf32, #tpu.memory_space<smem>>
    %505 = vector.broadcast %504 : f32 to vector<1x16x16xf32>
    %506 = arith.mulf %499, %505 : vector<1x16x16xf32>
    %507 = arith.addf %489, %506 : vector<1x16x16xf32>
    %c99 = arith.constant 99 : index
    %508 = memref.load %arg2[%c99] : memref<144xf32, #tpu.memory_space<smem>>
    %509 = vector.broadcast %508 : f32 to vector<1x16x16xf32>
    %510 = arith.mulf %499, %509 : vector<1x16x16xf32>
    %511 = arith.addf %493, %510 : vector<1x16x16xf32>
    %c135 = arith.constant 135 : index
    %512 = memref.load %arg2[%c135] : memref<144xf32, #tpu.memory_space<smem>>
    %513 = vector.broadcast %512 : f32 to vector<1x16x16xf32>
    %514 = arith.mulf %499, %513 : vector<1x16x16xf32>
    %515 = arith.addf %497, %514 : vector<1x16x16xf32>
    %c0_128 = arith.constant 0 : index
    %c3_129 = arith.constant 3 : index
    %c0_130 = arith.constant 0 : index
    %c1_131 = arith.constant 1 : index
    %516 = vector.load %arg7[%c0_128, %c3_129, %c0_130, %c1_131] : memref<1x4x18x18xf32, #tpu.memory_space<vmem>>, vector<1x1x16x16xf32>
    %517 = vector.shape_cast %516 : vector<1x1x16x16xf32> to vector<1x16x16xf32>
    %c28 = arith.constant 28 : index
    %518 = memref.load %arg2[%c28] : memref<144xf32, #tpu.memory_space<smem>>
    %519 = vector.broadcast %518 : f32 to vector<1x16x16xf32>
    %520 = arith.mulf %517, %519 : vector<1x16x16xf32>
    %521 = arith.addf %503, %520 : vector<1x16x16xf32>
    %c64 = arith.constant 64 : index
    %522 = memref.load %arg2[%c64] : memref<144xf32, #tpu.memory_space<smem>>
    %523 = vector.broadcast %522 : f32 to vector<1x16x16xf32>
    %524 = arith.mulf %517, %523 : vector<1x16x16xf32>
    %525 = arith.addf %507, %524 : vector<1x16x16xf32>
    %c100 = arith.constant 100 : index
    %526 = memref.load %arg2[%c100] : memref<144xf32, #tpu.memory_space<smem>>
    %527 = vector.broadcast %526 : f32 to vector<1x16x16xf32>
    %528 = arith.mulf %517, %527 : vector<1x16x16xf32>
    %529 = arith.addf %511, %528 : vector<1x16x16xf32>
    %c136 = arith.constant 136 : index
    %530 = memref.load %arg2[%c136] : memref<144xf32, #tpu.memory_space<smem>>
    %531 = vector.broadcast %530 : f32 to vector<1x16x16xf32>
    %532 = arith.mulf %517, %531 : vector<1x16x16xf32>
    %533 = arith.addf %515, %532 : vector<1x16x16xf32>
    %c0_132 = arith.constant 0 : index
    %c3_133 = arith.constant 3 : index
    %c0_134 = arith.constant 0 : index
    %c2_135 = arith.constant 2 : index
    %534 = vector.load %arg7[%c0_132, %c3_133, %c0_134, %c2_135] : memref<1x4x18x18xf32, #tpu.memory_space<vmem>>, vector<1x1x16x16xf32>
    %535 = vector.shape_cast %534 : vector<1x1x16x16xf32> to vector<1x16x16xf32>
    %c29 = arith.constant 29 : index
    %536 = memref.load %arg2[%c29] : memref<144xf32, #tpu.memory_space<smem>>
    %537 = vector.broadcast %536 : f32 to vector<1x16x16xf32>
    %538 = arith.mulf %535, %537 : vector<1x16x16xf32>
    %539 = arith.addf %521, %538 : vector<1x16x16xf32>
    %c65 = arith.constant 65 : index
    %540 = memref.load %arg2[%c65] : memref<144xf32, #tpu.memory_space<smem>>
    %541 = vector.broadcast %540 : f32 to vector<1x16x16xf32>
    %542 = arith.mulf %535, %541 : vector<1x16x16xf32>
    %543 = arith.addf %525, %542 : vector<1x16x16xf32>
    %c101 = arith.constant 101 : index
    %544 = memref.load %arg2[%c101] : memref<144xf32, #tpu.memory_space<smem>>
    %545 = vector.broadcast %544 : f32 to vector<1x16x16xf32>
    %546 = arith.mulf %535, %545 : vector<1x16x16xf32>
    %547 = arith.addf %529, %546 : vector<1x16x16xf32>
    %c137 = arith.constant 137 : index
    %548 = memref.load %arg2[%c137] : memref<144xf32, #tpu.memory_space<smem>>
    %549 = vector.broadcast %548 : f32 to vector<1x16x16xf32>
    %550 = arith.mulf %535, %549 : vector<1x16x16xf32>
    %551 = arith.addf %533, %550 : vector<1x16x16xf32>
    %c0_136 = arith.constant 0 : index
    %c3_137 = arith.constant 3 : index
    %c1_138 = arith.constant 1 : index
    %c0_139 = arith.constant 0 : index
    %552 = vector.load %arg7[%c0_136, %c3_137, %c1_138, %c0_139] : memref<1x4x18x18xf32, #tpu.memory_space<vmem>>, vector<1x1x16x16xf32>
    %553 = vector.shape_cast %552 : vector<1x1x16x16xf32> to vector<1x16x16xf32>
    %c30 = arith.constant 30 : index
    %554 = memref.load %arg2[%c30] : memref<144xf32, #tpu.memory_space<smem>>
    %555 = vector.broadcast %554 : f32 to vector<1x16x16xf32>
    %556 = arith.mulf %553, %555 : vector<1x16x16xf32>
    %557 = arith.addf %539, %556 : vector<1x16x16xf32>
    %c66 = arith.constant 66 : index
    %558 = memref.load %arg2[%c66] : memref<144xf32, #tpu.memory_space<smem>>
    %559 = vector.broadcast %558 : f32 to vector<1x16x16xf32>
    %560 = arith.mulf %553, %559 : vector<1x16x16xf32>
    %561 = arith.addf %543, %560 : vector<1x16x16xf32>
    %c102 = arith.constant 102 : index
    %562 = memref.load %arg2[%c102] : memref<144xf32, #tpu.memory_space<smem>>
    %563 = vector.broadcast %562 : f32 to vector<1x16x16xf32>
    %564 = arith.mulf %553, %563 : vector<1x16x16xf32>
    %565 = arith.addf %547, %564 : vector<1x16x16xf32>
    %c138 = arith.constant 138 : index
    %566 = memref.load %arg2[%c138] : memref<144xf32, #tpu.memory_space<smem>>
    %567 = vector.broadcast %566 : f32 to vector<1x16x16xf32>
    %568 = arith.mulf %553, %567 : vector<1x16x16xf32>
    %569 = arith.addf %551, %568 : vector<1x16x16xf32>
    %c0_140 = arith.constant 0 : index
    %c3_141 = arith.constant 3 : index
    %c1_142 = arith.constant 1 : index
    %c1_143 = arith.constant 1 : index
    %570 = vector.load %arg7[%c0_140, %c3_141, %c1_142, %c1_143] : memref<1x4x18x18xf32, #tpu.memory_space<vmem>>, vector<1x1x16x16xf32>
    %571 = vector.shape_cast %570 : vector<1x1x16x16xf32> to vector<1x16x16xf32>
    %c31 = arith.constant 31 : index
    %572 = memref.load %arg2[%c31] : memref<144xf32, #tpu.memory_space<smem>>
    %573 = vector.broadcast %572 : f32 to vector<1x16x16xf32>
    %574 = arith.mulf %571, %573 : vector<1x16x16xf32>
    %575 = arith.addf %557, %574 : vector<1x16x16xf32>
    %c67 = arith.constant 67 : index
    %576 = memref.load %arg2[%c67] : memref<144xf32, #tpu.memory_space<smem>>
    %577 = vector.broadcast %576 : f32 to vector<1x16x16xf32>
    %578 = arith.mulf %571, %577 : vector<1x16x16xf32>
    %579 = arith.addf %561, %578 : vector<1x16x16xf32>
    %c103 = arith.constant 103 : index
    %580 = memref.load %arg2[%c103] : memref<144xf32, #tpu.memory_space<smem>>
    %581 = vector.broadcast %580 : f32 to vector<1x16x16xf32>
    %582 = arith.mulf %571, %581 : vector<1x16x16xf32>
    %583 = arith.addf %565, %582 : vector<1x16x16xf32>
    %c139 = arith.constant 139 : index
    %584 = memref.load %arg2[%c139] : memref<144xf32, #tpu.memory_space<smem>>
    %585 = vector.broadcast %584 : f32 to vector<1x16x16xf32>
    %586 = arith.mulf %571, %585 : vector<1x16x16xf32>
    %587 = arith.addf %569, %586 : vector<1x16x16xf32>
    %c0_144 = arith.constant 0 : index
    %c3_145 = arith.constant 3 : index
    %c1_146 = arith.constant 1 : index
    %c2_147 = arith.constant 2 : index
    %588 = vector.load %arg7[%c0_144, %c3_145, %c1_146, %c2_147] : memref<1x4x18x18xf32, #tpu.memory_space<vmem>>, vector<1x1x16x16xf32>
    %589 = vector.shape_cast %588 : vector<1x1x16x16xf32> to vector<1x16x16xf32>
    %c32 = arith.constant 32 : index
    %590 = memref.load %arg2[%c32] : memref<144xf32, #tpu.memory_space<smem>>
    %591 = vector.broadcast %590 : f32 to vector<1x16x16xf32>
    %592 = arith.mulf %589, %591 : vector<1x16x16xf32>
    %593 = arith.addf %575, %592 : vector<1x16x16xf32>
    %c68 = arith.constant 68 : index
    %594 = memref.load %arg2[%c68] : memref<144xf32, #tpu.memory_space<smem>>
    %595 = vector.broadcast %594 : f32 to vector<1x16x16xf32>
    %596 = arith.mulf %589, %595 : vector<1x16x16xf32>
    %597 = arith.addf %579, %596 : vector<1x16x16xf32>
    %c104 = arith.constant 104 : index
    %598 = memref.load %arg2[%c104] : memref<144xf32, #tpu.memory_space<smem>>
    %599 = vector.broadcast %598 : f32 to vector<1x16x16xf32>
    %600 = arith.mulf %589, %599 : vector<1x16x16xf32>
    %601 = arith.addf %583, %600 : vector<1x16x16xf32>
    %c140 = arith.constant 140 : index
    %602 = memref.load %arg2[%c140] : memref<144xf32, #tpu.memory_space<smem>>
    %603 = vector.broadcast %602 : f32 to vector<1x16x16xf32>
    %604 = arith.mulf %589, %603 : vector<1x16x16xf32>
    %605 = arith.addf %587, %604 : vector<1x16x16xf32>
    %c0_148 = arith.constant 0 : index
    %c3_149 = arith.constant 3 : index
    %c2_150 = arith.constant 2 : index
    %c0_151 = arith.constant 0 : index
    %606 = vector.load %arg7[%c0_148, %c3_149, %c2_150, %c0_151] : memref<1x4x18x18xf32, #tpu.memory_space<vmem>>, vector<1x1x16x16xf32>
    %607 = vector.shape_cast %606 : vector<1x1x16x16xf32> to vector<1x16x16xf32>
    %c33 = arith.constant 33 : index
    %608 = memref.load %arg2[%c33] : memref<144xf32, #tpu.memory_space<smem>>
    %609 = vector.broadcast %608 : f32 to vector<1x16x16xf32>
    %610 = arith.mulf %607, %609 : vector<1x16x16xf32>
    %611 = arith.addf %593, %610 : vector<1x16x16xf32>
    %c69 = arith.constant 69 : index
    %612 = memref.load %arg2[%c69] : memref<144xf32, #tpu.memory_space<smem>>
    %613 = vector.broadcast %612 : f32 to vector<1x16x16xf32>
    %614 = arith.mulf %607, %613 : vector<1x16x16xf32>
    %615 = arith.addf %597, %614 : vector<1x16x16xf32>
    %c105 = arith.constant 105 : index
    %616 = memref.load %arg2[%c105] : memref<144xf32, #tpu.memory_space<smem>>
    %617 = vector.broadcast %616 : f32 to vector<1x16x16xf32>
    %618 = arith.mulf %607, %617 : vector<1x16x16xf32>
    %619 = arith.addf %601, %618 : vector<1x16x16xf32>
    %c141 = arith.constant 141 : index
    %620 = memref.load %arg2[%c141] : memref<144xf32, #tpu.memory_space<smem>>
    %621 = vector.broadcast %620 : f32 to vector<1x16x16xf32>
    %622 = arith.mulf %607, %621 : vector<1x16x16xf32>
    %623 = arith.addf %605, %622 : vector<1x16x16xf32>
    %c0_152 = arith.constant 0 : index
    %c3_153 = arith.constant 3 : index
    %c2_154 = arith.constant 2 : index
    %c1_155 = arith.constant 1 : index
    %624 = vector.load %arg7[%c0_152, %c3_153, %c2_154, %c1_155] : memref<1x4x18x18xf32, #tpu.memory_space<vmem>>, vector<1x1x16x16xf32>
    %625 = vector.shape_cast %624 : vector<1x1x16x16xf32> to vector<1x16x16xf32>
    %c34 = arith.constant 34 : index
    %626 = memref.load %arg2[%c34] : memref<144xf32, #tpu.memory_space<smem>>
    %627 = vector.broadcast %626 : f32 to vector<1x16x16xf32>
    %628 = arith.mulf %625, %627 : vector<1x16x16xf32>
    %629 = arith.addf %611, %628 : vector<1x16x16xf32>
    %c70 = arith.constant 70 : index
    %630 = memref.load %arg2[%c70] : memref<144xf32, #tpu.memory_space<smem>>
    %631 = vector.broadcast %630 : f32 to vector<1x16x16xf32>
    %632 = arith.mulf %625, %631 : vector<1x16x16xf32>
    %633 = arith.addf %615, %632 : vector<1x16x16xf32>
    %c106 = arith.constant 106 : index
    %634 = memref.load %arg2[%c106] : memref<144xf32, #tpu.memory_space<smem>>
    %635 = vector.broadcast %634 : f32 to vector<1x16x16xf32>
    %636 = arith.mulf %625, %635 : vector<1x16x16xf32>
    %637 = arith.addf %619, %636 : vector<1x16x16xf32>
    %c142 = arith.constant 142 : index
    %638 = memref.load %arg2[%c142] : memref<144xf32, #tpu.memory_space<smem>>
    %639 = vector.broadcast %638 : f32 to vector<1x16x16xf32>
    %640 = arith.mulf %625, %639 : vector<1x16x16xf32>
    %641 = arith.addf %623, %640 : vector<1x16x16xf32>
    %c0_156 = arith.constant 0 : index
    %c3_157 = arith.constant 3 : index
    %c2_158 = arith.constant 2 : index
    %c2_159 = arith.constant 2 : index
    %642 = vector.load %arg7[%c0_156, %c3_157, %c2_158, %c2_159] : memref<1x4x18x18xf32, #tpu.memory_space<vmem>>, vector<1x1x16x16xf32>
    %643 = vector.shape_cast %642 : vector<1x1x16x16xf32> to vector<1x16x16xf32>
    %c35 = arith.constant 35 : index
    %644 = memref.load %arg2[%c35] : memref<144xf32, #tpu.memory_space<smem>>
    %645 = vector.broadcast %644 : f32 to vector<1x16x16xf32>
    %646 = arith.mulf %643, %645 : vector<1x16x16xf32>
    %647 = arith.addf %629, %646 : vector<1x16x16xf32>
    %c71 = arith.constant 71 : index
    %648 = memref.load %arg2[%c71] : memref<144xf32, #tpu.memory_space<smem>>
    %649 = vector.broadcast %648 : f32 to vector<1x16x16xf32>
    %650 = arith.mulf %643, %649 : vector<1x16x16xf32>
    %651 = arith.addf %633, %650 : vector<1x16x16xf32>
    %c107 = arith.constant 107 : index
    %652 = memref.load %arg2[%c107] : memref<144xf32, #tpu.memory_space<smem>>
    %653 = vector.broadcast %652 : f32 to vector<1x16x16xf32>
    %654 = arith.mulf %643, %653 : vector<1x16x16xf32>
    %655 = arith.addf %637, %654 : vector<1x16x16xf32>
    %c143 = arith.constant 143 : index
    %656 = memref.load %arg2[%c143] : memref<144xf32, #tpu.memory_space<smem>>
    %657 = vector.broadcast %656 : f32 to vector<1x16x16xf32>
    %658 = arith.mulf %643, %657 : vector<1x16x16xf32>
    %659 = arith.addf %641, %658 : vector<1x16x16xf32>
    %660 = vector.shape_cast %647 : vector<1x16x16xf32> to vector<1x1x16x16xf32>
    %661 = vector.shape_cast %651 : vector<1x16x16xf32> to vector<1x1x16x16xf32>
    %662 = vector.shape_cast %655 : vector<1x16x16xf32> to vector<1x1x16x16xf32>
    %663 = vector.shape_cast %659 : vector<1x16x16xf32> to vector<1x1x16x16xf32>
    %664 = tpu.concatenate %660, %661, %662, %663 in 1 : vector<1x1x16x16xf32>, vector<1x1x16x16xf32>, vector<1x1x16x16xf32>, vector<1x1x16x16xf32> -> vector<1x4x16x16xf32>
    %c0_160 = arith.constant 0 : index
    %c0_161 = arith.constant 0 : index
    %665 = vector.load %arg4[%c0_160, %c0_161] : memref<1x16xf32, #tpu.memory_space<vmem>>, vector<1x16xf32>
    %c0_162 = arith.constant 0 : index
    %c0_163 = arith.constant 0 : index
    %666 = vector.load %arg5[%c0_162, %c0_163] : memref<1x16xf32, #tpu.memory_space<vmem>>, vector<1x16xf32>
    %cst_164 = arith.constant dense<0.000000e+00> : vector<1x4x16xf32>
    %667 = vector.multi_reduction <add>, %664, %cst_164 [3] : vector<1x4x16x16xf32> to vector<1x4x16xf32>
    %668 = vector.shape_cast %667 : vector<1x4x16xf32> to vector<1x4x16x1xf32>
    %cst_165 = arith.constant 1.600000e+01 : f32
    %669 = vector.broadcast %cst_165 : f32 to vector<1x4x16x1xf32>
    %670 = arith.divf %668, %669 : vector<1x4x16x1xf32>
    %671 = vector.broadcast %670 : vector<1x4x16x1xf32> to vector<1x4x16x16xf32>
    %672 = arith.subf %664, %671 : vector<1x4x16x16xf32>
    %673 = arith.mulf %672, %672 : vector<1x4x16x16xf32>
    %cst_166 = arith.constant dense<0.000000e+00> : vector<1x4x16xf32>
    %674 = vector.multi_reduction <add>, %673, %cst_166 [3] : vector<1x4x16x16xf32> to vector<1x4x16xf32>
    %675 = vector.shape_cast %674 : vector<1x4x16xf32> to vector<1x4x16x1xf32>
    %cst_167 = arith.constant 1.600000e+01 : f32
    %676 = vector.broadcast %cst_167 : f32 to vector<1x4x16x1xf32>
    %677 = arith.divf %675, %676 : vector<1x4x16x1xf32>
    %cst_168 = arith.constant 9.99999974E-6 : f32
    %678 = vector.broadcast %cst_168 : f32 to vector<1x4x16x1xf32>
    %679 = arith.addf %677, %678 : vector<1x4x16x1xf32>
    %680 = math.rsqrt %679 : vector<1x4x16x1xf32>
    %681 = vector.broadcast %680 : vector<1x4x16x1xf32> to vector<1x4x16x16xf32>
    %682 = arith.mulf %672, %681 : vector<1x4x16x16xf32>
    %683 = vector.shape_cast %665 : vector<1x16xf32> to vector<1x1x1x16xf32>
    %684 = vector.broadcast %683 : vector<1x1x1x16xf32> to vector<1x4x16x16xf32>
    %685 = arith.mulf %682, %684 : vector<1x4x16x16xf32>
    %686 = vector.shape_cast %666 : vector<1x16xf32> to vector<1x1x1x16xf32>
    %687 = vector.broadcast %686 : vector<1x1x1x16xf32> to vector<1x4x16x16xf32>
    %688 = arith.addf %685, %687 : vector<1x4x16x16xf32>
    %cst_169 = arith.constant 0.000000e+00 : f32
    %689 = vector.broadcast %cst_169 : f32 to vector<1x4x16x16xf32>
    %690 = arith.maximumf %688, %689 : vector<1x4x16x16xf32>
    %c0_170 = arith.constant 0 : index
    %c0_171 = arith.constant 0 : index
    %c0_172 = arith.constant 0 : index
    %c0_173 = arith.constant 0 : index
    %691 = vector.load %arg6[%c0_170, %c0_171, %c0_172, %c0_173] : memref<1x4x16x16xf32, #tpu.memory_space<vmem>>, vector<1x4x16x16xf32>
    tpu.vector_store %arg6[%c0_170, %c0_171, %c0_172, %c0_173], %690 {strides = array<i32>} : memref<1x4x16x16xf32, #tpu.memory_space<vmem>>, vector<1x4x16x16xf32>,
    return
  }
  func.func @transform_0(%arg0: i32) -> (i32, i32, i32, i32) {
    %c0_i32 = arith.constant 0 : i32
    %c0_i32_0 = arith.constant 0 : i32
    %c0_i32_1 = arith.constant 0 : i32
    %c0_i32_2 = arith.constant 0 : i32
    return %arg0, %c0_i32, %c0_i32_0, %c0_i32_1 : i32, i32, i32, i32
  }
  func.func @transform_1(%arg0: i32) -> i32 {
    %c0_i32 = arith.constant 0 : i32
    %c0_i32_0 = arith.constant 0 : i32
    return %c0_i32 : i32
  }
  func.func @transform_2(%arg0: i32) -> i32 {
    %c0_i32 = arith.constant 0 : i32
    %c0_i32_0 = arith.constant 0 : i32
    return %c0_i32 : i32
  }
  func.func @transform_3(%arg0: i32) -> (i32, i32) {
    %c0_i32 = arith.constant 0 : i32
    %c0_i32_0 = arith.constant 0 : i32
    %c0_i32_1 = arith.constant 0 : i32
    return %c0_i32, %c0_i32_0 : i32, i32
  }
  func.func @transform_4(%arg0: i32) -> (i32, i32) {
    %c0_i32 = arith.constant 0 : i32
    %c0_i32_0 = arith.constant 0 : i32
    %c0_i32_1 = arith.constant 0 : i32
    return %c0_i32, %c0_i32_0 : i32, i32
  }
  func.func @transform_5(%arg0: i32) -> (i32, i32, i32, i32) {
    %c0_i32 = arith.constant 0 : i32
    %c0_i32_0 = arith.constant 0 : i32
    %c0_i32_1 = arith.constant 0 : i32
    %c0_i32_2 = arith.constant 0 : i32
    return %arg0, %c0_i32, %c0_i32_0, %c0_i32_1 : i32, i32, i32, i32
  }
}

</mosaic_0001>

<bundles_post_ra>
// kernel: tpu_custom_call.1
= control target key start
LH: loop header
LB: loop body
LE: loop exit
PB: predicated region body
PF: predicated region fallthrough
CT: control target
= control target key end

     0   :  { %s4301_s0 = inlined_call_operand.hbm [shape: f32[2,4,16,16], index: 0, kind: input, shape index: {}]   ;;  %s4302_s1 = inlined_call_operand.hbm [shape: f32[144], index: 1, kind: input, shape index: {}]   ;;  %s4303_s2 = inlined_call_operand.vmem [shape: f32[4], index: 2, kind: input, shape index: {}]   ;;  %s4304_s3 = inlined_call_operand.vmem [shape: f32[1,16], index: 3, kind: input, shape index: {}]   ;;  %s4305_s4 = inlined_call_operand.vmem [shape: f32[1,16], index: 4, kind: input, shape index: {}]   ;;  %s4306_s5 = inlined_call_operand.hbm [shape: f32[2,4,16,16], index: 5, kind: output, shape index: {}]  }
   0x1   :  { %4307 = sst [smem:[#allocation16_spill]] %s4302_s1 }
   0x2   :  { %4308 = sst [smem:[#allocation17_spill]] %s4303_s2 }
   0x3   :  { %10 = vsyncpa [#allocation4], 0 }
   0x4   :  { %12 = vsyncpa [#allocation4 + $0x1], 0 }
   0x5   :  { %13 = vsyncpa [#allocation6], 0 }
   0x6   :  { %14 = vsyncpa [#allocation7], 0 }
   0x7   :  { %15 = vsyncpa [#allocation5], 0 }
   0x8   :  { %17 = vsyncpa [#allocation5 + $0x1], 0  ;;  %s2778_s18 = smov 0   ;;  %s2780_s19 = smov 0  }
   0x9   :  { %s2782_s20 = smov 0   ;;  %s2784_s21 = smov 0  }
   0xa LB: > { %s2799_s22 = sadd.s32 4294967295, %s2735_s21   ;;  %s2339_s23 = sadd.s32 4294967294, %s2735_s21   ;;  %s2735_s21 = sphi %s2784_s21, %s4323_s21   ;;  %s2731_s20 = sphi %s2782_s20, %s4322_s20   ;;  %s2727_s19 = sphi %s2780_s19, %s4321_s19   ;;  %s2723_s18 = sphi %s2778_s18, %s4320_s18  }
   0xb   : > { %s2803_s24 = sadd.s32 1, %s2735_s21   ;;  %s30_s25 = sadd.s32 1, %s2731_s20 }
   0xc   : > { %s27_s26 = ssub.s32 %s2735_s21, %s2803_s24  ;;  %p37_p0 = scmp.ne.s32.totalorder %s2731_s20, %s2727_s19 }
   0xd   : > { %p28_p1 = scmp.eq.s32.totalorder %s27_s26, 0  ;;  %p38_p2 = scmp.eq.s32.totalorder %s2735_s21, 0 }
   0xe   : > { %p43_p3 = scmp.ne.s32.totalorder %s2727_s19, %s2723_s18  ;;  %p44_p4 = scmp.eq.s32.totalorder %s2799_s22, 0 }
   0xf   : > { %s2815_s27 = scalar_select %p28_p1, %s2731_s20, %s30_s25  }
  0x10   : > { %p2817_p5 = por %p38_p2, %p37_p0  ;;  %p2823_p6 = por %p44_p4, %p43_p3 }
  0x11   : > { %4309 = sst [smem:[#allocation15_spill]] %s2815_s27  ;;  %p151_p7 = scmp.eq.s32.totalorder %s2799_s22, 1 }
  0x12   : > { %p157_p8 = scmp.eq.s32.totalorder %s2339_s23, 1  ;;  %p2340_p9 = scmp.ge.s32.totalorder %s2735_s21, 1 }
  0x13   : > { %p164_p10 = scmp.lt.s32.totalorder %s2735_s21, 3  ;;  %p2830_p11 = por %p151_p7, %p37_p0 }
  0x14   : > { %p2834_p12 = por %p157_p8, %p43_p3  ;;  %s4315_s1 = sld [smem:[#allocation16_spill]] }
  0x15   : > { %p2838_p13 = pnand %p2340_p9, %p164_p10  ;;  %p2534_p2 = scmp.lt.s32.totalorder %s2735_s21, 2 }
  0x16   : > { %s4316_s2 = sld [smem:[#allocation17_spill]]  ;;  %s2737_s15 = smov [#allocation8]  }
  0x17   : > { %p2517_p1 = pneg %p2838_p13  ;;  %p2856_p7 = pnand %p2534_p2, %p2817_p5 }
  0x18   : > { %s203_s16 = sand.u32 1, %s2731_s20   ;;  %s2738_s17 = smov [#allocation9]  }
  0x19   : > { %p2518_p3 = pnand %p2517_p1, %p44_p4  ;;  %s2344_s23 = sshll.u32 %s203_s16, 6 }
  0x1a   : > { %s176_s10 = sshll.u32 %s4315_s1, 4  ;;  %s2503_s25 = sshll.u32 %s2735_s21, 6  ;;  %s177_s10 = int_to_ptr.hbm [resolvable:$true] %s176_s10 }
  0x1b   : > { %2520 = dma.hbm_to_smem (!%p2518_p3), %s177_s10, 32, %s2737_s15, [#allocation6]  }
  0x1c   : > { %s186_s13 = sshll.u32 %s4316_s2, 4  ;;  %s212_s9 = scalar_lea.hbm %s4301_s0, %s2503_s25  ;;  %s187_s13 = int_to_ptr.vmem [resolvable:$true] %s186_s13 }
  0x1d   : > { %2523 = dma.vmem_to_smem (!%p2518_p3), %s187_s13, 16, %s2738_s17, [#allocation7]  }
  0x1e   : > { %s207_s11 = scalar_lea.vmem [#allocation3], %s2344_s23  ;;  %s213_s28 = sshll.u32 %s212_s9, 4  ;;  %s214_s28 = int_to_ptr.hbm [resolvable:$true] %s213_s28 }
  0x1f   : > { %s215_s12 = sshll.u32 %s207_s11, 4  ;;  %s204_s1 = scalar_lea.sflag [#allocation4], %s203_s16  ;;  %s216_s12 = int_to_ptr.vmem [resolvable:$true] %s215_s12 }
  0x20   : > { %s2631_s2 = sshra.s32 %s214_s28, 4  ;;  %p2635_p8 = pneg %p2856_p7  ;;  %s2632_s2 = int_to_ptr.hbm [resolvable:$true] %s2631_s2 }
  0x21   : > { %s2633_s27 = scalar_lea.hbm %s2632_s2, 64  ;;  %s2638_s15 = scalar_lea.hbm %s4301_s0, 128 }
  0x22   : > { %p2634_p5 = scmp.ne.s32.totalorder %s2632_s2, %s2633_s27  ;;  %p2639_p1 = scmp.lt.s32.totalorder %s2632_s2, %s4301_s0 }
  0x23   : > { %p2640_p2 = scmp.lt.s32.totalorder %s2638_s15, %s2633_s27 }
  0x24   : > { %p2636_p9 = pnand %p2635_p8, %p2634_p5 }
  0x25   : > { %p2641_p3 = por %p2640_p2, %p2639_p1 }
  0x26   : > { %p2637_p10 = pneg %p2636_p9 }
  0x28   : > { %p2642_p0 = pnand %p2641_p3, %p2637_p10 }
  0x2a   : > { %2645 = shalt.err (!%p2642_p0)
}
  0x2b   : > { %s2739_s16 = smov 128   ;;  %s2740_s23 = smov 8  }
  0x2c   : > { %2527 = dma.hbm_to_vmem [thread:$0]  (!%p2856_p7), %s214_s28, 1024, %s216_s12, %s204_s1, %s2739_s16, %s2739_s16, %s2740_s23  }
  0x2d   : > { %227 = sbr.rel (%p2838_p13) target bundleno = 1094 (0x446), region = 40  ;;  %s2878_s26 = sand.u32 (!%p2838_p13), 1, %s2727_s19  }
  0x2e   : > { %s2348_s2 = sshll.u32 (!%p2838_p13), %s2878_s26, 6  ;;  %s230_s27 = scalar_lea.sflag (!%p2838_p13), [#allocation4], %s2878_s26 }
  0x2f   : > { %s2884_s8 = scalar_lea.vmem (!%p2838_p13), [#allocation3], %s2348_s2 }
  0x32   : > { %2706 = dma.done.wait (%p2823_p6), %s230_s27, 1024  }
  0x33   : > { %2708 = vsyncadd (%p2823_p6), %s230_s27, 4294966272 }
  0x34   : > { %2710 = dma.done.wait (%p44_p4), [#allocation6], 32  }
  0x35   : > { %2712 = vsyncadd (%p44_p4), [#allocation6], 4294967264 }
  0x36   : > { %2714 = dma.done.wait (%p44_p4), [#allocation7], 16  }
  0x37   : > { %2716 = vsyncadd (%p44_p4), [#allocation7], 4294967280 }
  0x38   : > { %249 = sfence }
  0x39   : > { %v286_v0 = vld [vmem:[%s2884_s8] sm:$0xff]  ;;  %v288_v1 = vld [vmem:[%s2884_s8 + $0x10] sm:$0xff]  ;;  %s2741_s1 = smov 1   ;;  %v287_v3 = vld [vmem:[%s2884_s8 + $0x8] sm:$0xff]  ;;  %vm272_vm0 = vcmask 146432   ;;  %v2742_v5 = vmov 0.0  }
  0x3a   : > { %302 = vrot.lane.b32.xlu0 %v286_v0, %s2741_s1  ;;  %306 = vrot.lane.b32.xlu1 %v288_v1, %s2741_s1  ;;  %v290_v2 = vld [vmem:[%s2884_s8 + $0x20] sm:$0xff]  ;;  %v289_v4 = vld [vmem:[%s2884_s8 + $0x18] sm:$0xff]  ;;  %273 = vst.msk [vmem:[#allocation2] sm:$0xff] %vm272_vm0, %v2742_v5  ;;  %vm275_vm1 = vcmask 140288   ;;  %s2359_s29 = sld [smem:[#allocation8 + $0x25]]  ;;  %vm326_vm2 = vcmask 138248  }
  0x3b   : > { %310 = vrot.lane.b32.xlu2 %v290_v2, %s2741_s1  ;;  %274 = vst.msk [vmem:[#allocation2 + $0x8] sm:$0xff] %vm272_vm0, %v2742_v5  ;;  %v291_v6 = vld [vmem:[%s2884_s8 + $0x28] sm:$0xff]  ;;  %v293_v7 = vld [vmem:[%s2884_s8 + $0x38] sm:$0xff]  ;;  %v292_v8 = vld [vmem:[%s2884_s8 + $0x30] sm:$0xff]  ;;  %s2358_s7 = sld [smem:[#allocation8 + $0x1]]  ;;  %s2743_s9 = smov 127  }
  0x3c   : > { %277 = vst.msk [vmem:[#allocation2 + $0x18] sm:$0xff] %vm272_vm0, %v2742_v5  ;;  %s2360_s14 = sld [smem:[#allocation8 + $0x49]]  ;;  %s2744_s10 = smov 126   ;;  %vm2004_vm3 = vcmask 130048  }
  0x3d   : > { %278 = vst.msk [vmem:[#allocation2 + $0x20] sm:$0xff] %vm272_vm0, %v2742_v5  ;;  %s2362_s11 = sld [smem:[#allocation8 + $0x2]] }
  0x3e   : > { %280 = vst.msk [vmem:[#allocation2 + $0x30] sm:$0xff] %vm272_vm0, %v2742_v5  ;;  %s2361_s12 = sld [smem:[#allocation8 + $0x6d]] }
  0x3f   : > { %281 = vst.msk [vmem:[#allocation2 + $0x38] sm:$0xff] %vm272_vm0, %v2742_v5  ;;  %s2363_s28 = sld [smem:[#allocation8 + $0x26]] }
  0x40   : > { %283 = vst.msk [vmem:[#allocation2 + $0x48] sm:$0xff] %vm272_vm0, %v2742_v5  ;;  %v384_v10 = vstv %s2359_s29  ;;  %s2365_s13 = sld [smem:[#allocation8 + $0x6e]] }
  0x41   : > { %284 = vst.msk [vmem:[#allocation2 + $0x50] sm:$0xff] %vm272_vm0, %v2742_v5  ;;  %v370_v11 = vstv %s2358_s7  ;;  %s2364_s15 = sld [smem:[#allocation8 + $0x4a]] }
  0x42   : > { %304 = vrot.lane.b32.xlu0 %v287_v3, %s2741_s1  ;;  %308 = vrot.lane.b32.xlu1 %v289_v4, %s2741_s1  ;;  %276 = vst.msk [vmem:[#allocation2 + $0x10] sm:$0x3] %vm275_vm1, %v2742_v5  ;;  %v398_v17 = vstv %s2360_s14  ;;  %s2370_s17 = sld [smem:[#allocation8 + $0x4]] }
  0x43   : > { %312 = vrot.lane.b32.xlu2 %v291_v6, %s2741_s1  ;;  %279 = vst.msk [vmem:[#allocation2 + $0x28] sm:$0x3] %vm275_vm1, %v2742_v5  ;;  %v426_v21 = vstv %s2362_s11  ;;  %s2372_s25 = sld [smem:[#allocation8 + $0x4c]] }
  0x44   : > { %282 = vst.msk [vmem:[#allocation2 + $0x40] sm:$0x3] %vm275_vm1, %v2742_v5  ;;  %v412_v22 = vstv %s2361_s12  ;;  %s2371_s16 = sld [smem:[#allocation8 + $0x28]] }
  0x45   : > { %285 = vst.msk [vmem:[#allocation2 + $0x58] sm:$0x3] %vm275_vm1, %v2742_v5  ;;  %v440_v26 = vstv %s2363_s28  ;;  %s2373_s23 = sld [smem:[#allocation8 + $0x70]] }
  0x46   : > { %v468_v30 = vstv %s2365_s13  ;;  %s2375_s27 = sld [smem:[#allocation8 + $0x29]] }
  0x47   : > { %v454_v31 = vstv %s2364_s15  ;;  %s2374_s8 = sld [smem:[#allocation8 + $0x5]] }
  0x48   : > { %v508_v36 = vstv %s2370_s17  ;;  %s2382_s29 = sld [smem:[#allocation8 + $0x7]] }
  0x49   : > { %v536_v42 = vstv %s2372_s25  ;;  %s2377_s7 = sld [smem:[#allocation8 + $0x71]] }
  0x4a   : > { %316 = vrot.lane.b32.xlu1 %v293_v7, %s2741_s1  ;;  %314 = vrot.lane.b32.xlu0 %v292_v8, %s2741_s1  ;;  %v522_v43 = vstv %s2371_s16  ;;  %s2376_s1 = sld [smem:[#allocation8 + $0x4d]] }
  0x4b   : > { %v550_v48 = vstv %s2373_s23  ;;  %s2383_s14 = sld [smem:[#allocation8 + $0x2b]] }
  0x4c   : > { %v578_v53 = vstv %s2375_s27  ;;  %s2385_s11 = sld [smem:[#allocation8 + $0x73]] }
  0x4d   : > { %v564_v54 = vstv %s2374_s8  ;;  %s2384_s12 = sld [smem:[#allocation8 + $0x4f]] }
  0x4e   : > { %v646_v1 = vstv %s2382_s29  ;;  %s2386_s28 = sld [smem:[#allocation8 + $0x8]] }
  0x4f   : > { %v606_v2 = vstv %s2377_s7  ;;  %s3006_s13 = sld [smem:[#allocation8 + $0x50]] }
  0x50   : > { %v592_v59 = vstv %s2376_s1  ;;  %s2387_s15 = sld [smem:[#allocation8 + $0x2c]] }
  0x51   : > { %v660_v7 = vstv %s2383_s14  ;;  %s3017_s17 = sld [smem:[#allocation8 + $0x74]] }
  0x52   : > { %s3019_s25 = sld [smem:[#allocation8]] }
  0x53   : > { %s3024_s16 = sld [smem:[#allocation9]] }
  0x54   : > { %s3029_s23 = sld [smem:[#allocation8 + $0x48]] }
  0x55   : > { %s3033_s27 = sld [smem:[#allocation8 + $0x3]] }
  0x56   : > { %s3036_s8 = sld [smem:[#allocation8 + $0x2e]] }
  0x57   : > { %s3039_s1 = sld [smem:[#allocation8 + $0xa]] }
  0x58   : > { %s3044_s29 = sld [smem:[#allocation9 + $0x2]] }
  0x59   : > { %s3050_s7 = sld [smem:[#allocation8 + $0x24]] }
  0x5a   : > { %s3056_s14 = sld [smem:[#allocation8 + $0x4b]] }
  0x95   : > { %v311_v40 = vpop.permute.xlu2 %310 }
  0x96   : > { %331 = vst.msk [vmem:[#allocation2 + $0x31] sm:$0xff] %vm326_vm2, %v311_v40  ;;  %v336_v40 = vstv %s3024_s16  ;;  %s3102_s16 = sld [smem:[#allocation8 + $0x76]] }
  0x9d   : > { %v313_v47 = vpop.permute.xlu2 %312 }
  0x9e   : > { %332 = vst.msk [vmem:[#allocation2 + $0x39] sm:$0xff] %vm326_vm2, %v313_v47 }
  0xac   : > { %v303_v9 = vpop.permute.xlu0 %302  ;;  %v307_v52 = vpop.permute.xlu1 %306 }
  0xad   : > { %327 = vst.msk [vmem:[#allocation2 + $0x1] sm:$0xff] %vm326_vm2, %v303_v9 }
  0xae   : > { %329 = vst.msk [vmem:[#allocation2 + $0x19] sm:$0xff] %vm326_vm2, %v307_v52  ;;  %v484_v52 = vstv %s3033_s27  ;;  %s3127_s27 = sld [smem:[#allocation8 + $0x2f]] }
  0xb4   : > { %v2907_v12 = vld [vmem:[#allocation2] sm:$0xff]  ;;  %v305_v13 = vpop.permute.xlu0 %304  ;;  %v309_v58 = vpop.permute.xlu1 %308 }
  0xb5   : > { %328 = vst.msk [vmem:[#allocation2 + $0x9] sm:$0xff] %vm326_vm2, %v305_v13  ;;  %v385_v14 = vmul.f32 %v384_v10, %v2907_v12  ;;  %v371_v15 = vmul.f32 %v370_v11, %v2907_v12  ;;  %v399_v23 = vmul.f32 %v398_v17, %v2907_v12  ;;  %v427_v24 = vmul.f32 %v426_v21, %v2907_v12  ;;  %v2949_v41 = vld [vmem:[#allocation2 + $0x1] sm:$0xff] }
  0xb6   : > { %v413_v25 = vmul.f32 %v412_v22, %v2907_v12  ;;  %v441_v32 = vmul.f32 %v440_v26, %v2907_v12  ;;  %v469_v33 = vmul.f32 %v468_v30, %v2907_v12  ;;  %v455_v34 = vmul.f32 %v454_v31, %v2907_v12  ;;  %330 = vst.msk [vmem:[#allocation2 + $0x21] sm:$0xff] %vm326_vm2, %v309_v58 }
  0xb7   : > { %389 = vrot.lane.b32.xlu1 %v385_v14, %s2743_s9  ;;  %375 = vrot.lane.b32.xlu2 %v371_v15, %s2743_s9  ;;  %v509_v44 = vmul.f32 %v508_v36, %v2949_v41  ;;  %v537_v45 = vmul.f32 %v536_v42, %v2949_v41  ;;  %v523_v46 = vmul.f32 %v522_v43, %v2949_v41  ;;  %v688_v14 = vstv %s2385_s11  ;;  %s3062_s11 = sld [smem:[#allocation8 + $0x52]] }
  0xb8   : > { %v551_v55 = vmul.f32 %v550_v48, %v2949_v41  ;;  %v579_v56 = vmul.f32 %v578_v53, %v2949_v41  ;;  %v565_v57 = vmul.f32 %v564_v54, %v2949_v41  ;;  %v593_v3 = vmul.f32 %v592_v59, %v2949_v41 }
  0xb9   : > { %v607_v5 = vmul.f32 %v606_v2, %v2949_v41  ;;  %v674_v15 = vstv %s2384_s12  ;;  %s3064_s12 = sld [smem:[#allocation8 + $0x6c]] }
  0xbc   : > { %v2914_v16 = vld [vmem:[#allocation2 + $0x8] sm:$0xff]  ;;  %v317_v63 = vpop.permute.xlu1 %316  ;;  %v315_v8 = vpop.permute.xlu0 %314 }
  0xbd   : > { %v372_v18 = vmul.f32 %v370_v11, %v2914_v16  ;;  %v400_v19 = vmul.f32 %v398_v17, %v2914_v16  ;;  %v386_v20 = vmul.f32 %v384_v10, %v2914_v16  ;;  %v414_v27 = vmul.f32 %v412_v22, %v2914_v16  ;;  %v2940_v35 = vld [vmem:[#allocation2 + $0x9] sm:$0xff]  ;;  %334 = vst.msk [vmem:[#allocation2 + $0x51] sm:$0xff] %vm326_vm2, %v317_v63 }
  0xbe   : > { %v442_v28 = vmul.f32 %v440_v26, %v2914_v16  ;;  %v428_v29 = vmul.f32 %v426_v21, %v2914_v16  ;;  %v456_v37 = vmul.f32 %v454_v31, %v2914_v16  ;;  %v510_v38 = vmul.f32 %v508_v36, %v2940_v35  ;;  %v2978_v0 = vld [vmem:[#allocation2 + $0x2] sm:$0xff]  ;;  %v2987_v6 = vld [vmem:[#allocation2 + $0xa] sm:$0xff]  ;;  %333 = vst.msk [vmem:[#allocation2 + $0x49] sm:$0xff] %vm326_vm2, %v315_v8 }
  0xbf   : > { %377 = vrot.lane.b32.xlu0 %v372_v18, %s2743_s9  ;;  %405 = vrot.lane.b32.xlu1 %v400_v19, %s2743_s9  ;;  %v470_v39 = vmul.f32 %v468_v30, %v2914_v16  ;;  %v524_v49 = vmul.f32 %v522_v43, %v2940_v35  ;;  %v552_v50 = vmul.f32 %v550_v48, %v2940_v35  ;;  %v702_v21 = vstv %s2386_s28  ;;  %s3072_s28 = sld [smem:[#allocation9 + $0x1]] }
  0xc0   : > { %391 = vrot.lane.b32.xlu2 %v386_v20, %s2743_s9  ;;  %v538_v51 = vmul.f32 %v536_v42, %v2940_v35  ;;  %v566_v60 = vmul.f32 %v564_v54, %v2940_v35  ;;  %v594_v61 = vmul.f32 %v592_v59, %v2940_v35  ;;  %v580_v62 = vmul.f32 %v578_v53, %v2940_v35 }
  0xc1   : > { %v647_v4 = vmul.f32 %v646_v1, %v2978_v0  ;;  %v608_v9 = vmul.f32 %v606_v2, %v2940_v35  ;;  %v662_v10 = vmul.f32 %v660_v7, %v2987_v6  ;;  %v648_v11 = vmul.f32 %v646_v1, %v2987_v6 }
  0xc2   : > { %v661_v17 = vmul.f32 %v660_v7, %v2978_v0  ;;  %v689_v18 = vmul.f32 %v688_v14, %v2978_v0  ;;  %v675_v19 = vmul.f32 %v674_v15, %v2978_v0  ;;  %v676_v22 = vmul.f32 %v674_v15, %v2987_v6  ;;  %v3095_v7 = vld [vmem:[#allocation2 + $0x20] sm:$0xff] }
  0xc3   : > { %v730_v26 = vstv %s3006_s13  ;;  %s3080_s13 = sld [smem:[#allocation9 + $0x3]]  ;;  %v352_v1 = vstv %s3050_s7 }
  0xc4   : > { %v354_v8 = vmul.f32 %v352_v1, %v2914_v16  ;;  %s3192_s7 = sld [smem:[#allocation8 + $0x2a]] }
  0xc7   : > { %403 = vrot.lane.b32.xlu0 %v399_v23, %s2743_s9  ;;  %431 = vrot.lane.b32.xlu1 %v427_v24, %s2744_s10  ;;  %v704_v23 = vmul.f32 %v702_v21, %v2987_v6  ;;  %v690_v24 = vmul.f32 %v688_v14, %v2987_v6  ;;  %v364_v14 = vstv %s3064_s12  ;;  %s3213_s12 = sld [smem:[#allocation8 + $0x72]] }
  0xc8   : > { %417 = vrot.lane.b32.xlu2 %v413_v25, %s2743_s9 }
  0xcf   : > { %419 = vrot.lane.b32.xlu0 %v414_v27, %s2743_s9  ;;  %447 = vrot.lane.b32.xlu1 %v442_v28, %s2744_s10  ;;  %v716_v27 = vstv %s2387_s15  ;;  %v703_v28 = vmul.f32 %v702_v21, %v2978_v0  ;;  %s3088_s15 = sld [smem:[#allocation8 + $0x27]]  ;;  %v338_v21 = vstv %s3072_s28 }
  0xd0   : > { %433 = vrot.lane.b32.xlu2 %v428_v29, %s2744_s10  ;;  %v731_v29 = vmul.f32 %v730_v26, %v2978_v0  ;;  %v717_v30 = vmul.f32 %v716_v27, %v2978_v0  ;;  %s3221_s28 = sld [smem:[#allocation8 + $0x79]] }
  0xd7   : > { %445 = vrot.lane.b32.xlu0 %v441_v32, %s2744_s10  ;;  %473 = vrot.lane.b32.xlu1 %v469_v33, %s2744_s10  ;;  %v744_v33 = vstv %s3017_s17  ;;  %s3093_s17 = sld [smem:[#allocation8 + $0x6f]] }
  0xd8   : > { %459 = vrot.lane.b32.xlu2 %v455_v34, %s2744_s10  ;;  %v346_v34 = vstv %s3019_s25  ;;  %s3099_s25 = sld [smem:[#allocation8 + $0xb]] }
  0xd9   : > { %v348_v36 = vmul.f32 %v346_v34, %v2914_v16  ;;  %v347_v47 = vmul.f32 %v346_v34, %v2907_v12 }
  0xdb   : > { %v350_v42 = vadd.f32 %v348_v36, %v336_v40  ;;  %v349_v59 = vadd.f32 %v347_v47, %v336_v40 }
  0xdd   : > { %v502_v47 = vstv %s3093_s17  ;;  %s3243_s17 = sld [smem:[#allocation8 + $0xe]] }
  0xdf   : > { %461 = vrot.lane.b32.xlu0 %v456_v37, %s2744_s10  ;;  %515 = vrot.lane.b32.xlu1 %v510_v38, %s2743_s9  ;;  %v718_v37 = vmul.f32 %v716_v27, %v2987_v6  ;;  %v746_v38 = vmul.f32 %v744_v33, %v2987_v6 }
  0xe0   : > { %475 = vrot.lane.b32.xlu2 %v470_v39, %s2744_s10  ;;  %v732_v39 = vmul.f32 %v730_v26, %v2987_v6 }
  0xe7   : > { %513 = vrot.lane.b32.xlu0 %v509_v44, %s2743_s9  ;;  %541 = vrot.lane.b32.xlu1 %v537_v45, %s2743_s9  ;;  %v358_v44 = vstv %s3029_s23  ;;  %s3172_s23 = sld [smem:[#allocation8 + $0x6]] }
  0xe8   : > { %527 = vrot.lane.b32.xlu2 %v523_v46, %s2743_s9  ;;  %v3058_v46 = vld [vmem:[#allocation2 + $0x18] sm:$0xff]  ;;  %v359_v54 = vmul.f32 %v358_v44, %v2907_v12 }
  0xef   : > { %529 = vrot.lane.b32.xlu0 %v524_v49, %s2743_s9  ;;  %557 = vrot.lane.b32.xlu1 %v552_v50, %s2743_s9  ;;  %v799_v50 = vstv %s3036_s8  ;;  %s3153_s8 = sld [smem:[#allocation8 + $0x77]] }
  0xf0   : > { %543 = vrot.lane.b32.xlu2 %v538_v51, %s2743_s9  ;;  %v785_v51 = vstv %s3039_s1  ;;  %v800_v58 = vmul.f32 %v799_v50, %v3058_v46  ;;  %v801_v26 = vmul.f32 %v799_v50, %v3095_v7  ;;  %v504_v50 = vmul.f32 %v502_v47, %v2940_v35  ;;  %s3155_s1 = sld [smem:[#allocation8 + $0x53]] }
  0xf7   : > { %555 = vrot.lane.b32.xlu0 %v551_v55, %s2743_s9  ;;  %583 = vrot.lane.b32.xlu1 %v579_v56, %s2744_s10  ;;  %v486_v55 = vmul.f32 %v484_v52, %v2940_v35  ;;  %v340_v56 = vstv %s3044_s29  ;;  %s3181_s29 = sld [smem:[#allocation8 + $0xd]] }
  0xf8   : > { %569 = vrot.lane.b32.xlu2 %v565_v57, %s2744_s10  ;;  %v745_v57 = vmul.f32 %v744_v33, %v2978_v0  ;;  %v361_v63 = vadd.f32 %v359_v54, %v340_v56  ;;  %v353_v33 = vmul.f32 %v352_v1, %v2907_v12  ;;  %v360_v1 = vmul.f32 %v358_v44, %v2914_v16 }
  0xfa   : > { %v362_v44 = vadd.f32 %v360_v1, %v340_v56 }
  0xff   : > { %571 = vrot.lane.b32.xlu0 %v566_v60, %s2744_s10  ;;  %599 = vrot.lane.b32.xlu1 %v594_v61, %s2744_s10  ;;  %v786_v60 = vmul.f32 %v785_v51, %v3058_v46 }
 0x100   : > { %585 = vrot.lane.b32.xlu2 %v580_v62, %s2744_s10 }
 0x107   : > { %597 = vrot.lane.b32.xlu0 %v593_v3, %s2744_s10  ;;  %651 = vrot.lane.b32.xlu1 %v647_v4, %s2743_s9  ;;  %v496_v4 = vstv %s3056_s14  ;;  %s3197_s14 = sld [smem:[#allocation8 + $0x55]] }
 0x108   : > { %611 = vrot.lane.b32.xlu2 %v607_v5, %s2744_s10  ;;  %v485_v5 = vmul.f32 %v484_v52, %v2949_v41 }
 0x10f   : > { %613 = vrot.lane.b32.xlu0 %v608_v9, %s2744_s10  ;;  %667 = vrot.lane.b32.xlu1 %v662_v10, %s2743_s9 }
 0x110   : > { %653 = vrot.lane.b32.xlu2 %v648_v11, %s2743_s9 }
 0x111   : > { %v2996_v13 = vpop.permute.xlu2 %375 }
 0x112   : > { %v381_v62 = vadd.f32 %v2996_v13, %v349_v59  ;;  %v813_v13 = vstv %s3062_s11  ;;  %s3199_s11 = sld [smem:[#allocation8 + $0x31]] }
 0x117   : > { %665 = vrot.lane.b32.xlu0 %v661_v17, %s2743_s9  ;;  %693 = vrot.lane.b32.xlu1 %v689_v18, %s2743_s9  ;;  %v366_v17 = vmul.f32 %v364_v14, %v2914_v16 }
 0x118   : > { %679 = vrot.lane.b32.xlu2 %v675_v19, %s2743_s9  ;;  %v497_v19 = vmul.f32 %v496_v4, %v2949_v41 }
 0x11a   : > { %v3004_v20 = vpop.permute.xlu2 %391 }
 0x11f   : > { %681 = vrot.lane.b32.xlu0 %v676_v22, %s2743_s9  ;;  %709 = vrot.lane.b32.xlu1 %v704_v23, %s2744_s10  ;;  %v787_v22 = vmul.f32 %v785_v51, %v3095_v7  ;;  %v815_v23 = vmul.f32 %v813_v13, %v3095_v7 }
 0x120   : > { %695 = vrot.lane.b32.xlu2 %v690_v24, %s2743_s9  ;;  %v356_v24 = vadd.f32 %v354_v8, %v338_v21  ;;  %v855_v8 = vstv %s3127_s27  ;;  %s3289_s27 = sld [smem:[#allocation8 + $0x7a]] }
 0x121   : > { %v857_v16 = vmul.f32 %v855_v8, %v3095_v7 }
 0x122   : > { %v3014_v25 = vpop.permute.xlu2 %417 }
 0x127   : > { %707 = vrot.lane.b32.xlu0 %v703_v28, %s2744_s10  ;;  %735 = vrot.lane.b32.xlu1 %v731_v29, %s2744_s10  ;;  %v342_v28 = vstv %s3080_s13  ;;  %v396_v29 = vadd.f32 %v3004_v20, %v356_v24  ;;  %v827_v20 = vstv %s3102_s16  ;;  %s3231_s13 = sld [smem:[#allocation8 + $0x4e]] }
 0x128   : > { %721 = vrot.lane.b32.xlu2 %v717_v30, %s2744_s10  ;;  %v368_v30 = vadd.f32 %v366_v17, %v342_v28  ;;  %v828_v54 = vmul.f32 %v827_v20, %v3058_v46  ;;  %v883_v17 = vstv %s3153_s8  ;;  %v622_v24 = vstv %s3172_s23  ;;  %s3287_s16 = sld [smem:[#allocation8 + $0x10]] }
 0x129   : > { %v3031_v31 = vpop.permute.xlu1 %389  ;;  %s3304_s8 = sld [smem:[#allocation8 + $0x2d]] }
 0x12a   : > { %v434_v32 = vpop.permute.xlu2 %433  ;;  %s3320_s23 = sld [smem:[#allocation8 + $0x9]] }
 0x12f   : > { %723 = vrot.lane.b32.xlu0 %v718_v37, %s2744_s10  ;;  %751 = vrot.lane.b32.xlu1 %v746_v38, %s2744_s10  ;;  %v490_v37 = vstv %s3088_s15  ;;  %s3240_s15 = sld [smem:[#allocation8 + $0x32]] }
 0x130   : > { %737 = vrot.lane.b32.xlu2 %v732_v39, %s2744_s10  ;;  %v491_v59 = vmul.f32 %v490_v37, %v2949_v41 }
 0x131   : > { %v378_v43 = vpop.permute.xlu0 %377  ;;  %v3054_v45 = vpop.permute.xlu1 %405 }
 0x132   : > { %v382_v48 = vadd.f32 %v378_v43, %v350_v42  ;;  %v460_v49 = vpop.permute.xlu2 %459  ;;  %v841_v42 = vstv %s3099_s25  ;;  %v492_v43 = vmul.f32 %v490_v37, %v2940_v35  ;;  %v885_v37 = vmul.f32 %v883_v17, %v3095_v7  ;;  %s3270_s25 = sld [smem:[#allocation8 + $0x56]] }
 0x133   : > { %v842_v51 = vmul.f32 %v841_v42, %v3058_v46 }
 0x134   : > { %v438_v53 = vadd.f32 %v434_v32, %v382_v48  ;;  %v365_v32 = vmul.f32 %v364_v14, %v2907_v12  ;;  %v814_v12 = vmul.f32 %v813_v13, %v3058_v46  ;;  %v498_v14 = vmul.f32 %v496_v4, %v2940_v35 }
 0x136   : > { %v3078_v61 = vadd.f32 %v486_v55, %v438_v53  ;;  %v367_v52 = vadd.f32 %v365_v32, %v342_v28  ;;  %v355_v53 = vadd.f32 %v353_v33, %v338_v21  ;;  %v923_v32 = vstv %s3181_s29  ;;  %s3326_s29 = sld [smem:[#allocation8 + $0x51]] }
 0x137   : > { %749 = vrot.lane.b32.xlu0 %v745_v57, %s2744_s10  ;;  %804 = vrot.lane.b32.xlu1 %v800_v58, %s2743_s9  ;;  %v623_v33 = vmul.f32 %v622_v24, %v2978_v0 }
 0x138   : > { %790 = vrot.lane.b32.xlu2 %v786_v60, %s2743_s9  ;;  %v423_v57 = vadd.f32 %v3014_v25, %v367_v52  ;;  %v395_v58 = vadd.f32 %v3031_v31, %v355_v53 }
 0x139   : > { %v404_v2 = vpop.permute.xlu0 %403  ;;  %v432_v3 = vpop.permute.xlu1 %431 }
 0x13a   : > { %v409_v9 = vadd.f32 %v404_v2, %v361_v63  ;;  %v437_v10 = vadd.f32 %v432_v3, %v381_v62  ;;  %v476_v11 = vpop.permute.xlu2 %475  ;;  %v503_v63 = vmul.f32 %v502_v47, %v2949_v41  ;;  %v829_v41 = vmul.f32 %v827_v20, %v3095_v7 }
 0x13c   : > { %v465_v15 = vadd.f32 %v460_v49, %v409_v9  ;;  %v3105_v18 = vadd.f32 %v485_v5, %v437_v10  ;;  %v843_v9 = vmul.f32 %v841_v42, %v3095_v7  ;;  %v410_v10 = vadd.f32 %v3054_v45, %v362_v44 }
 0x13d   : > { %v856_v45 = vmul.f32 %v855_v8, %v3058_v46  ;;  %v628_v42 = vstv %s3192_s7  ;;  %v965_v8 = vstv %s3221_s28  ;;  %s3331_s7 = sld [smem:[#allocation8 + $0x7c]] }
 0x13e   : > { %v3114_v27 = vadd.f32 %v497_v19, %v465_v15  ;;  %v869_v19 = vstv %s3155_s1  ;;  %s3313_s1 = sld [smem:[#allocation8 + $0x34]] }
 0x13f   : > { %792 = vrot.lane.b32.xlu0 %v787_v22, %s2743_s9  ;;  %820 = vrot.lane.b32.xlu1 %v815_v23, %s2743_s9  ;;  %v884_v22 = vmul.f32 %v883_v17, %v3058_v46  ;;  %v870_v23 = vmul.f32 %v869_v19, %v3058_v46  ;;  %s3379_s28 = sld [smem:[#allocation8 + $0x59]] }
 0x140   : > { %806 = vrot.lane.b32.xlu2 %v801_v26, %s2743_s9  ;;  %v3194_v26 = vld [vmem:[#allocation2 + $0x21] sm:$0xff] }
 0x141   : > { %v420_v34 = vpop.permute.xlu0 %419  ;;  %v448_v36 = vpop.permute.xlu1 %447 }
 0x142   : > { %v424_v38 = vadd.f32 %v420_v34, %v368_v30  ;;  %v452_v39 = vadd.f32 %v448_v36, %v396_v29  ;;  %v3124_v40 = vpop.permute.xlu2 %527  ;;  %v871_v34 = vmul.f32 %v869_v19, %v3095_v7  ;;  %v925_v36 = vmul.f32 %v923_v32, %v3194_v26 }
 0x144   : > { %v480_v48 = vadd.f32 %v476_v11, %v424_v38  ;;  %v3132_v49 = vadd.f32 %v492_v43, %v452_v39  ;;  %v3216_v43 = vld [vmem:[#allocation2 + $0x19] sm:$0xff] }
 0x145   : > { %v924_v52 = vmul.f32 %v923_v32, %v3216_v43 }
 0x146   : > { %v3138_v55 = vadd.f32 %v504_v50, %v480_v48  ;;  %v951_v48 = vstv %s3197_s14  ;;  %v937_v50 = vstv %s3199_s11  ;;  %s3333_s14 = sld [smem:[#allocation8 + $0x58]] }
 0x147   : > { %818 = vrot.lane.b32.xlu0 %v814_v12, %s2743_s9  ;;  %846 = vrot.lane.b32.xlu1 %v842_v51, %s2744_s10  ;;  %v630_v51 = vmul.f32 %v628_v42, %v2987_v6  ;;  %v952_v53 = vmul.f32 %v951_v48, %v3216_v43  ;;  %s3357_s11 = sld [smem:[#allocation8 + $0x11]] }
 0x148   : > { %832 = vrot.lane.b32.xlu2 %v828_v54, %s2743_s9  ;;  %v938_v54 = vmul.f32 %v937_v50, %v3216_v43 }
 0x149   : > { %v446_v60 = vpop.permute.xlu0 %445  ;;  %v474_v62 = vpop.permute.xlu1 %473 }
 0x14a   : > { %v451_v2 = vadd.f32 %v446_v60, %v395_v58  ;;  %v479_v3 = vadd.f32 %v474_v62, %v423_v57  ;;  %v3150_v5 = vpop.permute.xlu2 %543  ;;  %v640_v60 = vstv %s3213_s12  ;;  %s3369_s12 = sld [smem:[#allocation8 + $0x75]] }
 0x14c   : > { %v3157_v25 = vadd.f32 %v491_v59, %v451_v2  ;;  %v3159_v31 = vadd.f32 %v503_v63, %v479_v3  ;;  %v629_v2 = vmul.f32 %v628_v42, %v2978_v0 }
 0x14f   : > { %834 = vrot.lane.b32.xlu0 %v829_v41, %s2743_s9  ;;  %862 = vrot.lane.b32.xlu1 %v857_v16, %s2744_s10  ;;  %v953_v16 = vmul.f32 %v951_v48, %v3194_v26  ;;  %v642_v48 = vmul.f32 %v640_v60, %v2987_v6 }
 0x150   : > { %848 = vrot.lane.b32.xlu2 %v843_v9, %s2744_s10  ;;  %v634_v9 = vstv %s3231_s13  ;;  %s3382_s13 = sld [smem:[#allocation8 + $0x35]] }
 0x151   : > { %v462_v11 = vpop.permute.xlu0 %461  ;;  %v3170_v13 = vpop.permute.xlu1 %515  ;;  %v635_v32 = vmul.f32 %v634_v9, %v2978_v0 }
 0x152   : > { %v466_v56 = vadd.f32 %v462_v11, %v410_v10  ;;  %v570_v15 = vpop.permute.xlu2 %569  ;;  %v520_v10 = vadd.f32 %v3170_v13, %v3078_v61 }
 0x154   : > { %v3179_v21 = vadd.f32 %v498_v14, %v466_v56  ;;  %v624_v14 = vmul.f32 %v622_v24, %v2987_v6 }
 0x156   : > { %v548_v11 = vadd.f32 %v3150_v5, %v3179_v21  ;;  %v966_v5 = vmul.f32 %v965_v8, %v3216_v43 }
 0x157   : > { %860 = vrot.lane.b32.xlu0 %v856_v45, %s2744_s10  ;;  %888 = vrot.lane.b32.xlu1 %v884_v22, %s2744_s10  ;;  %v993_v22 = vstv %s3240_s15  ;;  %s3410_s15 = sld [smem:[#allocation8 + $0x7d]] }
 0x158   : > { %874 = vrot.lane.b32.xlu2 %v870_v23, %s2744_s10  ;;  %v636_v23 = vmul.f32 %v634_v9, %v2987_v6  ;;  %v994_v13 = vmul.f32 %v993_v22, %v3216_v43 }
 0x159   : > { %v514_v35 = vpop.permute.xlu0 %513  ;;  %v3189_v4 = vpop.permute.xlu1 %541 }
 0x15a   : > { %v519_v28 = vadd.f32 %v514_v35, %v3105_v18  ;;  %v586_v29 = vpop.permute.xlu2 %585  ;;  %v979_v35 = vstv %s3243_s17  ;;  %v547_v24 = vadd.f32 %v3189_v4, %v3114_v27  ;;  %s3424_s17 = sld [smem:[#allocation8 + $0x37]] }
 0x15b   : > { %v980_v21 = vmul.f32 %v979_v35, %v3216_v43  ;;  %v981_v27 = vmul.f32 %v979_v35, %v3194_v26 }
 0x15c   : > { %v575_v30 = vadd.f32 %v570_v15, %v519_v28 }
 0x15e   : > { %v3206_v38 = vadd.f32 %v623_v33, %v575_v30 }
 0x15f   : > { %876 = vrot.lane.b32.xlu0 %v871_v34, %s2744_s10  ;;  %930 = vrot.lane.b32.xlu1 %v925_v36, %s2743_s9 }
 0x160   : > { %890 = vrot.lane.b32.xlu2 %v885_v37, %s2744_s10  ;;  %v1007_v37 = vstv %s3270_s25  ;;  %s3427_s25 = sld [smem:[#allocation8 + $0x13]] }
 0x161   : > { %v530_v18 = vpop.permute.xlu0 %529  ;;  %v3211_v39 = vpop.permute.xlu1 %557  ;;  %v1009_v4 = vmul.f32 %v1007_v37, %v3194_v26 }
 0x162   : > { %v534_v20 = vadd.f32 %v530_v18, %v3132_v49  ;;  %v612_v47 = vpop.permute.xlu2 %611  ;;  %v533_v49 = vadd.f32 %v3124_v40, %v3157_v25  ;;  %v641_v40 = vmul.f32 %v640_v60, %v2978_v0  ;;  %v939_v25 = vmul.f32 %v937_v50, %v3194_v26 }
 0x163   : > { %v995_v18 = vmul.f32 %v993_v22, %v3194_v26  ;;  %v562_v0 = vadd.f32 %v3211_v39, %v3138_v55  ;;  %v1008_v55 = vmul.f32 %v1007_v37, %v3216_v43  ;;  %v1089_v22 = vstv %s3333_s14  ;;  %s3495_s14 = sld [smem:[#allocation8 + $0x38]] }
 0x164   : > { %v590_v12 = vadd.f32 %v586_v29, %v534_v20 }
 0x166   : > { %v3227_v57 = vadd.f32 %v630_v51, %v590_v12  ;;  %v1061_v51 = vstv %s3287_s16  ;;  %s3429_s16 = sld [smem:[#allocation8 + $0xc]] }
 0x167   : > { %928 = vrot.lane.b32.xlu0 %v924_v52, %s2743_s9  ;;  %956 = vrot.lane.b32.xlu1 %v952_v53, %s2743_s9  ;;  %v1021_v52 = vstv %s3289_s27  ;;  %s3442_s27 = sld [smem:[#allocation8 + $0x54]] }
 0x168   : > { %942 = vrot.lane.b32.xlu2 %v938_v54, %s2743_s9  ;;  %v1022_v54 = vmul.f32 %v1021_v52, %v3216_v43 }
 0x169   : > { %v556_v58 = vpop.permute.xlu0 %555  ;;  %v584_v59 = vpop.permute.xlu1 %583 }
 0x16a   : > { %v561_v62 = vadd.f32 %v556_v58, %v3159_v31  ;;  %v589_v63 = vadd.f32 %v584_v59, %v533_v49  ;;  %v3238_v1 = vpop.permute.xlu2 %653  ;;  %v967_v31 = vmul.f32 %v965_v8, %v3194_v26  ;;  %v767_v58 = vstv %s3304_s8  ;;  %v3328_v59 = vld [vmem:[#allocation2 + $0x22] sm:$0xff]  ;;  %s3448_s8 = sld [smem:[#allocation8 + $0x5b]] }
 0x16b   : > { %v1023_v8 = vmul.f32 %v1021_v52, %v3194_v26 }
 0x16c   : > { %v617_v3 = vadd.f32 %v612_v47, %v561_v62  ;;  %v3246_v41 = vadd.f32 %v629_v2, %v589_v63  ;;  %v3306_v47 = vld [vmem:[#allocation2 + $0x1a] sm:$0xff]  ;;  %v1075_v2 = vstv %s3313_s1  ;;  %s3463_s1 = sld [smem:[#allocation8 + $0x14]] }
 0x16d   : > { %v1062_v39 = vmul.f32 %v1061_v51, %v3306_v47 }
 0x16e   : > { %v3252_v44 = vadd.f32 %v641_v40, %v617_v3  ;;  %v768_v3 = vmul.f32 %v767_v58, %v3058_v46  ;;  %v1077_v40 = vmul.f32 %v1075_v2, %v3328_v59 }
 0x16f   : > { %944 = vrot.lane.b32.xlu0 %v939_v25, %s2743_s9  ;;  %972 = vrot.lane.b32.xlu1 %v967_v31, %s2743_s9  ;;  %v1063_v25 = vmul.f32 %v1061_v51, %v3328_v59  ;;  %v761_v31 = vstv %s3320_s23  ;;  %v769_v51 = vmul.f32 %v767_v58, %v3095_v7  ;;  %s3465_s23 = sld [smem:[#allocation8 + $0x30]] }
 0x170   : > { %958 = vrot.lane.b32.xlu2 %v953_v16, %s2743_s9 }
 0x171   : > { %v572_v56 = vpop.permute.xlu0 %571  ;;  %v600_v15 = vpop.permute.xlu1 %599 }
 0x172   : > { %v576_v17 = vadd.f32 %v572_v56, %v520_v10  ;;  %v604_v19 = vadd.f32 %v600_v15, %v548_v11  ;;  %v3263_v45 = vpop.permute.xlu2 %679  ;;  %v773_v11 = vstv %s3326_s29  ;;  %s3472_s29 = sld [smem:[#allocation8 + $0x7f]] }
 0x174   : > { %v3268_v28 = vadd.f32 %v624_v14, %v576_v17  ;;  %v3272_v61 = vadd.f32 %v636_v23, %v604_v19  ;;  %v1103_v17 = vstv %s3331_s7  ;;  %v763_v19 = vmul.f32 %v761_v31, %v3095_v7  ;;  %s3475_s7 = sld [smem:[#allocation8 + $0x78]] }
 0x176   : > { %v658_v16 = vadd.f32 %v3238_v1, %v3268_v28  ;;  %v1076_v1 = vmul.f32 %v1075_v2, %v3306_v47  ;;  %v1104_v28 = vmul.f32 %v1103_v17, %v3306_v47 }
 0x177   : > { %970 = vrot.lane.b32.xlu0 %v966_v5, %s2743_s9  ;;  %998 = vrot.lane.b32.xlu1 %v994_v13, %s2744_s10  ;;  %v775_v5 = vmul.f32 %v773_v11, %v3095_v7 }
 0x178   : > { %984 = vrot.lane.b32.xlu2 %v980_v21, %s2744_s10 }
 0x179   : > { %v598_v29 = vpop.permute.xlu0 %597  ;;  %v3282_v30 = vpop.permute.xlu1 %651 }
 0x17a   : > { %v603_v33 = vadd.f32 %v598_v29, %v547_v24  ;;  %v3285_v34 = vpop.permute.xlu2 %695  ;;  %v657_v21 = vadd.f32 %v3282_v30, %v3206_v38  ;;  %v1117_v30 = vstv %s3357_s11  ;;  %s3517_s11 = sld [smem:[#allocation8 + $0x80]] }
 0x17c   : > { %v3291_v36 = vadd.f32 %v635_v32, %v603_v33  ;;  %v762_v33 = vmul.f32 %v761_v31, %v3058_v46 }
 0x17e   : > { %v685_v24 = vadd.f32 %v3263_v45, %v3291_v36  ;;  %v1091_v36 = vmul.f32 %v1089_v22, %v3328_v59 }
 0x17f   : > { %986 = vrot.lane.b32.xlu0 %v981_v27, %s2744_s10  ;;  %1014 = vrot.lane.b32.xlu1 %v1009_v4, %s2744_s10 }
 0x180   : > { %1000 = vrot.lane.b32.xlu2 %v995_v18, %s2744_s10  ;;  %v774_v18 = vmul.f32 %v773_v11, %v3058_v46  ;;  %v3444_v11 = vld [vmem:[#allocation2 + $0x30] sm:$0xff] }
 0x181   : > { %v614_v42 = vpop.permute.xlu0 %613  ;;  %v3302_v20 = vpop.permute.xlu1 %667 }
 0x182   : > { %v618_v50 = vadd.f32 %v614_v42, %v562_v0  ;;  %v722_v12 = vpop.permute.xlu2 %721  ;;  %v1119_v0 = vmul.f32 %v1117_v30, %v3328_v59  ;;  %v1105_v42 = vmul.f32 %v1103_v17, %v3328_v59  ;;  %v1214_v17 = vstv %s3424_s17  ;;  %s3563_s17 = sld [smem:[#allocation8 + $0x3a]] }
 0x184   : > { %v3311_v53 = vadd.f32 %v642_v48, %v618_v50  ;;  %v779_v48 = vstv %s3369_s12  ;;  %v672_v50 = vadd.f32 %v3302_v20, %v3227_v57  ;;  %s3520_s12 = sld [smem:[#allocation8 + $0x5c]] }
 0x187   : > { %1012 = vrot.lane.b32.xlu0 %v1008_v55, %s2744_s10  ;;  %1066 = vrot.lane.b32.xlu1 %v1062_v39, %s2743_s9 }
 0x188   : > { %1026 = vrot.lane.b32.xlu2 %v1022_v54, %s2744_s10 }
 0x189   : > { %v666_v6 = vpop.permute.xlu0 %665  ;;  %v3323_v49 = vpop.permute.xlu1 %693 }
 0x18a   : > { %v671_v60 = vadd.f32 %v666_v6, %v3246_v41  ;;  %v738_v62 = vpop.permute.xlu2 %737 }
 0x18c   : > { %v727_v63 = vadd.f32 %v722_v12, %v671_v60  ;;  %v700_v12 = vadd.f32 %v3285_v34, %v3311_v53  ;;  %v1145_v60 = vstv %s3379_s28  ;;  %v1118_v34 = vmul.f32 %v1117_v30, %v3306_v47  ;;  %s3534_s28 = sld [smem:[#allocation8 + $0xf]] }
 0x18d   : > { %v1146_v20 = vmul.f32 %v1145_v60, %v3306_v47  ;;  %v1228_v30 = vstv %s3448_s8  ;;  %s3599_s8 = sld [smem:[#allocation8 + $0x57]] }
 0x18e   : > { %v3342_v41 = vadd.f32 %v768_v3, %v727_v63  ;;  %v1131_v63 = vstv %s3382_s13  ;;  %s3544_s13 = sld [smem:[#allocation8 + $0x16]] }
 0x18f   : > { %1028 = vrot.lane.b32.xlu0 %v1023_v8, %s2744_s10  ;;  %1082 = vrot.lane.b32.xlu1 %v1077_v40, %s2743_s9  ;;  %v1132_v53 = vmul.f32 %v1131_v63, %v3306_v47  ;;  %v780_v8 = vmul.f32 %v779_v48, %v3058_v46 }
 0x190   : > { %1068 = vrot.lane.b32.xlu2 %v1063_v25, %s2743_s9 }
 0x191   : > { %v682_v9 = vpop.permute.xlu0 %681  ;;  %v710_v10 = vpop.permute.xlu1 %709 }
 0x192   : > { %v686_v14 = vadd.f32 %v682_v9, %v3272_v61  ;;  %v714_v56 = vadd.f32 %v710_v10, %v658_v16  ;;  %v3352_v15 = vpop.permute.xlu2 %790  ;;  %v1090_v61 = vmul.f32 %v1089_v22, %v3306_v47  ;;  %v1147_v9 = vmul.f32 %v1145_v60, %v3328_v59 }
 0x193   : > { %v899_v22 = vstv %s3429_s16  ;;  %s3577_s16 = sld [smem:[#allocation8 + $0x7b]] }
 0x194   : > { %v742_v23 = vadd.f32 %v738_v62, %v686_v14  ;;  %v3359_v35 = vadd.f32 %v763_v19, %v714_v56  ;;  %v781_v62 = vmul.f32 %v779_v48, %v3095_v7  ;;  %v699_v7 = vadd.f32 %v3323_v49, %v3252_v44 }
 0x195   : > { %v1159_v44 = vstv %s3410_s15  ;;  %v1133_v49 = vmul.f32 %v1131_v63, %v3328_v59  ;;  %v1200_v19 = vstv %s3427_s25  ;;  %s3554_s15 = sld [smem:[#allocation8 + $0x5e]] }
 0x196   : > { %v3365_v13 = vadd.f32 %v775_v5, %v742_v23  ;;  %v1161_v16 = vmul.f32 %v1159_v44, %v3328_v59  ;;  %v901_v5 = vmul.f32 %v899_v22, %v3194_v26  ;;  %s3565_s25 = sld [smem:[#allocation8 + $0x33]] }
 0x197   : > { %1080 = vrot.lane.b32.xlu0 %v1076_v1, %s2743_s9  ;;  %1108 = vrot.lane.b32.xlu1 %v1104_v28, %s2743_s9  ;;  %v1160_v1 = vmul.f32 %v1159_v44, %v3306_v47  ;;  %v1215_v28 = vmul.f32 %v1214_v17, %v3444_v11 }
 0x198   : > { %1094 = vrot.lane.b32.xlu2 %v1090_v61, %s2743_s9  ;;  %v1201_v61 = vmul.f32 %v1200_v19, %v3444_v11 }
 0x199   : > { %v708_v29 = vpop.permute.xlu0 %707  ;;  %v736_v32 = vpop.permute.xlu1 %735 }
 0x19a   : > { %v713_v37 = vadd.f32 %v708_v29, %v657_v21  ;;  %v741_v27 = vadd.f32 %v736_v32, %v685_v24  ;;  %v3377_v4 = vpop.permute.xlu2 %806  ;;  %v911_v32 = vstv %s3442_s27  ;;  %s3588_s27 = sld [smem:[#allocation8 + $0x82]] }
 0x19c   : > { %v3384_v38 = vadd.f32 %v762_v33, %v713_v37  ;;  %v3387_v45 = vadd.f32 %v774_v18, %v741_v27  ;;  %v3468_v33 = vld [vmem:[#allocation2 + $0x38] sm:$0xff] }
 0x19d   : > { %v1216_v48 = vmul.f32 %v1214_v17, %v3468_v33 }
 0x19f   : > { %1096 = vrot.lane.b32.xlu0 %v1091_v36, %s2743_s9  ;;  %1124 = vrot.lane.b32.xlu1 %v1119_v0, %s2744_s10  ;;  %v912_v0 = vmul.f32 %v911_v32, %v3216_v43 }
 0x1a0   : > { %1110 = vrot.lane.b32.xlu2 %v1105_v42, %s2743_s9  ;;  %v1202_v42 = vmul.f32 %v1200_v19, %v3468_v33 }
 0x1a1   : > { %v724_v52 = vpop.permute.xlu0 %723  ;;  %v752_v55 = vpop.permute.xlu1 %751 }
 0x1a2   : > { %v728_v39 = vadd.f32 %v724_v52, %v672_v50  ;;  %v756_v54 = vadd.f32 %v752_v55, %v700_v12  ;;  %v3403_v6 = vpop.permute.xlu2 %832  ;;  %v905_v55 = vstv %s3465_s23  ;;  %s3607_s23 = sld [smem:[#allocation8 + $0x17]] }
 0x1a3   : > { %v907_v63 = vmul.f32 %v905_v55, %v3194_v26  ;;  %v906_v44 = vmul.f32 %v905_v55, %v3216_v43 }
 0x1a4   : > { %v3408_v2 = vadd.f32 %v769_v51, %v728_v39  ;;  %v3412_v57 = vadd.f32 %v781_v62, %v756_v54  ;;  %v1256_v62 = vstv %s3463_s1  ;;  %s3604_s1 = sld [smem:[#allocation8 + $0x3b]] }
 0x1a5   : > { %v1258_v19 = vmul.f32 %v1256_v62, %v3468_v33 }
 0x1a6   : > { %v811_v12 = vadd.f32 %v3377_v4, %v3408_v2  ;;  %v1229_v4 = vmul.f32 %v1228_v30, %v3444_v11  ;;  %v1257_v2 = vmul.f32 %v1256_v62, %v3444_v11 }
 0x1a7   : > { %1122 = vrot.lane.b32.xlu0 %v1118_v34, %s2744_s10  ;;  %1150 = vrot.lane.b32.xlu1 %v1146_v20, %s2744_s10  ;;  %v1242_v34 = vstv %s3472_s29  ;;  %v917_v20 = vstv %s3475_s7  ;;  %s3628_s29 = sld [smem:[#allocation8 + $0x5f]] }
 0x1a8   : > { %1136 = vrot.lane.b32.xlu2 %v1132_v53, %s2744_s10  ;;  %v918_v17 = vmul.f32 %v917_v20, %v3216_v43  ;;  %s3645_s7 = sld [smem:[#allocation8 + $0x19]] }
 0x1a9   : > { %v750_v58 = vpop.permute.xlu0 %749  ;;  %v3422_v3 = vpop.permute.xlu1 %804 }
 0x1aa   : > { %v755_v40 = vadd.f32 %v750_v58, %v699_v7  ;;  %v849_v25 = vpop.permute.xlu2 %848  ;;  %v919_v58 = vmul.f32 %v917_v20, %v3194_v26  ;;  %v1043_v20 = vstv %s3565_s25  ;;  %s3713_s25 = sld [smem:[#allocation8 + $0x1a]] }
 0x1ac   : > { %v3431_v31 = vadd.f32 %v780_v8, %v755_v40  ;;  %v810_v40 = vadd.f32 %v3422_v3, %v3342_v41 }
 0x1af   : > { %1138 = vrot.lane.b32.xlu0 %v1133_v49, %s2744_s10  ;;  %1166 = vrot.lane.b32.xlu1 %v1161_v16, %s2744_s10 }
 0x1b0   : > { %1152 = vrot.lane.b32.xlu2 %v1147_v9, %s2744_s10 }
 0x1b1   : > { %v793_v46 = vpop.permute.xlu0 %792  ;;  %v3440_v10 = vpop.permute.xlu1 %820 }
 0x1b2   : > { %v797_v14 = vadd.f32 %v793_v46, %v3359_v35  ;;  %v875_v56 = vpop.permute.xlu2 %874  ;;  %v796_v35 = vadd.f32 %v3352_v15, %v3384_v38  ;;  %v900_v15 = vmul.f32 %v899_v22, %v3216_v43  ;;  %v825_v43 = vadd.f32 %v3440_v10, %v3365_v13 }
 0x1b4   : > { %v853_v23 = vadd.f32 %v849_v25, %v797_v14  ;;  %v838_v25 = vadd.f32 %v3403_v6, %v3431_v31  ;;  %v1244_v6 = vmul.f32 %v1242_v34, %v3468_v33 }
 0x1b6   : > { %v3456_v21 = vadd.f32 %v901_v5, %v853_v23 }
 0x1b7   : > { %1164 = vrot.lane.b32.xlu0 %v1160_v1, %s2744_s10  ;;  %1219 = vrot.lane.b32.xlu1 %v1215_v28, %s2743_s9  ;;  %v913_v1 = vmul.f32 %v911_v32, %v3194_v26  ;;  %v1037_v32 = vstv %s3534_s28  ;;  %s3678_s28 = sld [smem:[#allocation8 + $0x12]] }
 0x1b8   : > { %1205 = vrot.lane.b32.xlu2 %v1201_v61, %s2743_s9 }
 0x1b9   : > { %v819_v24 = vpop.permute.xlu0 %818  ;;  %v847_v29 = vpop.permute.xlu1 %846 }
 0x1ba   : > { %v824_v37 = vadd.f32 %v819_v24, %v3387_v45  ;;  %v852_v27 = vadd.f32 %v847_v29, %v796_v35  ;;  %v891_v18 = vpop.permute.xlu2 %890  ;;  %v1230_v45 = vmul.f32 %v1228_v30, %v3468_v33  ;;  %v1298_v24 = vstv %s3517_s11  ;;  %v3557_v30 = vld [vmem:[#allocation2 + $0x39] sm:$0xff]  ;;  %s3658_s11 = sld [smem:[#allocation8 + $0x36]] }
 0x1bb   : > { %v1284_v29 = vstv %s3520_s12  ;;  %v1299_v10 = vmul.f32 %v1298_v24, %v3444_v11  ;;  %s3669_s12 = sld [smem:[#allocation8 + $0x3d]] }
 0x1bc   : > { %v880_v38 = vadd.f32 %v875_v56, %v824_v37  ;;  %v3477_v36 = vadd.f32 %v900_v15, %v852_v27  ;;  %v1270_v56 = vstv %s3495_s14  ;;  %v1285_v27 = vmul.f32 %v1284_v29, %v3444_v11  ;;  %s3647_s14 = sld [smem:[#allocation8 + $0x83]] }
 0x1bd   : > { %v1272_v31 = vmul.f32 %v1270_v56, %v3468_v33  ;;  %v1271_v13 = vmul.f32 %v1270_v56, %v3444_v11 }
 0x1be   : > { %v3485_v50 = vadd.f32 %v912_v0, %v880_v38 }
 0x1bf   : > { %1207 = vrot.lane.b32.xlu0 %v1202_v42, %s2743_s9  ;;  %1235 = vrot.lane.b32.xlu1 %v1230_v45, %s2743_s9  ;;  %v1338_v45 = vstv %s3544_s13  ;;  %s3682_s13 = sld [smem:[#allocation8 + $0x5a]] }
 0x1c0   : > { %1221 = vrot.lane.b32.xlu2 %v1216_v48, %s2743_s9  ;;  %v1038_v48 = vmul.f32 %v1037_v32, %v3306_v47 }
 0x1c1   : > { %v835_v51 = vpop.permute.xlu0 %834  ;;  %v863_v52 = vpop.permute.xlu1 %862 }
 0x1c2   : > { %v839_v39 = vadd.f32 %v835_v51, %v3412_v57  ;;  %v867_v54 = vadd.f32 %v863_v52, %v811_v12  ;;  %v943_v60 = vpop.permute.xlu2 %942  ;;  %v1243_v57 = vmul.f32 %v1242_v34, %v3444_v11  ;;  %v1286_v12 = vmul.f32 %v1284_v29, %v3468_v33 }
 0x1c3   : > { %v1340_v51 = vmul.f32 %v1338_v45, %v3557_v30  ;;  %v1352_v34 = vstv %s3563_s17  ;;  %v1394_v29 = vstv %s3607_s23  ;;  %s3692_s17 = sld [smem:[#allocation8 + $0x61]] }
 0x1c4   : > { %v895_v53 = vadd.f32 %v891_v18, %v839_v39  ;;  %v3500_v7 = vadd.f32 %v907_v63, %v867_v54  ;;  %v3579_v39 = vld [vmem:[#allocation2 + $0x31] sm:$0xff]  ;;  %v1366_v63 = vstv %s3554_s15  ;;  %s3690_s15 = sld [smem:[#allocation8 + $0x85]] }
 0x1c5   : > { %s3768_s23 = sld [smem:[#allocation8 + $0x40]] }
 0x1c6   : > { %v3506_v8 = vadd.f32 %v919_v58, %v895_v53  ;;  %v1045_v58 = vmul.f32 %v1043_v20, %v3328_v59 }
 0x1c7   : > { %1233 = vrot.lane.b32.xlu0 %v1229_v4, %s2743_s9  ;;  %1261 = vrot.lane.b32.xlu1 %v1257_v2, %s2744_s10  ;;  %v1339_v4 = vmul.f32 %v1338_v45, %v3579_v39  ;;  %v1367_v2 = vmul.f32 %v1366_v63, %v3579_v39 }
 0x1c8   : > { %1247 = vrot.lane.b32.xlu2 %v1243_v57, %s2743_s9  ;;  %v1353_v57 = vmul.f32 %v1352_v34, %v3579_v39 }
 0x1c9   : > { %v861_v49 = vpop.permute.xlu0 %860  ;;  %v889_v16 = vpop.permute.xlu1 %888 }
 0x1ca   : > { %v866_v9 = vadd.f32 %v861_v49, %v810_v40  ;;  %v894_v46 = vadd.f32 %v889_v16, %v838_v25  ;;  %v959_v14 = vpop.permute.xlu2 %958  ;;  %v1055_v25 = vstv %s3577_s16  ;;  %s3725_s16 = sld [smem:[#allocation8 + $0x7e]] }
 0x1cc   : > { %v908_v41 = vadd.f32 %v906_v44, %v866_v9  ;;  %v3522_v3 = vadd.f32 %v918_v17, %v894_v46  ;;  %v1044_v9 = vmul.f32 %v1043_v20, %v3306_v47  ;;  %v1056_v17 = vmul.f32 %v1055_v25, %v3306_v47 }
 0x1cd   : > { %v1436_v20 = vstv %s3647_s14  ;;  %s3788_s14 = sld [smem:[#allocation8 + $0x5d]] }
 0x1ce   : > { %v3527_v22 = vadd.f32 %v943_v60, %v908_v41  ;;  %v1354_v41 = vmul.f32 %v1352_v34, %v3557_v30  ;;  %v1476_v34 = vstv %s3645_s7  ;;  %s3777_s7 = sld [smem:[#allocation8 + $0x15]] }
 0x1cf   : > { %1249 = vrot.lane.b32.xlu0 %v1244_v6, %s2743_s9  ;;  %1277 = vrot.lane.b32.xlu1 %v1272_v31, %s2744_s10  ;;  %v1368_v6 = vmul.f32 %v1366_v63, %v3557_v30 }
 0x1d0   : > { %1263 = vrot.lane.b32.xlu2 %v1258_v19, %s2744_s10  ;;  %v1039_v19 = vmul.f32 %v1037_v32, %v3328_v59 }
 0x1d1   : > { %v877_v23 = vpop.permute.xlu0 %876  ;;  %v931_v5 = vpop.permute.xlu1 %930 }
 0x1d2   : > { %v881_v28 = vadd.f32 %v877_v23, %v825_v43  ;;  %v3540_v61 = vadd.f32 %v931_v5, %v3456_v21  ;;  %v985_v35 = vpop.permute.xlu2 %984  ;;  %v1049_v23 = vstv %s3599_s8  ;;  %s3734_s8 = sld [smem:[#allocation8 + $0x3e]] }
 0x1d3   : > { %v1050_v32 = vmul.f32 %v1049_v23, %v3306_v47 }
 0x1d4   : > { %v915_v37 = vadd.f32 %v913_v1, %v881_v28 }
 0x1d6   : > { %v3549_v18 = vadd.f32 %v959_v14, %v915_v37  ;;  %v1380_v14 = vstv %s3588_s27  ;;  %s3728_s27 = sld [smem:[#allocation8 + $0x62]] }
 0x1d7   : > { %1275 = vrot.lane.b32.xlu0 %v1271_v13, %s2744_s10  ;;  %1303 = vrot.lane.b32.xlu1 %v1299_v10, %s2744_s10  ;;  %v1381_v10 = vmul.f32 %v1380_v14, %v3579_v39 }
 0x1d8   : > { %1289 = vrot.lane.b32.xlu2 %v1285_v27, %s2744_s10 }
 0x1d9   : > { %v929_v26 = vpop.permute.xlu0 %928  ;;  %v957_v21 = vpop.permute.xlu1 %956 }
 0x1da   : > { %v934_v15 = vadd.f32 %v929_v26, %v3477_v36  ;;  %v3561_v38 = vadd.f32 %v957_v21, %v3485_v50  ;;  %v1001_v0 = vpop.permute.xlu2 %1000  ;;  %v1300_v36 = vmul.f32 %v1298_v24, %v3468_v33  ;;  %v1051_v24 = vmul.f32 %v1049_v23, %v3328_v59 }
 0x1db   : > { %v1395_v26 = vmul.f32 %v1394_v29, %v3579_v39  ;;  %v1518_v23 = vstv %s3690_s15  ;;  %s3823_s15 = sld [smem:[#allocation8 + $0x81]] }
 0x1dc   : > { %v990_v42 = vadd.f32 %v985_v35, %v934_v15  ;;  %v1408_v35 = vstv %s3604_s1  ;;  %s3756_s1 = sld [smem:[#allocation8 + $0x86]] }
 0x1dd   : > { %v1409_v27 = vmul.f32 %v1408_v35, %v3579_v39  ;;  %v1410_v47 = vmul.f32 %v1408_v35, %v3557_v30 }
 0x1de   : > { %v3572_v50 = vadd.f32 %v1038_v48, %v990_v42  ;;  %v1422_v48 = vstv %s3628_s29  ;;  %s3775_s29 = sld [smem:[#allocation8 + $0x1c]] }
 0x1df   : > { %1291 = vrot.lane.b32.xlu0 %v1286_v12, %s2744_s10  ;;  %1345 = vrot.lane.b32.xlu1 %v1340_v51, %s2743_s9  ;;  %v1396_v12 = vmul.f32 %v1394_v29, %v3557_v30  ;;  %v1424_v51 = vmul.f32 %v1422_v48, %v3557_v30 }
 0x1e0   : > { %1305 = vrot.lane.b32.xlu2 %v1300_v36, %s2744_s10 }
 0x1e1   : > { %v945_v52 = vpop.permute.xlu0 %944  ;;  %v973_v55 = vpop.permute.xlu1 %972 }
 0x1e2   : > { %v949_v54 = vadd.f32 %v945_v52, %v3500_v7  ;;  %v3583_v60 = vadd.f32 %v973_v55, %v3506_v8  ;;  %v1027_v62 = vpop.permute.xlu2 %1026  ;;  %v3660_v52 = vld [vmem:[#allocation2 + $0x32] sm:$0xff]  ;;  %v1057_v55 = vmul.f32 %v1055_v25, %v3328_v59 }
 0x1e4   : > { %v1005_v53 = vadd.f32 %v1001_v0, %v949_v54 }
 0x1e6   : > { %v3594_v7 = vadd.f32 %v1045_v58, %v1005_v53  ;;  %v1423_v58 = vmul.f32 %v1422_v48, %v3579_v39 }
 0x1e7   : > { %1343 = vrot.lane.b32.xlu0 %v1339_v4, %s2743_s9  ;;  %1371 = vrot.lane.b32.xlu1 %v1367_v2, %s2743_s9  ;;  %v1477_v4 = vmul.f32 %v1476_v34, %v3660_v52  ;;  %v1437_v2 = vmul.f32 %v1436_v20, %v3579_v39 }
 0x1e8   : > { %1357 = vrot.lane.b32.xlu2 %v1353_v57, %s2743_s9 }
 0x1e9   : > { %v971_v8 = vpop.permute.xlu0 %970  ;;  %v999_v40 = vpop.permute.xlu1 %998 }
 0x1ea   : > { %v976_v44 = vadd.f32 %v971_v8, %v3522_v3  ;;  %v1004_v49 = vadd.f32 %v999_v40, %v3527_v22  ;;  %v1069_v16 = vpop.permute.xlu2 %1068  ;;  %v1382_v3 = vmul.f32 %v1380_v14, %v3557_v30  ;;  %v3684_v8 = vld [vmem:[#allocation2 + $0x3a] sm:$0xff] }
 0x1ec   : > { %v1032_v46 = vadd.f32 %v1027_v62, %v976_v44  ;;  %v3610_v56 = vadd.f32 %v1044_v9, %v1004_v49 }
 0x1ee   : > { %v3616_v31 = vadd.f32 %v1056_v17, %v1032_v46  ;;  %v1438_v46 = vmul.f32 %v1436_v20, %v3557_v30 }
 0x1ef   : > { %1359 = vrot.lane.b32.xlu0 %v1354_v41, %s2743_s9  ;;  %1387 = vrot.lane.b32.xlu1 %v1382_v3, %s2743_s9  ;;  %v1176_v41 = vstv %s3678_s28  ;;  %s3812_s28 = sld [smem:[#allocation8 + $0x39]] }
 0x1f0   : > { %1373 = vrot.lane.b32.xlu2 %v1368_v6, %s2743_s9 }
 0x1f1   : > { %v987_v22 = vpop.permute.xlu0 %986  ;;  %v1015_v43 = vpop.permute.xlu1 %1014 }
 0x1f2   : > { %v991_v5 = vadd.f32 %v987_v22, %v3540_v61  ;;  %v1019_v1 = vadd.f32 %v1015_v43, %v3549_v18  ;;  %v1095_v28 = vpop.permute.xlu2 %1094 }
 0x1f4   : > { %v1041_v37 = vadd.f32 %v1039_v19, %v991_v5  ;;  %v3630_v13 = vadd.f32 %v1051_v24, %v1019_v1  ;;  %v1178_v5 = vmul.f32 %v1176_v41, %v3468_v33  ;;  %v1504_v1 = vstv %s3692_s17  ;;  %s3837_s17 = sld [smem:[#allocation8 + $0x41]] }
 0x1f6   : > { %v3635_v61 = vadd.f32 %v1069_v16, %v1041_v37  ;;  %v1490_v16 = vstv %s3669_s12  ;;  %v1519_v37 = vmul.f32 %v1518_v23, %v3660_v52  ;;  %s3810_s12 = sld [smem:[#allocation8 + $0x1d]] }
 0x1f7   : > { %1385 = vrot.lane.b32.xlu0 %v1381_v10, %s2743_s9  ;;  %1413 = vrot.lane.b32.xlu1 %v1409_v27, %s2744_s10  ;;  %v1492_v14 = vmul.f32 %v1490_v16, %v3684_v8  ;;  %v1491_v29 = vmul.f32 %v1490_v16, %v3660_v52 }
 0x1f8   : > { %1399 = vrot.lane.b32.xlu2 %v1395_v26, %s2744_s10 }
 0x1f9   : > { %v1013_v18 = vpop.permute.xlu0 %1012  ;;  %v1067_v21 = vpop.permute.xlu1 %1066 }
 0x1fa   : > { %v1018_v15 = vadd.f32 %v1013_v18, %v3561_v38  ;;  %v3643_v0 = vadd.f32 %v1067_v21, %v3572_v50  ;;  %v1111_v42 = vpop.permute.xlu2 %1110 }
 0x1fc   : > { %v1052_v45 = vadd.f32 %v1050_v32, %v1018_v15 }
 0x1fe   : > { %v3653_v36 = vadd.f32 %v1095_v28, %v1052_v45  ;;  %v1532_v45 = vstv %s3713_s25  ;;  %s3860_s25 = sld [smem:[#allocation8 + $0x89]] }
 0x1ff   : > { %1401 = vrot.lane.b32.xlu0 %v1396_v12, %s2744_s10  ;;  %1429 = vrot.lane.b32.xlu1 %v1424_v51, %s2744_s10  ;;  %v1506_v12 = vmul.f32 %v1504_v1, %v3684_v8  ;;  %v1534_v51 = vmul.f32 %v1532_v45, %v3684_v8 }
 0x200   : > { %1415 = vrot.lane.b32.xlu2 %v1410_v47, %s2744_s10 }
 0x201   : > { %v1029_v38 = vpop.permute.xlu0 %1028  ;;  %v1083_v50 = vpop.permute.xlu1 %1082 }
 0x202   : > { %v1033_v54 = vadd.f32 %v1029_v38, %v3583_v60  ;;  %v3665_v62 = vadd.f32 %v1083_v50, %v3594_v7  ;;  %v1137_v63 = vpop.permute.xlu2 %1136  ;;  %v1182_v7 = vstv %s3658_s11  ;;  %s3797_s11 = sld [smem:[#allocation8 + $0x64]] }
 0x203   : > { %v1183_v9 = vmul.f32 %v1182_v7, %v3444_v11 }
 0x204   : > { %v1059_v53 = vadd.f32 %v1057_v55, %v1033_v54  ;;  %v1560_v55 = vstv %s3728_s27  ;;  %v1184_v54 = vmul.f32 %v1182_v7, %v3468_v33  ;;  %s3875_s27 = sld [smem:[#allocation8 + $0x18]] }
 0x206   : > { %v3674_v57 = vadd.f32 %v1111_v42, %v1059_v53 }
 0x207   : > { %1427 = vrot.lane.b32.xlu0 %v1423_v58, %s2744_s10  ;;  %1481 = vrot.lane.b32.xlu1 %v1477_v4, %s2743_s9  ;;  %v1546_v58 = vstv %s3734_s8  ;;  %s3884_s8 = sld [smem:[#allocation8 + $0x1f]] }
 0x208   : > { %1441 = vrot.lane.b32.xlu2 %v1437_v2, %s2744_s10  ;;  %v1547_v7 = vmul.f32 %v1546_v58, %v3660_v52 }
 0x209   : > { %v1081_v59 = vpop.permute.xlu0 %1080  ;;  %v1109_v60 = vpop.permute.xlu1 %1108 }
 0x20a   : > { %v1086_v40 = vadd.f32 %v1081_v59, %v3610_v56  ;;  %v3688_v25 = vadd.f32 %v1109_v60, %v3616_v31  ;;  %v1153_v44 = vpop.permute.xlu2 %1152  ;;  %v1478_v56 = vmul.f32 %v1476_v34, %v3684_v8  ;;  %v1188_v31 = vstv %s3682_s13  ;;  %s3820_s13 = sld [smem:[#allocation8 + $0x88]] }
 0x20b   : > { %v1190_v24 = vmul.f32 %v1188_v31, %v3468_v33  ;;  %v1189_v15 = vmul.f32 %v1188_v31, %v3444_v11  ;;  %v1533_v59 = vmul.f32 %v1532_v45, %v3660_v52  ;;  %v1561_v60 = vmul.f32 %v1560_v55, %v3660_v52 }
 0x20c   : > { %v1142_v49 = vadd.f32 %v1137_v63, %v1086_v40 }
 0x20e   : > { %v3701_v17 = vadd.f32 %v1183_v9, %v1142_v49 }
 0x20f   : > { %1443 = vrot.lane.b32.xlu0 %v1438_v46, %s2744_s10  ;;  %1497 = vrot.lane.b32.xlu1 %v1492_v14, %s2743_s9  ;;  %v1574_v46 = vstv %s3756_s1  ;;  %v1548_v14 = vmul.f32 %v1546_v58, %v3684_v8  ;;  %s3894_s1 = sld [smem:[#allocation8 + $0x67]] }
 0x210   : > { %1483 = vrot.lane.b32.xlu2 %v1478_v56, %s2743_s9  ;;  %v1576_v56 = vmul.f32 %v1574_v46, %v3684_v8 }
 0x211   : > { %v1097_v3 = vpop.permute.xlu0 %1096  ;;  %v1125_v6 = vpop.permute.xlu1 %1124 }
 0x212   : > { %v1101_v19 = vadd.f32 %v1097_v3, %v3630_v13  ;;  %v1129_v22 = vadd.f32 %v1125_v6, %v3635_v61  ;;  %v1206_v43 = vpop.permute.xlu2 %1205  ;;  %v1505_v13 = vmul.f32 %v1504_v1, %v3660_v52  ;;  %v1177_v61 = vmul.f32 %v1176_v41, %v3444_v11  ;;  %v3790_v3 = vld [vmem:[#allocation2 + $0x48] sm:$0xff] }
 0x214   : > { %v1157_v28 = vadd.f32 %v1153_v44, %v1101_v19  ;;  %v3715_v35 = vadd.f32 %v1178_v5, %v1129_v22  ;;  %v1629_v22 = vstv %s3768_s23  ;;  %s3903_s23 = sld [smem:[#allocation8 + $0x43]] }
 0x216   : > { %v3721_v10 = vadd.f32 %v1190_v24, %v1157_v28  ;;  %v1575_v28 = vmul.f32 %v1574_v46, %v3660_v52  ;;  %v1630_v24 = vmul.f32 %v1629_v22, %v3790_v3 }
 0x217   : > { %1495 = vrot.lane.b32.xlu0 %v1491_v29, %s2743_s9  ;;  %1523 = vrot.lane.b32.xlu1 %v1519_v37, %s2743_s9 }
 0x218   : > { %1509 = vrot.lane.b32.xlu2 %v1505_v13, %s2743_s9 }
 0x219   : > { %v1123_v27 = vpop.permute.xlu0 %1122  ;;  %v1151_v26 = vpop.permute.xlu1 %1150 }
 0x21a   : > { %v1128_v18 = vadd.f32 %v1123_v27, %v3643_v0  ;;  %v1156_v21 = vadd.f32 %v1151_v26, %v3653_v36  ;;  %v1222_v32 = vpop.permute.xlu2 %1221  ;;  %v1520_v0 = vmul.f32 %v1518_v23, %v3684_v8  ;;  %v1194_v36 = vstv %s3725_s16  ;;  %v3815_v27 = vld [vmem:[#allocation2 + $0x50] sm:$0xff]  ;;  %s3863_s16 = sld [smem:[#allocation8 + $0x65]] }
 0x21b   : > { %v1196_v53 = vmul.f32 %v1194_v36, %v3468_v33  ;;  %v1314_v23 = vstv %s3777_s7  ;;  %s3917_s7 = sld [smem:[#allocation8 + $0x84]] }
 0x21c   : > { %v1179_v42 = vadd.f32 %v1177_v61, %v1128_v18  ;;  %v3737_v48 = vadd.f32 %v1189_v15, %v1156_v21  ;;  %v1316_v1 = vmul.f32 %v1314_v23, %v3557_v30  ;;  %v1643_v21 = vstv %s3797_s11  ;;  %s3939_s11 = sld [smem:[#allocation8 + $0x60]] }
 0x21e   : > { %v3742_v47 = vadd.f32 %v1206_v43, %v1179_v42  ;;  %v1615_v43 = vstv %s3775_s29  ;;  %s3905_s29 = sld [smem:[#allocation8 + $0x3c]] }
 0x21f   : > { %1511 = vrot.lane.b32.xlu0 %v1506_v12, %s2743_s9  ;;  %1539 = vrot.lane.b32.xlu1 %v1534_v51, %s2744_s10  ;;  %v1617_v12 = vmul.f32 %v1615_v43, %v3815_v27  ;;  %v1631_v51 = vmul.f32 %v1629_v22, %v3815_v27 }
 0x220   : > { %1525 = vrot.lane.b32.xlu2 %v1520_v0, %s2743_s9 }
 0x221   : > { %v1139_v38 = vpop.permute.xlu0 %1138  ;;  %v1167_v50 = vpop.permute.xlu1 %1166 }
 0x222   : > { %v1143_v63 = vadd.f32 %v1139_v38, %v3665_v62  ;;  %v1171_v34 = vadd.f32 %v1167_v50, %v3674_v57  ;;  %v1248_v20 = vpop.permute.xlu2 %1247  ;;  %v1195_v57 = vmul.f32 %v1194_v36, %v3444_v11  ;;  %v1562_v11 = vmul.f32 %v1560_v55, %v3684_v8 }
 0x223   : > { %v1320_v38 = vstv %s3812_s28  ;;  %s3947_s28 = sld [smem:[#allocation8 + $0x20]] }
 0x224   : > { %v1186_v4 = vadd.f32 %v1184_v54, %v1143_v63  ;;  %v3758_v2 = vadd.f32 %v1196_v53, %v1171_v34  ;;  %v1671_v63 = vstv %s3810_s12  ;;  %v1322_v34 = vmul.f32 %v1320_v38, %v3557_v30  ;;  %s3944_s12 = sld [smem:[#allocation8 + $0x44]] }
 0x225   : > { %v1332_v53 = vstv %s3823_s15  ;;  %s3985_s15 = sld [smem:[#allocation8 + $0x22]] }
 0x226   : > { %v3763_v40 = vadd.f32 %v1222_v32, %v1186_v4  ;;  %v1315_v32 = vmul.f32 %v1314_v23, %v3579_v39 }
 0x227   : > { %1537 = vrot.lane.b32.xlu0 %v1533_v59, %s2744_s10  ;;  %1565 = vrot.lane.b32.xlu1 %v1561_v60, %s2744_s10  ;;  %v1334_v59 = vmul.f32 %v1332_v53, %v3557_v30  ;;  %v1644_v60 = vmul.f32 %v1643_v21, %v3790_v3 }
 0x228   : > { %1551 = vrot.lane.b32.xlu2 %v1547_v7, %s2744_s10  ;;  %v1672_v7 = vmul.f32 %v1671_v63, %v3790_v3 }
 0x229   : > { %v1165_v33 = vpop.permute.xlu0 %1164  ;;  %v1220_v62 = vpop.permute.xlu1 %1219 }
 0x22a   : > { %v1170_v44 = vadd.f32 %v1165_v33, %v3688_v25  ;;  %v3773_v49 = vadd.f32 %v1220_v62, %v3701_v17  ;;  %v1264_v16 = vpop.permute.xlu2 %1263 }
 0x22c   : > { %v1197_v9 = vadd.f32 %v1195_v57, %v1170_v44  ;;  %v1685_v57 = vstv %s3837_s17  ;;  %v1321_v44 = vmul.f32 %v1320_v38, %v3579_v39  ;;  %s3987_s17 = sld [smem:[#allocation8 + $0x8c]] }
 0x22e   : > { %v3783_v25 = vadd.f32 %v1248_v20, %v1197_v9  ;;  %v1657_v20 = vstv %s3820_s13  ;;  %s3968_s13 = sld [smem:[#allocation8 + $0x68]] }
 0x22f   : > { %1553 = vrot.lane.b32.xlu0 %v1548_v14, %s2744_s10  ;;  %1581 = vrot.lane.b32.xlu1 %v1576_v56, %s2744_s10  ;;  %v1333_v14 = vmul.f32 %v1332_v53, %v3579_v39 }
 0x230   : > { %1567 = vrot.lane.b32.xlu2 %v1562_v11, %s2744_s10 }
 0x231   : > { %v1208_v17 = vpop.permute.xlu0 %1207  ;;  %v1236_v41 = vpop.permute.xlu1 %1235 }
 0x232   : > { %v1212_v6 = vadd.f32 %v1208_v17, %v3715_v35  ;;  %v3794_v31 = vadd.f32 %v1236_v41, %v3721_v10  ;;  %v1290_v19 = vpop.permute.xlu2 %1289  ;;  %v1616_v35 = vmul.f32 %v1615_v43, %v3790_v3  ;;  %v1326_v10 = vstv %s3788_s14  ;;  %s3928_s14 = sld [smem:[#allocation8 + $0x8b]] }
 0x233   : > { %v1327_v45 = vmul.f32 %v1326_v10, %v3579_v39  ;;  %v1659_v17 = vmul.f32 %v1657_v20, %v3815_v27  ;;  %v1687_v41 = vmul.f32 %v1685_v57, %v3815_v27 }
 0x234   : > { %v1268_v5 = vadd.f32 %v1264_v16, %v1212_v6 }
 0x236   : > { %v3805_v29 = vadd.f32 %v1316_v1, %v1268_v5  ;;  %v1713_v5 = vstv %s3860_s25  ;;  %v1699_v1 = vstv %s3863_s16  ;;  %s3998_s25 = sld [smem:[#allocation8 + $0x3f]] }
 0x237   : > { %1579 = vrot.lane.b32.xlu0 %v1575_v28, %s2744_s10  ;;  %1634 = vrot.lane.b32.xlu1 %v1630_v24, %s2743_s9  ;;  %v1686_v24 = vmul.f32 %v1685_v57, %v3790_v3  ;;  %s4009_s16 = sld [smem:[#allocation8 + $0x46]] }
 0x238   : > { %1620 = vrot.lane.b32.xlu2 %v1616_v35, %s2743_s9  ;;  %v1714_v35 = vmul.f32 %v1713_v5, %v3790_v3 }
 0x239   : > { %v1234_v37 = vpop.permute.xlu0 %1233  ;;  %v1262_v13 = vpop.permute.xlu1 %1261 }
 0x23a   : > { %v1239_v26 = vadd.f32 %v1234_v37, %v3737_v48  ;;  %v1267_v61 = vadd.f32 %v1262_v13, %v3742_v47  ;;  %v1306_v18 = vpop.permute.xlu2 %1305  ;;  %v1645_v48 = vmul.f32 %v1643_v21, %v3815_v27  ;;  %v1700_v37 = vmul.f32 %v1699_v1, %v3790_v3 }
 0x23b   : > { %v1452_v13 = vstv %s3875_s27  ;;  %s4018_s27 = sld [smem:[#allocation8 + $0x1b]] }
 0x23c   : > { %v1295_v15 = vadd.f32 %v1290_v19, %v1239_v26  ;;  %v3825_v42 = vadd.f32 %v1315_v32, %v1267_v61  ;;  %v1328_v19 = vmul.f32 %v1326_v10, %v3557_v30  ;;  %v3897_v10 = vld [vmem:[#allocation2 + $0x51] sm:$0xff]  ;;  %v1753_v32 = vstv %s3884_s8  ;;  %s4022_s8 = sld [smem:[#allocation8 + $0x63]] }
 0x23e   : > { %v3831_v0 = vadd.f32 %v1327_v45, %v1295_v15  ;;  %v1453_v15 = vmul.f32 %v1452_v13, %v3660_v52  ;;  %v1701_v45 = vmul.f32 %v1699_v1, %v3815_v27  ;;  %v1809_v1 = vstv %s3947_s28  ;;  %s4106_s28 = sld [smem:[#allocation8 + $0x66]] }
 0x23f   : > { %1622 = vrot.lane.b32.xlu0 %v1617_v12, %s2743_s9  ;;  %1650 = vrot.lane.b32.xlu1 %v1645_v48, %s2743_s9  ;;  %v1755_v12 = vmul.f32 %v1753_v32, %v3897_v10 }
 0x240   : > { %1636 = vrot.lane.b32.xlu2 %v1631_v51, %s2743_s9 }
 0x241   : > { %v1250_v47 = vpop.permute.xlu0 %1249  ;;  %v1278_v36 = vpop.permute.xlu1 %1277 }
 0x242   : > { %v1254_v50 = vadd.f32 %v1250_v47, %v3758_v2  ;;  %v1282_v55 = vadd.f32 %v1278_v36, %v3763_v40  ;;  %v1358_v54 = vpop.permute.xlu2 %1357  ;;  %v1658_v2 = vmul.f32 %v1657_v20, %v3790_v3  ;;  %v3919_v47 = vld [vmem:[#allocation2 + $0x49] sm:$0xff] }
 0x243   : > { %v1754_v53 = vmul.f32 %v1753_v32, %v3919_v47 }
 0x244   : > { %v1310_v58 = vadd.f32 %v1306_v18, %v1254_v50  ;;  %v3845_v4 = vadd.f32 %v1322_v34, %v1282_v55  ;;  %v1781_v55 = vstv %s3894_s1  ;;  %s4030_s1 = sld [smem:[#allocation8 + $0x8e]] }
 0x246   : > { %v3851_v33 = vadd.f32 %v1334_v59, %v1310_v58  ;;  %v1782_v58 = vmul.f32 %v1781_v55, %v3919_v47 }
 0x247   : > { %1648 = vrot.lane.b32.xlu0 %v1644_v60, %s2743_s9  ;;  %1676 = vrot.lane.b32.xlu1 %v1672_v7, %s2744_s10 }
 0x248   : > { %1662 = vrot.lane.b32.xlu2 %v1658_v2, %s2743_s9  ;;  %v1470_v2 = vstv %s3917_s7  ;;  %s4063_s7 = sld [smem:[#allocation8 + $0x87]] }
 0x249   : > { %v1276_v40 = vpop.permute.xlu0 %1275  ;;  %v1304_v62 = vpop.permute.xlu1 %1303 }
 0x24a   : > { %v1281_v16 = vadd.f32 %v1276_v40, %v3773_v49  ;;  %v1309_v9 = vadd.f32 %v1304_v62, %v3783_v25  ;;  %v1374_v46 = vpop.permute.xlu2 %1373  ;;  %v1673_v49 = vmul.f32 %v1671_v63, %v3815_v27  ;;  %v1458_v63 = vstv %s3905_s29  ;;  %s4051_s29 = sld [smem:[#allocation8 + $0x23]] }
 0x24b   : > { %v1460_v20 = vmul.f32 %v1458_v63, %v3684_v8  ;;  %v1459_v57 = vmul.f32 %v1458_v63, %v3660_v52  ;;  %v1851_v63 = vstv %s3987_s17  ;;  %s2487_s17 = sld [smem:[#allocation8 + $0x45]] }
 0x24c   : > { %v1323_v56 = vadd.f32 %v1321_v44, %v1281_v16  ;;  %v3865_v11 = vadd.f32 %v1333_v14, %v1309_v9  ;;  %v1795_v16 = vstv %s3928_s14  ;;  %s4069_s14 = sld [smem:[#allocation8 + $0x6b]] }
 0x24e   : > { %v3870_v6 = vadd.f32 %v1358_v54, %v1323_v56  ;;  %v1767_v54 = vstv %s3903_s23  ;;  %v1797_v56 = vmul.f32 %v1795_v16, %v3897_v10  ;;  %s4032_s23 = sld [smem:[#allocation8 + $0x6a]] }
 0x24f   : > { %1664 = vrot.lane.b32.xlu0 %v1659_v17, %s2743_s9  ;;  %1692 = vrot.lane.b32.xlu1 %v1687_v41, %s2744_s10  ;;  %v1768_v59 = vmul.f32 %v1767_v54, %v3919_v47  ;;  %v1769_v14 = vmul.f32 %v1767_v54, %v3897_v10  ;;  %v1454_v41 = vmul.f32 %v1452_v13, %v3684_v8  ;;  %v1891_v54 = vstv %s3985_s15  ;;  %s2477_s15 = sld [smem:[#allocation8 + $0x8a]] }
 0x250   : > { %1678 = vrot.lane.b32.xlu2 %v1673_v49, %s2744_s10 }
 0x251   : > { %v1292_v39 = vpop.permute.xlu0 %1291  ;;  %v1346_v25 = vpop.permute.xlu1 %1345 }
 0x252   : > { %v1296_v22 = vadd.f32 %v1292_v39, %v3794_v31  ;;  %v3880_v43 = vadd.f32 %v1346_v25, %v3805_v29  ;;  %v1400_v23 = vpop.permute.xlu2 %1399  ;;  %v1464_v39 = vstv %s3939_s11  ;;  %s4072_s11 = sld [smem:[#allocation8 + $0x47]] }
 0x253   : > { %v1465_v13 = vmul.f32 %v1464_v39, %v3660_v52 }
 0x254   : > { %v1330_v28 = vadd.f32 %v1328_v19, %v1296_v22 }
 0x256   : > { %v3889_v30 = vadd.f32 %v1374_v46, %v1330_v28  ;;  %v1471_v46 = vmul.f32 %v1470_v2, %v3660_v52 }
 0x257   : > { %1690 = vrot.lane.b32.xlu0 %v1686_v24, %s2744_s10  ;;  %1718 = vrot.lane.b32.xlu1 %v1714_v35, %s2744_s10  ;;  %v1796_v35 = vmul.f32 %v1795_v16, %v3919_v47 }
 0x258   : > { %1704 = vrot.lane.b32.xlu2 %v1700_v37, %s2744_s10 }
 0x259   : > { %v1344_v31 = vpop.permute.xlu0 %1343  ;;  %v1372_v29 = vpop.permute.xlu1 %1371 }
 0x25a   : > { %v1349_v26 = vadd.f32 %v1344_v31, %v3825_v42  ;;  %v3901_v61 = vadd.f32 %v1372_v29, %v3831_v0  ;;  %v1416_v18 = vpop.permute.xlu2 %1415  ;;  %v1715_v42 = vmul.f32 %v1713_v5, %v3815_v27  ;;  %v1466_v5 = vmul.f32 %v1464_v39, %v3684_v8 }
 0x25b   : > { %v1810_v31 = vmul.f32 %v1809_v1, %v3919_v47  ;;  %v1933_v39 = vstv %s4030_s1 }
 0x25c   : > { %v1405_v21 = vadd.f32 %v1400_v23, %v1349_v26  ;;  %v1823_v23 = vstv %s3944_s12  ;;  %s4088_s12 = sld [smem:[#allocation8 + $0x8f]] }
 0x25d   : > { %v1824_v37 = vmul.f32 %v1823_v23, %v3919_v47  ;;  %v1825_v52 = vmul.f32 %v1823_v23, %v3897_v10 }
 0x25e   : > { %v3912_v48 = vadd.f32 %v1453_v15, %v1405_v21  ;;  %v1837_v15 = vstv %s3968_s13  ;;  %s2475_s13 = sld [smem:[#allocation8 + $0x42]] }
 0x25f   : > { %1706 = vrot.lane.b32.xlu0 %v1701_v45, %s2744_s10  ;;  %1760 = vrot.lane.b32.xlu1 %v1755_v12, %s2743_s9  ;;  %v1811_v45 = vmul.f32 %v1809_v1, %v3897_v10  ;;  %v1839_v12 = vmul.f32 %v1837_v15, %v3897_v10 }
 0x260   : > { %1720 = vrot.lane.b32.xlu2 %v1715_v42, %s2744_s10 }
 0x261   : > { %v1360_v51 = vpop.permute.xlu0 %1359  ;;  %v1388_v0 = vpop.permute.xlu1 %1387 }
 0x262   : > { %v1364_v36 = vadd.f32 %v1360_v51, %v3845_v4  ;;  %v3923_v38 = vadd.f32 %v1388_v0, %v3851_v33  ;;  %v1442_v50 = vpop.permute.xlu2 %1441  ;;  %v4000_v51 = vld [vmem:[#allocation2 + $0x4a] sm:$0xff]  ;;  %v1472_v0 = vmul.f32 %v1470_v2, %v3684_v8 }
 0x264   : > { %v1420_v34 = vadd.f32 %v1416_v18, %v1364_v36 }
 0x266   : > { %v3934_v4 = vadd.f32 %v1460_v20, %v1420_v34  ;;  %v1838_v20 = vmul.f32 %v1837_v15, %v3919_v47 }
 0x267   : > { %1758 = vrot.lane.b32.xlu0 %v1754_v53, %s2743_s9  ;;  %1786 = vrot.lane.b32.xlu1 %v1782_v58, %s2743_s9  ;;  %v1892_v53 = vmul.f32 %v1891_v54, %v4000_v51  ;;  %v1852_v58 = vmul.f32 %v1851_v63, %v3919_v47 }
 0x268   : > { %1772 = vrot.lane.b32.xlu2 %v1768_v59, %s2743_s9 }
 0x269   : > { %v1386_v60 = vpop.permute.xlu0 %1385  ;;  %v1414_v7 = vpop.permute.xlu1 %1413 }
 0x26a   : > { %v1391_v33 = vadd.f32 %v1386_v60, %v3865_v11  ;;  %v1419_v40 = vadd.f32 %v1414_v7, %v3870_v6  ;;  %v1484_v62 = vpop.permute.xlu2 %1483  ;;  %v1783_v11 = vmul.f32 %v1781_v55, %v3897_v10  ;;  %v4024_v60 = vld [vmem:[#allocation2 + $0x52] sm:$0xff] }
 0x26c   : > { %v1447_v44 = vadd.f32 %v1442_v50, %v1391_v33  ;;  %v3950_v9 = vadd.f32 %v1459_v57, %v1419_v40 }
 0x26e   : > { %v3956_v17 = vadd.f32 %v1471_v46, %v1447_v44  ;;  %v1853_v44 = vmul.f32 %v1851_v63, %v3897_v10  ;;  %v1975_v63 = vstv %s4069_s14 }
 0x26f   : > { %1774 = vrot.lane.b32.xlu0 %v1769_v14, %s2743_s9  ;;  %1802 = vrot.lane.b32.xlu1 %v1797_v56, %s2743_s9  ;;  %v1591_v14 = vstv %s4018_s27 }
 0x270   : > { %1788 = vrot.lane.b32.xlu2 %v1783_v11, %s2743_s9 }
 0x271   : > { %v1402_v49 = vpop.permute.xlu0 %1401  ;;  %v1430_v6 = vpop.permute.xlu1 %1429 }
 0x272   : > { %v1406_v25 = vadd.f32 %v1402_v49, %v3880_v43  ;;  %v1434_v19 = vadd.f32 %v1430_v6, %v3889_v30  ;;  %v1510_v22 = vpop.permute.xlu2 %1509 }
 0x274   : > { %v1456_v28 = vadd.f32 %v1454_v41, %v1406_v25  ;;  %v3970_v24 = vadd.f32 %v1466_v5, %v1434_v19  ;;  %v1593_v25 = vmul.f32 %v1591_v14, %v3815_v27  ;;  %v1919_v19 = vstv %s4032_s23 }
 0x276   : > { %v3975_v43 = vadd.f32 %v1484_v62, %v1456_v28  ;;  %v1905_v62 = vstv %s4009_s16  ;;  %v1934_v28 = vmul.f32 %v1933_v39, %v4000_v51  ;;  %s2488_s16 = sld [smem:[#allocation8 + $0x69]] }
 0x277   : > { %1800 = vrot.lane.b32.xlu0 %v1796_v35, %s2743_s9  ;;  %1828 = vrot.lane.b32.xlu1 %v1824_v37, %s2744_s10  ;;  %v1907_v16 = vmul.f32 %v1905_v62, %v4024_v60  ;;  %v1906_v1 = vmul.f32 %v1905_v62, %v4000_v51 }
 0x278   : > { %1814 = vrot.lane.b32.xlu2 %v1810_v31, %s2744_s10 }
 0x279   : > { %v1428_v30 = vpop.permute.xlu0 %1427  ;;  %v1482_v29 = vpop.permute.xlu1 %1481 }
 0x27a   : > { %v1433_v26 = vadd.f32 %v1428_v30, %v3901_v61  ;;  %v3983_v18 = vadd.f32 %v1482_v29, %v3912_v48  ;;  %v1526_v21 = vpop.permute.xlu2 %1525 }
 0x27c   : > { %v1467_v32 = vadd.f32 %v1465_v13, %v1433_v26 }
 0x27e   : > { %v3993_v42 = vadd.f32 %v1510_v22, %v1467_v32  ;;  %v1947_v32 = vstv %s4051_s29  ;;  %s4223_s29 = scalar_lea.vmem [#allocation10], %s2348_s2  ;;  %s2504_s2 = sshll.u32 %s2799_s22, 6 }
 0x27f   : > { %1816 = vrot.lane.b32.xlu0 %v1811_v45, %s2744_s10  ;;  %1844 = vrot.lane.b32.xlu1 %v1839_v12, %s2744_s10  ;;  %v1921_v45 = vmul.f32 %v1919_v19, %v4024_v60  ;;  %v1949_v12 = vmul.f32 %v1947_v32, %v4024_v60  ;;  %s2239_s22 = sshll.u32 %s4223_s29, 4  ;;  %s2240_s22 = int_to_ptr.vmem [resolvable:$true] %s2239_s22 }
 0x280   : > { %1830 = vrot.lane.b32.xlu2 %v1825_v52, %s2744_s10 }
 0x281   : > { %v1444_v61 = vpop.permute.xlu0 %1443  ;;  %v1498_v48 = vpop.permute.xlu1 %1497 }
 0x282   : > { %v1448_v36 = vadd.f32 %v1444_v61, %v3923_v38  ;;  %v4005_v50 = vadd.f32 %v1498_v48, %v3934_v4  ;;  %v1552_v55 = vpop.permute.xlu2 %1551  ;;  %v1597_v4 = vstv %s3998_s25  ;;  %s4129_s25 = sld [smem:[#allocation8 + $0x8d]] }
 0x283   : > { %v1598_v57 = vmul.f32 %v1597_v4, %v3790_v3  ;;  %v1599_v61 = vmul.f32 %v1597_v4, %v3815_v27 }
 0x284   : > { %v1474_v34 = vadd.f32 %v1472_v0, %v1448_v36 }
 0x286   : > { %v4014_v59 = vadd.f32 %v1526_v21, %v1474_v34 }
 0x287   : > { %1842 = vrot.lane.b32.xlu0 %v1838_v20, %s2744_s10  ;;  %1896 = vrot.lane.b32.xlu1 %v1892_v53, %s2743_s9  ;;  %v1961_v20 = vstv %s4072_s11  ;;  %s2238_s11 = scalar_lea.hbm %s4306_s5, %s2504_s2 }
 0x288   : > { %1856 = vrot.lane.b32.xlu2 %v1852_v58, %s2744_s10  ;;  %v1962_v4 = vmul.f32 %v1961_v20, %v4000_v51 }
 0x289   : > { %v1496_v8 = vpop.permute.xlu0 %1495  ;;  %v1524_v38 = vpop.permute.xlu1 %1523 }
 0x28a   : > { %v1501_v7 = vadd.f32 %v1496_v8, %v3950_v9  ;;  %v4028_v2 = vadd.f32 %v1524_v38, %v3956_v17  ;;  %v1568_v33 = vpop.permute.xlu2 %1567  ;;  %v1893_v9 = vmul.f32 %v1891_v54, %v4024_v60  ;;  %v1603_v17 = vstv %s4022_s8 }
 0x28b   : > { %v1605_v5 = vmul.f32 %v1603_v17, %v3815_v27  ;;  %v1604_v26 = vmul.f32 %v1603_v17, %v3790_v3  ;;  %v1948_v8 = vmul.f32 %v1947_v32, %v4000_v51  ;;  %v1976_v38 = vmul.f32 %v1975_v63, %v4000_v51 }
 0x28c   : > { %v1557_v40 = vadd.f32 %v1552_v55, %v1501_v7 }
 0x28e   : > { %v4039_v46 = vadd.f32 %v1598_v57, %v1557_v40 }
 0x28f   : > { %1858 = vrot.lane.b32.xlu0 %v1853_v44, %s2744_s10  ;;  %1912 = vrot.lane.b32.xlu1 %v1907_v16, %s2743_s9  ;;  %v1989_v44 = vstv %s4088_s12  ;;  %v1963_v16 = vmul.f32 %v1961_v20, %v4024_v60  ;;  %s2241_s12 = sshll.u32 %s2238_s11, 4  ;;  %s2242_s12 = int_to_ptr.hbm [resolvable:$true] %s2241_s12 }
 0x290   : > { %1898 = vrot.lane.b32.xlu2 %v1893_v9, %s2743_s9  ;;  %v1991_v9 = vmul.f32 %v1989_v44, %v4024_v60 }
 0x291   : > { %v1512_v56 = vpop.permute.xlu0 %1511  ;;  %v1540_v11 = vpop.permute.xlu1 %1539 }
 0x292   : > { %v1516_v41 = vadd.f32 %v1512_v56, %v3970_v24  ;;  %v1544_v49 = vadd.f32 %v1540_v11, %v3975_v43  ;;  %v1621_v6 = vpop.permute.xlu2 %1620  ;;  %v1920_v24 = vmul.f32 %v1919_v19, %v4000_v51  ;;  %v1592_v43 = vmul.f32 %v1591_v14, %v3790_v3 }
 0x293   : > { %v1977_v14 = vmul.f32 %v1975_v63, %v4024_v60 }
 0x294   : > { %v1572_v22 = vadd.f32 %v1568_v33, %v1516_v41  ;;  %v4053_v23 = vadd.f32 %v1593_v25, %v1544_v49 }
 0x296   : > { %v4059_v35 = vadd.f32 %v1605_v5, %v1572_v22  ;;  %v1741_v5 = vstv %s4106_s28  ;;  %s2675_s28 = sshra.s32 %s2242_s12, 4  ;;  %s2676_s28 = int_to_ptr.hbm [resolvable:$true] %s2675_s28 }
 0x297   : > { %1910 = vrot.lane.b32.xlu0 %v1906_v1, %s2743_s9  ;;  %1938 = vrot.lane.b32.xlu1 %v1934_v28, %s2743_s9  ;;  %p2682_p0 = scmp.lt.s32.totalorder %s2676_s28, %s4306_s5 }
 0x298   : > { %1924 = vrot.lane.b32.xlu2 %v1920_v24, %s2743_s9 }
 0x299   : > { %v1538_v37 = vpop.permute.xlu0 %1537  ;;  %v1566_v31 = vpop.permute.xlu1 %1565 }
 0x29a   : > { %v1543_v30 = vadd.f32 %v1538_v37, %v3983_v18  ;;  %v1571_v29 = vadd.f32 %v1566_v31, %v3993_v42  ;;  %v1637_v13 = vpop.permute.xlu2 %1636  ;;  %v1935_v18 = vmul.f32 %v1933_v39, %v4024_v60  ;;  %v1609_v42 = vstv %s4063_s7 }
 0x29b   : > { %v1611_v34 = vmul.f32 %v1609_v42, %v3815_v27  ;;  %v1990_v39 = vmul.f32 %v1989_v44, %v4000_v51  ;;  %v1742_v31 = vmul.f32 %v1741_v5, %v3919_v47 }
 0x29c   : > { %v1594_v21 = vadd.f32 %v1592_v43, %v1543_v30  ;;  %v1606_v15 = vadd.f32 %v1604_v26, %v1571_v29 }
 0x29e   : > { %v1626_v52 = vadd.f32 %v1621_v6, %v1594_v21 }
 0x29f   : > { %1926 = vrot.lane.b32.xlu0 %v1921_v45, %s2743_s9  ;;  %1954 = vrot.lane.b32.xlu1 %v1949_v12, %s2744_s10  ;;  %v1747_v12 = vstv %s2477_s15 }
 0x2a0   : > { %1940 = vrot.lane.b32.xlu2 %v1935_v18, %s2743_s9  ;;  %s2474_s9 = sld [smem:[#allocation8 + $0x1e]]  ;;  %v1748_v63 = vmul.f32 %v1747_v12, %v3919_v47 }
 0x2a1   : > { %v1554_v48 = vpop.permute.xlu0 %1553  ;;  %v1582_v0 = vpop.permute.xlu1 %1581 }
 0x2a2   : > { %v1558_v36 = vadd.f32 %v1554_v48, %v4005_v50  ;;  %v1586_v55 = vadd.f32 %v1582_v0, %v4014_v59  ;;  %v1663_v54 = vpop.permute.xlu2 %1662  ;;  %v1610_v59 = vmul.f32 %v1609_v42, %v3790_v3 }
 0x2a4   : > { %v1601_v53 = vadd.f32 %v1599_v61, %v1558_v36  ;;  %v1613_v58 = vadd.f32 %v1611_v34, %v1586_v55 }
 0x2a6   : > { %v1641_v7 = vadd.f32 %v1637_v13, %v1601_v53  ;;  %v1729_v41 = vstv %s2474_s9  ;;  %v1735_v13 = vstv %s2475_s13  ;;  %s2227_s9 = scalar_lea.sflag [#allocation5], %s2878_s26  ;;  %s2677_s13 = scalar_lea.hbm %s2676_s28, 64 }
 0x2a7   : > { %1952 = vrot.lane.b32.xlu0 %v1948_v8, %s2744_s10  ;;  %1980 = vrot.lane.b32.xlu1 %v1976_v38, %s2744_s10  ;;  %v1731_v6 = vmul.f32 %v1729_v41, %v3897_v10  ;;  %v1730_v24 = vmul.f32 %v1729_v41, %v3919_v47  ;;  %v1737_v45 = vmul.f32 %v1735_v13, %v3897_v10  ;;  %p2678_p4 = scmp.ne.s32.totalorder %s2676_s28, %s2677_s13 }
 0x2a8   : > { %1966 = vrot.lane.b32.xlu2 %v1962_v4, %s2744_s10  ;;  %v1736_v0 = vmul.f32 %v1735_v13, %v3919_v47  ;;  %v1743_v8 = vmul.f32 %v1741_v5, %v3897_v10 }
 0x2a9   : > { %v1580_v27 = vpop.permute.xlu0 %1579  ;;  %v1635_v50 = vpop.permute.xlu1 %1634  ;;  %p2679_p6 = pnand %p2678_p4, %p2830_p11 }
 0x2aa   : > { %v1585_v33 = vadd.f32 %v1580_v27, %v4028_v2  ;;  %v1640_v40 = vadd.f32 %v1635_v50, %v4039_v46  ;;  %v1679_v62 = vpop.permute.xlu2 %1678 }
 0x2ab   : > { %p2680_p13 = pneg %p2679_p6 }
 0x2ac   : > { %v1612_v57 = vadd.f32 %v1610_v59, %v1585_v33 }
 0x2ae   : > { %v1668_v56 = vadd.f32 %v1663_v54, %v1612_v57 }
 0x2af   : > { %1968 = vrot.lane.b32.xlu0 %v1963_v16, %s2744_s10  ;;  %1996 = vrot.lane.b32.xlu1 %v1991_v9, %s2744_s10 }
 0x2b0   : > { %1982 = vrot.lane.b32.xlu2 %v1977_v14, %s2744_s10 }
 0x2b1   : > { %v1623_v3 = vpop.permute.xlu0 %1622  ;;  %v1651_v2 = vpop.permute.xlu1 %1650 }
 0x2b2   : > { %v1627_v46 = vadd.f32 %v1623_v3, %v4053_v23  ;;  %v1655_v11 = vadd.f32 %v1651_v2, %v4059_v35  ;;  %v1705_v17 = vpop.permute.xlu2 %1704  ;;  %v1873_v3 = vstv %s2487_s17  ;;  %s2681_s17 = scalar_lea.hbm %s4306_s5, 128 }
 0x2b3   : > { %p2683_p7 = scmp.lt.s32.totalorder %s2681_s17, %s2677_s13 }
 0x2b4   : > { %v1683_v49 = vadd.f32 %v1679_v62, %v1627_v46  ;;  %v1875_v46 = vmul.f32 %v1873_v3, %v4024_v60 }
 0x2b5   : > { %p2684_p5 = por %p2683_p7, %p2682_p0 }
 0x2b6   : > { %v4112_v25 = vadd.f32 %v1731_v6, %v1683_v49  ;;  %v1885_v6 = vstv %s4129_s25 }
 0x2b7   : > { %1994 = vrot.lane.b32.xlu0 %v1990_v39, %s2744_s10  ;;  %s4122_s10 = sld [smem:[#allocation8 + $0x21]]  ;;  %p2685_p8 = pnand %p2684_p5, %p2680_p13 }
 0x2b9   : > { %v1649_v19 = vpop.permute.xlu0 %1648  ;;  %v1677_v22 = vpop.permute.xlu1 %1676 }
 0x2ba   : > { %v1654_v1 = vadd.f32 %v1649_v19, %v1606_v15  ;;  %v1682_v28 = vadd.f32 %v1677_v22, %v1626_v52  ;;  %v1721_v23 = vpop.permute.xlu2 %1720  ;;  %v1749_v52 = vmul.f32 %v1747_v12, %v3897_v10  ;;  %v1874_v22 = vmul.f32 %v1873_v3, %v4000_v51 }
 0x2bc   : > { %v1710_v35 = vadd.f32 %v1705_v17, %v1654_v1  ;;  %v1732_v37 = vadd.f32 %v1730_v24, %v1682_v28 }
 0x2bd   : > { %v1867_v59 = vstv %s4122_s10 }
 0x2be   : > { %v1744_v43 = vadd.f32 %v1742_v31, %v1710_v35  ;;  %v1868_v57 = vmul.f32 %v1867_v59, %v4000_v51 }
 0x2c1   : > { %v1665_v30 = vpop.permute.xlu0 %1664  ;;  %v1693_v29 = vpop.permute.xlu1 %1692 }
 0x2c2   : > { %v1669_v26 = vadd.f32 %v1665_v30, %v1613_v58  ;;  %v1697_v21 = vadd.f32 %v1693_v29, %v1641_v7  ;;  %v1773_v32 = vpop.permute.xlu2 %1772  ;;  %v1879_v30 = vstv %s2488_s16  ;;  %v1869_v29 = vmul.f32 %v1867_v59, %v4024_v60 }
 0x2c4   : > { %v1725_v15 = vadd.f32 %v1721_v23, %v1669_v26  ;;  %v1739_v18 = vadd.f32 %v1737_v45, %v1697_v21  ;;  %v1886_v23 = vmul.f32 %v1885_v6, %v4000_v51  ;;  %v1881_v21 = vmul.f32 %v1879_v30, %v4024_v60 }
 0x2c6   : > { %v1751_v42 = vadd.f32 %v1749_v52, %v1725_v15  ;;  %v1880_v52 = vmul.f32 %v1879_v30, %v4000_v51 }
 0x2c9   : > { %v1691_v61 = vpop.permute.xlu0 %1690  ;;  %v1719_v48 = vpop.permute.xlu1 %1718 }
 0x2ca   : > { %v1696_v36 = vadd.f32 %v1691_v61, %v1640_v40  ;;  %v1724_v55 = vadd.f32 %v1719_v48, %v1668_v56  ;;  %v1789_v54 = vpop.permute.xlu2 %1788 }
 0x2cc   : > { %v1738_v34 = vadd.f32 %v1736_v0, %v1696_v36  ;;  %v1750_v20 = vadd.f32 %v1748_v63, %v1724_v55  ;;  %v1887_v36 = vmul.f32 %v1885_v6, %v4024_v60 }
 0x2ce   : > { %v1778_v17 = vadd.f32 %v1773_v32, %v1738_v34 }
 0x2d1   : > { %v1707_v53 = vpop.permute.xlu0 %1706  ;;  %v1761_v58 = vpop.permute.xlu1 %1760 }
 0x2d2   : > { %v1711_v38 = vadd.f32 %v1707_v53, %v1655_v11  ;;  %v1815_v4 = vpop.permute.xlu2 %1814  ;;  %v1765_v35 = vadd.f32 %v1761_v58, %v4112_v25 }
 0x2d4   : > { %v1745_v7 = vadd.f32 %v1743_v8, %v1711_v38 }
 0x2d9   : > { %v1759_v27 = vpop.permute.xlu0 %1758  ;;  %v1787_v50 = vpop.permute.xlu1 %1786 }
 0x2da   : > { %v1764_v33 = vadd.f32 %v1759_v27, %v1732_v37  ;;  %v1792_v40 = vadd.f32 %v1787_v50, %v1744_v43  ;;  %v1831_v62 = vpop.permute.xlu2 %1830  ;;  %v1793_v37 = vadd.f32 %v1789_v54, %v1745_v7 }
 0x2dc   : > { %v1820_v47 = vadd.f32 %v1815_v4, %v1764_v33 }
 0x2de   : > { %v4127_v44 = vadd.f32 %v1868_v57, %v1820_v47 }
 0x2e1   : > { %v1775_v16 = vpop.permute.xlu0 %1774  ;;  %v1803_v9 = vpop.permute.xlu1 %1802 }
 0x2e2   : > { %v1779_v10 = vadd.f32 %v1775_v16, %v1739_v18  ;;  %v1807_v14 = vadd.f32 %v1803_v9, %v1751_v42  ;;  %v1857_v56 = vpop.permute.xlu2 %1856 }
 0x2e4   : > { %v1835_v2 = vadd.f32 %v1831_v62, %v1779_v10 }
 0x2e6   : > { %v1877_v11 = vadd.f32 %v1875_v46, %v1835_v2 }
 0x2e9   : > { %v1801_v41 = vpop.permute.xlu0 %1800  ;;  %v1829_v49 = vpop.permute.xlu1 %1828 }
 0x2ea   : > { %v1806_v39 = vadd.f32 %v1801_v41, %v1750_v20  ;;  %v1834_v19 = vadd.f32 %v1829_v49, %v1778_v17  ;;  %v1899_v1 = vpop.permute.xlu2 %1898 }
 0x2ec   : > { %v1862_v5 = vadd.f32 %v1857_v56, %v1806_v39  ;;  %v1876_v28 = vadd.f32 %v1874_v22, %v1834_v19  ;;  %v2745_v22 = vmov 16.0  }
 0x2ed   : > { %2583 = vrcp.f32 %v2745_v22 }
 0x2ee   : > { %v1888_v24 = vadd.f32 %v1886_v23, %v1862_v5 }
 0x2f1   : > { %v1817_v31 = vpop.permute.xlu0 %1816  ;;  %v1845_v43 = vpop.permute.xlu1 %1844 }
 0x2f2   : > { %v1821_v13 = vadd.f32 %v1817_v31, %v1765_v35  ;;  %v1849_v26 = vadd.f32 %v1845_v43, %v1793_v37  ;;  %v1925_v12 = vpop.permute.xlu2 %1924 }
 0x2f3   : > { %v2584_v5 = vpop.eup %2583 }
 0x2f4   : > { %v1871_v32 = vadd.f32 %v1869_v29, %v1821_v13  ;;  %v1883_v45 = vadd.f32 %v1881_v21, %v1849_v26  ;;  %vm2034_vm4 = vweird.f32 %v2584_v5 }
 0x2f6   : > { %v1903_v38 = vadd.f32 %v1899_v1, %v1871_v32  ;;  %v2030_v1 = vmul.f32 16.0, %v2584_v5 }
 0x2f9   : > { %v1843_v15 = vpop.permute.xlu0 %1842  ;;  %v1897_v18 = vpop.permute.xlu1 %1896 }
 0x2fa   : > { %v1848_v42 = vadd.f32 %v1843_v15, %v1792_v40  ;;  %v1941_v25 = vpop.permute.xlu2 %1940  ;;  %v1902_v59 = vadd.f32 %v1897_v18, %v4127_v44 }
 0x2fc   : > { %v1882_v61 = vadd.f32 %v1880_v52, %v1848_v42 }
 0x2fe   : > { %v1930_v3 = vadd.f32 %v1925_v12, %v1882_v61 }
 0x301   : > { %v1859_v48 = vpop.permute.xlu0 %1858  ;;  %v1913_v0 = vpop.permute.xlu1 %1912 }
 0x302   : > { %v1863_v55 = vadd.f32 %v1859_v48, %v1807_v14  ;;  %v1967_v53 = vpop.permute.xlu2 %1966  ;;  %v1917_v16 = vadd.f32 %v1913_v0, %v1877_v11 }
 0x304   : > { %v1889_v54 = vadd.f32 %v1887_v36, %v1863_v55 }
 0x306   : > { %v1945_v39 = vadd.f32 %v1941_v25, %v1889_v54 }
 0x309   : > { %v1911_v63 = vpop.permute.xlu0 %1910  ;;  %v1939_v34 = vpop.permute.xlu1 %1938 }
 0x30a   : > { %v1916_v20 = vadd.f32 %v1911_v63, %v1876_v28  ;;  %v1983_v60 = vpop.permute.xlu2 %1982  ;;  %v1944_v2 = vadd.f32 %v1939_v34, %v1888_v24  ;;  %v2031_v28 = vsub.f32 1.0, %v2030_v1 }
 0x30c   : > { %v1972_v58 = vadd.f32 %v1967_v53, %v1916_v20  ;;  %v2032_v23 = vmul.f32 %v2584_v5, %v2031_v28 }
 0x30e   : > { %v2011_v8 = vsel %vm2004_vm3, %v1972_v58, 0.0  ;;  %v2033_v24 = vadd.f32 %v2584_v5, %v2032_v23  ;;  %v4206_v23 = vld [vmem:[%s4304_s3] ss:$0 sm:$0xff] }
 0x30f   : > { %2012 = vadd.xlane.f32.xlu1 %v2011_v8 }
 0x310   : > { %v4149_v35 = vsel %vm2034_vm4, %v2584_v5, %v2033_v24 }
 0x311   : > { %v1927_v51 = vpop.permute.xlu0 %1926  ;;  %v1955_v4 = vpop.permute.xlu1 %1954 }
 0x312   : > { %v1959_v7 = vadd.f32 %v1955_v4, %v1903_v38  ;;  %v1931_v27 = vadd.f32 %v1927_v51, %v1883_v45 }
 0x314   : > { %v2008_v50 = vsel %vm2004_vm3, %v1959_v7, 0.0  ;;  %v1987_v33 = vadd.f32 %v1983_v60, %v1931_v27 }
 0x315   : > { %2009 = vadd.xlane.f32.xlu0 %v2008_v50 }
 0x316   : > { %v2020_v47 = vsel %vm2004_vm3, %v1987_v33, 0.0 }
 0x319   : > { %v1953_v40 = vpop.permute.xlu0 %1952  ;;  %v1981_v14 = vpop.permute.xlu1 %1980 }
 0x31a   : > { %v1958_v62 = vadd.f32 %v1953_v40, %v1902_v59  ;;  %v1986_v46 = vadd.f32 %v1981_v14, %v1930_v3 }
 0x31c   : > { %v2005_v57 = vsel %vm2004_vm3, %v1958_v62, 0.0  ;;  %v2017_v49 = vsel %vm2004_vm3, %v1986_v46, 0.0 }
 0x31d   : > { %2021 = vadd.xlane.f32.xlu0 %v2020_v47  ;;  %2006 = vadd.xlane.f32.xlu2 %v2005_v57 }
 0x321   : > { %v1969_v9 = vpop.permute.xlu0 %1968  ;;  %v1997_v6 = vpop.permute.xlu1 %1996 }
 0x322   : > { %v1973_v10 = vadd.f32 %v1969_v9, %v1917_v16  ;;  %v2001_v11 = vadd.f32 %v1997_v6, %v1945_v39 }
 0x324   : > { %v2014_v56 = vsel %vm2004_vm3, %v1973_v10, 0.0  ;;  %v2026_v19 = vsel %vm2004_vm3, %v2001_v11, 0.0 }
 0x325   : > { %2015 = vadd.xlane.f32.xlu2 %v2014_v56 }
 0x329   : > { %v1995_v44 = vpop.permute.xlu0 %1994 }
 0x32a   : > { %v2000_v17 = vadd.f32 %v1995_v44, %v1944_v2 }
 0x32c   : > { %v2023_v41 = vsel %vm2004_vm3, %v2000_v17, 0.0 }
 0x32d   : > { %2024 = vadd.xlane.f32.xlu1 %v2023_v41  ;;  %2018 = vadd.xlane.f32.xlu2 %v2017_v49 }
 0x335   : > { %2027 = vadd.xlane.f32.xlu2 %v2026_v19 }
 0x382   : > { %v2013_v37 = vpop.xlane.xlu1 %2012 }
 0x383   : > { %v2038_v31 = vmul.f32 %v4149_v35, %v2013_v37 }
 0x385   : > { %v4152_v43 = vsub.f32 %v1972_v58, %v2038_v31 }
 0x387   : > { %v2054_v30 = vmul.f32 %v4152_v43, %v4152_v43 }
 0x388   : > { %v2010_v29 = vpop.xlane.xlu0 %2009 }
 0x389   : > { %v2037_v13 = vmul.f32 %v4149_v35, %v2010_v29  ;;  %v2066_v26 = vsel %vm2004_vm3, %v2054_v30, 0.0  ;;  %v4211_v30 = vld [vmem:[%s4305_s4] ss:$0 sm:$0xff] }
 0x38a   : > { %2067 = vadd.xlane.f32.xlu2 %v2066_v26 }
 0x38b   : > { %v4158_v21 = vsub.f32 %v1959_v7, %v2037_v13 }
 0x38d   : > { %v2053_v32 = vmul.f32 %v4158_v21, %v4158_v21 }
 0x38f   : > { %v2063_v45 = vsel %vm2004_vm3, %v2053_v32, 0.0 }
 0x390   : > { %v2022_v12 = vpop.xlane.xlu0 %2021  ;;  %2064 = vadd.xlane.f32.xlu1 %v2063_v45  ;;  %v2007_v15 = vpop.xlane.xlu2 %2006 }
 0x391   : > { %v2041_v18 = vmul.f32 %v4149_v35, %v2022_v12  ;;  %v2036_v52 = vmul.f32 %v4149_v35, %v2007_v15 }
 0x393   : > { %v4165_v42 = vsub.f32 %v1987_v33, %v2041_v18  ;;  %v4167_v61 = vsub.f32 %v1958_v62, %v2036_v52 }
 0x395   : > { %v2057_v25 = vmul.f32 %v4165_v42, %v4165_v42  ;;  %v2052_v48 = vmul.f32 %v4167_v61, %v4167_v61 }
 0x397   : > { %v2075_v0 = vsel %vm2004_vm3, %v2057_v25, 0.0  ;;  %v2060_v36 = vsel %vm2004_vm3, %v2052_v48, 0.0 }
 0x398   : > { %2076 = vadd.xlane.f32.xlu2 %v2075_v0  ;;  %2061 = vadd.xlane.f32.xlu0 %v2060_v36  ;;  %v2016_v55 = vpop.xlane.xlu2 %2015 }
 0x399   : > { %v2039_v54 = vmul.f32 %v4149_v35, %v2016_v55 }
 0x39b   : > { %v4176_v63 = vsub.f32 %v1973_v10, %v2039_v54 }
 0x39d   : > { %v2055_v34 = vmul.f32 %v4176_v63, %v4176_v63 }
 0x39f   : > { %v2069_v20 = vsel %vm2004_vm3, %v2055_v34, 0.0 }
 0x3a0   : > { %v2025_v53 = vpop.xlane.xlu1 %2024  ;;  %2070 = vadd.xlane.f32.xlu0 %v2069_v20  ;;  %v2019_v58 = vpop.xlane.xlu2 %2018 }
 0x3a1   : > { %v2042_v8 = vmul.f32 %v4149_v35, %v2025_v53  ;;  %v2040_v38 = vmul.f32 %v4149_v35, %v2019_v58 }
 0x3a3   : > { %v4183_v51 = vsub.f32 %v2000_v17, %v2042_v8  ;;  %v4185_v4 = vsub.f32 %v1986_v46, %v2040_v38 }
 0x3a5   : > { %v2058_v7 = vmul.f32 %v4183_v51, %v4183_v51  ;;  %v2056_v27 = vmul.f32 %v4185_v4, %v4185_v4 }
 0x3a7   : > { %v2078_v50 = vsel %vm2004_vm3, %v2058_v7, 0.0  ;;  %v2072_v60 = vsel %vm2004_vm3, %v2056_v27, 0.0 }
 0x3a8   : > { %2079 = vadd.xlane.f32.xlu0 %v2078_v50  ;;  %2073 = vadd.xlane.f32.xlu1 %v2072_v60  ;;  %v2028_v59 = vpop.xlane.xlu2 %2027 }
 0x3a9   : > { %v2043_v33 = vmul.f32 %v4149_v35, %v2028_v59 }
 0x3ab   : > { %v4194_v40 = vsub.f32 %v2001_v11, %v2043_v33 }
 0x3ad   : > { %v2059_v62 = vmul.f32 %v4194_v40, %v4194_v40 }
 0x3af   : > { %v2081_v47 = vsel %vm2004_vm3, %v2059_v62, 0.0 }
 0x3b0   : > { %2082 = vadd.xlane.f32.xlu1 %v2081_v47 }
 0x3fd   : > { %v2068_v57 = vpop.xlane.xlu2 %2067 }
 0x3fe   : > { %v2086_v16 = vmul.f32 %v2068_v57, %v4149_v35 }
 0x400   : > { %v2094_v9 = vadd.f32 1e-05, %v2086_v16 }
 0x402   : > { %2585 = vrsqrt.f32 %v2094_v9  ;;  %vm2126_vm6 = vweird.f32 %v2094_v9 }
 0x403   : > { %v2065_v10 = vpop.xlane.xlu1 %2064 }
 0x404   : > { %v2085_v14 = vmul.f32 %v2065_v10, %v4149_v35 }
 0x406   : > { %v2093_v56 = vadd.f32 1e-05, %v2085_v14 }
 0x408   : > { %v2586_v3 = vpop.eup %2585  ;;  %2587 = vrsqrt.f32 %v2093_v56  ;;  %vm2116_vm9 = vweird.f32 %v2093_v56 }
 0x409   : > { %v2121_v2 = vmul.f32 %v2586_v3, %v2094_v9  ;;  %vm2127_vm5 = vweird.f32 %v2586_v3 }
 0x40a   : > { %vm2128_vm7 = vmor %vm2126_vm6, %vm2127_vm5 }
 0x40b   : > { %v2122_v46 = vmul.f32 %v2586_v3, %v2121_v2  ;;  %v2062_v44 = vpop.xlane.xlu0 %2061  ;;  %v2077_v17 = vpop.xlane.xlu2 %2076 }
 0x40c   : > { %v2084_v41 = vmul.f32 %v2062_v44, %v4149_v35  ;;  %v2089_v49 = vmul.f32 %v2077_v17, %v4149_v35 }
 0x40d   : > { %v2123_v6 = vmul.f32 0.5, %v2122_v46 }
 0x40e   : > { %v2588_v39 = vpop.eup %2587  ;;  %v2092_v11 = vadd.f32 1e-05, %v2084_v41  ;;  %v2097_v19 = vadd.f32 1e-05, %v2089_v49 }
 0x40f   : > { %v2124_v22 = vsub.f32 1.5, %v2123_v6  ;;  %v2111_v5 = vmul.f32 %v2588_v39, %v2093_v56  ;;  %vm2117_vm8 = vweird.f32 %v2588_v39 }
 0x410   : > { %2589 = vrsqrt.f32 %v2092_v11  ;;  %vm2118_vm10 = vmor %vm2116_vm9, %vm2117_vm8  ;;  %vm2106_vm13 = vweird.f32 %v2092_v11  ;;  %vm2156_vm15 = vweird.f32 %v2097_v19 }
 0x411   : > { %v2125_v1 = vmul.f32 %v2586_v3, %v2124_v22  ;;  %v2112_v28 = vmul.f32 %v2588_v39, %v2111_v5  ;;  %2591 = vrsqrt.f32 %v2097_v19 }
 0x413   : > { %v2129_v24 = vsel %vm2128_vm7, %v2586_v3, %v2125_v1  ;;  %v2113_v37 = vmul.f32 0.5, %v2112_v28  ;;  %v2071_v31 = vpop.xlane.xlu0 %2070 }
 0x414   : > { %v2182_v29 = vmul.f32 %v2129_v24, %v4152_v43  ;;  %v2087_v13 = vmul.f32 %v2071_v31, %v4149_v35 }
 0x415   : > { %v2114_v26 = vsub.f32 1.5, %v2113_v37 }
 0x416   : > { %v2590_v32 = vpop.eup %2589  ;;  %v2193_v45 = vmul.f32 %v4206_v23, %v2182_v29  ;;  %v4216_v12 = vadd.f32 1e-05, %v2087_v13 }
 0x417   : > { %v2592_v15 = vpop.eup %2591  ;;  %v2115_v18 = vmul.f32 %v2588_v39, %v2114_v26  ;;  %v2101_v52 = vmul.f32 %v2590_v32, %v2092_v11  ;;  %vm2107_vm11 = vweird.f32 %v2590_v32 }
 0x418   : > { %v2204_v25 = vadd.f32 %v4211_v30, %v2193_v45  ;;  %v2151_v48 = vmul.f32 %v2592_v15, %v2097_v19  ;;  %2593 = vrsqrt.f32 %v4216_v12  ;;  %vm2157_vm12 = vweird.f32 %v2592_v15  ;;  %vm2108_vm14 = vmor %vm2106_vm13, %vm2107_vm11 }
 0x419   : > { %v2119_v43 = vsel %vm2118_vm10, %v2588_v39, %v2115_v18  ;;  %v2102_v0 = vmul.f32 %v2590_v32, %v2101_v52  ;;  %vm2158_vm0 = vmor %vm2156_vm15, %vm2157_vm12  ;;  %vm2136_vm2 = vweird.f32 %v4216_v12 }
 0x41a   : > { %v2212_v36 = vmax.f32 %v2204_v25, 0.0  ;;  %v2181_v55 = vmul.f32 %v2119_v43, %v4158_v21  ;;  %v2152_v54 = vmul.f32 %v2592_v15, %v2151_v48 }
 0x41b   : > { %v2103_v34 = vmul.f32 0.5, %v2102_v0  ;;  %v2080_v20 = vpop.xlane.xlu0 %2079  ;;  %v2074_v53 = vpop.xlane.xlu1 %2073 }
 0x41c   : > { %2220 = vst.msk [vmem:[%s4223_s29 + $0x10] sm:$0xff] %vm2004_vm3, %v2212_v36  ;;  %v2192_v58 = vmul.f32 %v4206_v23, %v2181_v55  ;;  %v2153_v8 = vmul.f32 0.5, %v2152_v54  ;;  %v2090_v38 = vmul.f32 %v2080_v20, %v4149_v35  ;;  %v2088_v7 = vmul.f32 %v2074_v53, %v4149_v35 }
 0x41d   : > { %v2104_v27 = vsub.f32 1.5, %v2103_v34 }
 0x41e   : > { %v2594_v21 = vpop.eup %2593  ;;  %v2203_v50 = vadd.f32 %v4211_v30, %v2192_v58  ;;  %v2154_v60 = vsub.f32 1.5, %v2153_v8  ;;  %v2098_v59 = vadd.f32 1e-05, %v2090_v38  ;;  %v2096_v33 = vadd.f32 1e-05, %v2088_v7 }
 0x41f   : > { %v2105_v62 = vmul.f32 %v2590_v32, %v2104_v27  ;;  %v2131_v47 = vmul.f32 %v2594_v21, %v4216_v12  ;;  %vm2137_vm1 = vweird.f32 %v2594_v21 }
 0x420   : > { %v2211_v57 = vmax.f32 %v2203_v50, 0.0  ;;  %v2155_v16 = vmul.f32 %v2592_v15, %v2154_v60  ;;  %2595 = vrsqrt.f32 %v2098_v59  ;;  %vm2138_vm4 = vmor %vm2136_vm2, %vm2137_vm1  ;;  %vm2166_vm7 = vweird.f32 %v2098_v59 }
 0x421   : > { %v2109_v9 = vsel %vm2108_vm14, %v2590_v32, %v2105_v62  ;;  %v2132_v10 = vmul.f32 %v2594_v21, %v2131_v47  ;;  %2597 = vrsqrt.f32 %v2096_v33  ;;  %vm2146_vm9 = vweird.f32 %v2096_v33 }
 0x422   : > { %2219 = vst.msk [vmem:[%s4223_s29 + $0x8] sm:$0xff] %vm2004_vm3, %v2211_v57  ;;  %v2180_v14 = vmul.f32 %v2109_v9, %v4167_v61  ;;  %v2159_v56 = vsel %vm2158_vm0, %v2592_v15, %v2155_v16 }
 0x423   : > { %v2185_v3 = vmul.f32 %v2159_v56, %v4165_v42  ;;  %v2133_v2 = vmul.f32 0.5, %v2132_v10  ;;  %v2083_v46 = vpop.xlane.xlu1 %2082 }
 0x424   : > { %v2191_v44 = vmul.f32 %v4206_v23, %v2180_v14  ;;  %v2091_v17 = vmul.f32 %v2083_v46, %v4149_v35 }
 0x425   : > { %v2196_v41 = vmul.f32 %v4206_v23, %v2185_v3  ;;  %v2134_v49 = vsub.f32 1.5, %v2133_v2 }
 0x426   : > { %v2596_v6 = vpop.eup %2595  ;;  %v2202_v39 = vadd.f32 %v4211_v30, %v2191_v44  ;;  %v2099_v11 = vadd.f32 1e-05, %v2091_v17 }
 0x427   : > { %v2598_v61 = vpop.eup %2597  ;;  %v2207_v19 = vadd.f32 %v4211_v30, %v2196_v41  ;;  %v2135_v42 = vmul.f32 %v2594_v21, %v2134_v49  ;;  %v2161_v22 = vmul.f32 %v2596_v6, %v2098_v59  ;;  %vm2167_vm5 = vweird.f32 %v2596_v6 }
 0x428   : > { %v2210_v5 = vmax.f32 %v2202_v39, 0.0  ;;  %v2141_v35 = vmul.f32 %v2598_v61, %v2096_v33  ;;  %2599 = vrsqrt.f32 %v2099_v11  ;;  %vm2147_vm6 = vweird.f32 %v2598_v61  ;;  %vm2168_vm8 = vmor %vm2166_vm7, %vm2167_vm5 }
 0x429   : > { %v2215_v1 = vmax.f32 %v2207_v19, 0.0  ;;  %v2139_v28 = vsel %vm2138_vm4, %v2594_v21, %v2135_v42  ;;  %v2162_v24 = vmul.f32 %v2596_v6, %v2161_v22  ;;  %vm2148_vm10 = vmor %vm2146_vm9, %vm2147_vm6  ;;  %vm2176_vm12 = vweird.f32 %v2099_v11 }
 0x42a   : > { %2218 = vst.msk [vmem:[%s4223_s29] sm:$0xff] %vm2004_vm3, %v2210_v5  ;;  %v2183_v37 = vmul.f32 %v2139_v28, %v4176_v63  ;;  %v2142_v31 = vmul.f32 %v2598_v61, %v2141_v35 }
 0x42b   : > { %2223 = vst.msk [vmem:[%s4223_s29 + $0x28] sm:$0xff] %vm2004_vm3, %v2215_v1  ;;  %v2163_v29 = vmul.f32 0.5, %v2162_v24 }
 0x42c   : > { %v2194_v13 = vmul.f32 %v4206_v23, %v2183_v37  ;;  %v2143_v26 = vmul.f32 0.5, %v2142_v31 }
 0x42d   : > { %v2164_v32 = vsub.f32 1.5, %v2163_v29 }
 0x42e   : > { %v2600_v45 = vpop.eup %2599  ;;  %v2205_v12 = vadd.f32 %v4211_v30, %v2194_v13  ;;  %v2144_v15 = vsub.f32 1.5, %v2143_v26 }
 0x42f   : > { %v2165_v18 = vmul.f32 %v2596_v6, %v2164_v32  ;;  %v2171_v52 = vmul.f32 %v2600_v45, %v2099_v11  ;;  %vm2177_vm11 = vweird.f32 %v2600_v45 }
 0x430   : > { %v2213_v25 = vmax.f32 %v2205_v12, 0.0  ;;  %v2145_v63 = vmul.f32 %v2598_v61, %v2144_v15  ;;  %vm2178_vm13 = vmor %vm2176_vm12, %vm2177_vm11 }
 0x431   : > { %v2169_v48 = vsel %vm2168_vm8, %v2596_v6, %v2165_v18  ;;  %v2172_v43 = vmul.f32 %v2600_v45, %v2171_v52 }
 0x432   : > { %2221 = vst.msk [vmem:[%s4223_s29 + $0x18] sm:$0xff] %vm2004_vm3, %v2213_v25  ;;  %v2186_v0 = vmul.f32 %v2169_v48, %v4183_v51  ;;  %v2149_v36 = vsel %vm2148_vm10, %v2598_v61, %v2145_v63 }
 0x433   : > { %v2184_v55 = vmul.f32 %v2149_v36, %v4185_v4  ;;  %v2173_v54 = vmul.f32 0.5, %v2172_v43 }
 0x434   : > { %v2197_v34 = vmul.f32 %v4206_v23, %v2186_v0 }
 0x435   : > { %v2195_v20 = vmul.f32 %v4206_v23, %v2184_v55  ;;  %v2174_v53 = vsub.f32 1.5, %v2173_v54 }
 0x436   : > { %v2208_v58 = vadd.f32 %v4211_v30, %v2197_v34 }
 0x437   : > { %v2206_v8 = vadd.f32 %v4211_v30, %v2195_v20  ;;  %v2175_v38 = vmul.f32 %v2600_v45, %v2174_v53 }
 0x438   : > { %v2216_v51 = vmax.f32 %v2208_v58, 0.0 }
 0x439   : > { %v2214_v4 = vmax.f32 %v2206_v8, 0.0  ;;  %v2179_v7 = vsel %vm2178_vm13, %v2600_v45, %v2175_v38 }
 0x43a   : > { %2224 = vst.msk [vmem:[%s4223_s29 + $0x30] sm:$0xff] %vm2004_vm3, %v2216_v51  ;;  %v2187_v27 = vmul.f32 %v2179_v7, %v4194_v40 }
 0x43b   : > { %2222 = vst.msk [vmem:[%s4223_s29 + $0x20] sm:$0xff] %vm2004_vm3, %v2214_v4 }
 0x43c   : > { %v2198_v21 = vmul.f32 %v4206_v23, %v2187_v27 }
 0x43e   : > { %v2209_v50 = vadd.f32 %v4211_v30, %v2198_v21 }
 0x440   : > { %v2217_v60 = vmax.f32 %v2209_v50, 0.0 }
 0x442   : > { %2225 = vst.msk [vmem:[%s4223_s29 + $0x38] sm:$0xff] %vm2004_vm3, %v2217_v60 }
 0x443   : > { %2688 = shalt.err (!%p2685_p8)
}
 0x444   : > { %s2746_s26 = smov 128   ;;  %s2747_s27 = smov 8  }
 0x445   : > { %2515 = dma.vmem_to_hbm [thread:$0]  (%p2830_p11), %s2240_s22, 1024, %s2242_s12, %s2227_s9, %s2746_s26, %s2746_s26, %s2747_s27  }
 0x446 PF: > { %s2256_s8 = sand.u32 1, %s2723_s18   ;;  %p4318_p9 = scmp.ge.s32.totalorder %s2735_s21, 2 }
 0x447   : > { %s2257_s1 = scalar_lea.sflag [#allocation5], %s2256_s8 }
 0x448   : > { %p2529_p10 = pnand %p4318_p9, %p2834_p12 }
 0x44a   : > { %p2530_p1 = pneg %p2529_p10 }
 0x44c   : > { %2718 = dma.done.wait (%p2530_p1), %s2257_s1, 1024  }
 0x44d   : > { %2720 = vsyncadd (%p2530_p1), %s2257_s1, 4294966272  ;;  %s4319_s23 = sld [smem:[#allocation15_spill]]  ;;  %p20_p2 = scmp.ge.s32.totalorder %s2803_s24, 4  }
 0x44e   : > { %s4320_s18 = smov %s2727_s19  ;;  %s4321_s19 = smov %s2731_s20 }
 0x44f   : > { %s4323_s21 = smov %s2803_s24  ;;  %22 = sbr.rel (!%p20_p2) target bundleno = 10 (0xa), region = 98 }
 0x453   : > { %s4322_s20 = smov %s4319_s23 }
 0x454   :  { %2263 = vsyncpa [#allocation4], 1 }
 0x455   :  { %2265 = vsyncpa [#allocation4 + $0x1], 1 }
 0x456   :  { %2266 = vsyncpa [#allocation5], 1 }
 0x457   :  { %2268 = vsyncpa [#allocation5 + $0x1], 1 }
 0x458   :  { %2269 = vsyncpa [#allocation6], 1 }
 0x459   :  { %2271 = vsyncpa [#allocation6 + $0x1], 1 }
 0x45a   :  { %2272 = vsyncpa [#allocation7], 1 }
 0x45b   :  { %2274 = vsyncpa [#allocation7 + $0x1], 1 }

</bundles_post_ra>
